<compile_context>
chip_gen: v5e
topology: v5e:2x2
jax: 0.10.0
libtpu: 0.0.40
codegen_flags: <defaults>
</compile_context>

<pallas_src>
import functools

import jax
import jax.numpy as jnp
from jax.experimental import pallas as pl
from jax.experimental.pallas import tpu as pltpu

C_OUT_PAD = 128   # output-channel dim padded to one lane width (lane-dense I/O)
TM_MAX = 256      # row tile of the im2col matmul (multiple of 16)


def _round_up(x, m):
    return (x + m - 1) // m * m


# ----------------------------------------------------------------------------
# Pallas kernels
# ----------------------------------------------------------------------------
def _make_conv_kernel(res_mode, relu):
    """matmul + bias (+ residual | + fused 1x1 downsample conv) (+ relu).

    res_mode: None   -> y = A@W + b
              "add"  -> y = A@W + b + R
              "conv" -> y = A@W + b + (As@Ws + bs)
    MXU inputs are bf16, accumulation and epilogue in f32, output bf16.
    """

    def kernel(*refs):
        if res_mode == "conv":
            a_ref, w_ref, b_ref, as_ref, ws_ref, bs_ref, o_ref = refs
        elif res_mode == "add":
            a_ref, w_ref, b_ref, r_ref, o_ref = refs
        else:
            a_ref, w_ref, b_ref, o_ref = refs
        y = jnp.dot(a_ref[...], w_ref[...], preferred_element_type=jnp.float32)
        y = y + b_ref[...]
        if res_mode == "add":
            y = y + r_ref[...].astype(jnp.float32)
        elif res_mode == "conv":
            ys = jnp.dot(as_ref[...], ws_ref[...],
                         preferred_element_type=jnp.float32)
            y = y + ys + bs_ref[...]
        if relu:
            y = jnp.maximum(y, 0.0)
        o_ref[...] = y.astype(o_ref.dtype)

    return kernel


def _pool_fc_kernel(x_ref, w_ref, b_ref, o_ref):
    """Global average pool (1/(H*W) folded into w) + linear layer."""
    x = x_ref[...].astype(jnp.float32)            # (N, H*W, C)
    pooled = jnp.sum(x, axis=1)                   # (N, C)
    y = jnp.dot(pooled, w_ref[...], preferred_element_type=jnp.float32)
    o_ref[...] = (y + b_ref[...]).astype(o_ref.dtype)


# ----------------------------------------------------------------------------
# Wrappers (layout glue + pallas_call plumbing)
# ----------------------------------------------------------------------------
def _im2col(x, ksize, stride, pad):
    """x: (N, H, W, C) -> (N*Ho*Wo, ksize*ksize*C). ksize/stride/pad are ints."""
    n, h, w, c = x.shape
    xp = jnp.pad(x, ((0, 0), (pad, pad), (pad, pad), (0, 0)))
    ho = (h + 2 * pad - ksize) // stride + 1
    wo = (w + 2 * pad - ksize) // stride + 1
    cols = []
    for kh in range(ksize):
        for kw in range(ksize):
            cols.append(xp[:, kh:kh + ho * stride:stride,
                           kw:kw + wo * stride:stride, :])
    patches = jnp.concatenate(cols, axis=-1)      # (N, Ho, Wo, K*K*C)
    return patches.reshape(n * ho * wo, ksize * ksize * c), (n, ho, wo)


def conv_call(x, w4, bias, *, stride, pad, relu, residual=None, shortcut=None):
    """conv2d (BN scale pre-folded into w4) -> +bias -> (+res / +1x1 conv) -> relu."""
    kh, kw, cin_w, cout = w4.shape
    # Drop zero-padded lanes from the reduction dim (keeps output lane-dense,
    # removes up to 8x wasted MXU work / im2col HBM traffic on early stages).
    if x.shape[-1] != cin_w:
        x = x[..., :cin_w]
    a, (n, ho, wo) = _im2col(x, kh, stride, pad)
    wm = w4.reshape(kh * kw * cin_w, cout)
    m, k = a.shape

    m16 = _round_up(m, 16)
    tm = min(TM_MAX, m16)
    mp = _round_up(m16, tm)

    def pad_rows(arr):
        if arr.shape[0] == mp:
            return arr
        return jnp.pad(arr, ((0, mp - arr.shape[0]), (0, 0)))

    a = pad_rows(a)
    operands = [a, wm, bias.reshape(1, cout).astype(jnp.float32)]
    in_specs = [
        pl.BlockSpec((tm, k), lambda i: (i, 0)),
        pl.BlockSpec((k, cout), lambda i: (0, 0)),
        pl.BlockSpec((1, cout), lambda i: (0, 0)),
    ]
    flops = 2 * mp * k * cout

    res_mode = None
    if residual is not None:
        res_mode = "add"
        r = residual.reshape(m, residual.shape[-1])
        if r.shape[-1] != cout:
            r = jnp.pad(r, ((0, 0), (0, cout - r.shape[-1])))
        r = pad_rows(r)
        operands.append(r)
        in_specs.append(pl.BlockSpec((tm, cout), lambda i: (i, 0)))
    elif shortcut is not None:
        res_mode = "conv"
        xs, ws4, bs, s_stride = shortcut
        cin_s = ws4.shape[2]
        if xs.shape[-1] != cin_s:
            xs = xs[..., :cin_s]
        a_sc, _ = _im2col(xs, 1, s_stride, 0)
        ks = a_sc.shape[1]
        a_sc = pad_rows(a_sc)
        operands += [a_sc, ws4.reshape(ks, cout),
                     bs.reshape(1, cout).astype(jnp.float32)]
        in_specs += [
            pl.BlockSpec((tm, ks), lambda i: (i, 0)),
            pl.BlockSpec((ks, cout), lambda i: (0, 0)),
            pl.BlockSpec((1, cout), lambda i: (0, 0)),
        ]
        flops += 2 * mp * ks * cout

    bytes_accessed = sum(int(op.size) * op.dtype.itemsize for op in operands)
    bytes_accessed += mp * cout * 2   # bf16 output

    out = pl.pallas_call(
        _make_conv_kernel(res_mode, relu),
        out_shape=jax.ShapeDtypeStruct((mp, cout), jnp.bfloat16),
        grid=(mp // tm,),
        in_specs=in_specs,
        out_specs=pl.BlockSpec((tm, cout), lambda i: (i, 0)),
        compiler_params=pltpu.CompilerParams(
            dimension_semantics=("parallel",)),
        cost_estimate=pl.CostEstimate(
            flops=flops, transcendentals=0, bytes_accessed=bytes_accessed),
    )(*operands)
    return out[:m].reshape(n, ho, wo, cout)


def pool_fc(x, fc_w, fc_b):
    n, h, w, c = x.shape
    hw = h * w
    ncp = fc_w.shape[1]
    xr = x.reshape(n, hw, c)
    w_scaled = fc_w.astype(jnp.float32) * (1.0 / hw)   # fold mean into weight
    return pl.pallas_call(
        _pool_fc_kernel,
        out_shape=jax.ShapeDtypeStruct((n, ncp), jnp.float32),
        grid=(1,),
        in_specs=[
            pl.BlockSpec((n, hw, c), lambda i: (0, 0, 0)),
            pl.BlockSpec((c, ncp), lambda i: (0, 0)),
            pl.BlockSpec((1, ncp), lambda i: (0, 0)),
        ],
        out_specs=pl.BlockSpec((n, ncp), lambda i: (0, 0)),
        compiler_params=pltpu.CompilerParams(
            dimension_semantics=("arbitrary",)),
    )(xr, w_scaled, fc_b.reshape(1, ncp).astype(jnp.float32))


# ----------------------------------------------------------------------------
# Parameter construction (deterministic, synthetic; BN folded, Cout padded)
# ----------------------------------------------------------------------------
def _kaiming_conv(key, kh, kw, cin, cout):
    fan_in = kh * kw * cin
    std = (2.0 / fan_in) ** 0.5
    return jax.random.normal(key, (kh, kw, cin, cout), jnp.float32) * std


def _bn_scale_bias(key, c, eps=1e-5):
    """Eval-mode BatchNorm folded into per-channel (scale, bias)."""
    k1, k2, k3, k4 = jax.random.split(key, 4)
    gamma = 1.0 + 0.1 * jax.random.normal(k1, (c,), jnp.float32)
    beta = 0.1 * jax.random.normal(k2, (c,), jnp.float32)
    mean = 0.1 * jax.random.normal(k3, (c,), jnp.float32)
    var = 1.0 + 0.1 * jnp.abs(jax.random.normal(k4, (c,), jnp.float32))
    scale = gamma * jax.lax.rsqrt(var + eps)
    bias = beta - mean * scale
    return scale, bias


def _fold_pad_conv(w, scale, bias):
    """Fold BN scale into conv weight; zero-pad Cout to 128; keep true Cin; bf16."""
    kh, kw, cin, cout = w.shape
    wf = w * scale.reshape(1, 1, 1, cout)
    wp = jnp.zeros((kh, kw, cin, C_OUT_PAD), jnp.float32).at[..., :cout].set(wf)
    bp = jnp.zeros((C_OUT_PAD,), jnp.float32).at[:cout].set(bias)
    return wp.astype(jnp.bfloat16), bp


def _basic_block_params(key, cin, cout, stride):
    ks = jax.random.split(key, 6)
    w1, b1 = _fold_pad_conv(_kaiming_conv(ks[0], 3, 3, cin, cout),
                            *_bn_scale_bias(ks[1], cout))
    w2, b2 = _fold_pad_conv(_kaiming_conv(ks[2], 3, 3, cout, cout),
                            *_bn_scale_bias(ks[3], cout))
    p = {"w1": w1, "b1": b1, "w2": w2, "b2": b2}
    has_down = (stride != 1) or (cin != cout)
    if has_down:
        wd, bd = _fold_pad_conv(_kaiming_conv(ks[4], 1, 1, cin, cout),
                                *_bn_scale_bias(ks[5], cout))
        p["wd"], p["bd"] = wd, bd
    return p, (stride, has_down)


def build_model(key, n_size=1, num_classes=10):
    channel_in = 16
    n_blocks = 3 * n_size
    keys = jax.random.split(key, 4 + n_blocks)

    stem_w, stem_b = _fold_pad_conv(
        _kaiming_conv(keys[0], 3, 3, 3, channel_in),
        *_bn_scale_bias(keys[1], channel_in))
    params = {"stem_w": stem_w, "stem_b": stem_b}

    blocks, cfgs = [], []
    inplane = channel_in
    ki = 2
    for planes, stride in [(channel_in, 1), (channel_in * 2, 2),
                           (channel_in * 4, 2)]:
        for s in [stride] + [1] * (n_size - 1):
            p, cfg = _basic_block_params(keys[ki], inplane, planes, s)
            blocks.append(p)
            cfgs.append(cfg)
            inplane = planes
            ki += 1
    params["blocks"] = blocks

    cfeat = channel_in * 4
    fc_w = (jax.random.normal(keys[ki], (cfeat, num_classes), jnp.float32)
            * (1.0 / cfeat ** 0.5))
    fc_b = 0.01 * jax.random.normal(keys[ki + 1], (num_classes,), jnp.float32)
    params["fc_w"] = (jnp.zeros((C_OUT_PAD, C_OUT_PAD), jnp.float32)
                      .at[:cfeat, :num_classes].set(fc_w))
    params["fc_b"] = (jnp.zeros((C_OUT_PAD,), jnp.float32)
                      .at[:num_classes].set(fc_b))

    config = (num_classes, tuple(cfgs))   # static (hashable): strides etc.
    return params, config


# ----------------------------------------------------------------------------
# Forward pass
# ----------------------------------------------------------------------------
def _block_forward(x, p, stride, has_down):
    out1 = conv_call(x, p["w1"], p["b1"], stride=stride, pad=1, relu=True)
    if has_down:
        out = conv_call(out1, p["w2"], p["b2"], stride=1, pad=1, relu=True,
                        shortcut=(x, p["wd"], p["bd"], stride))
    else:
        out = conv_call(out1, p["w2"], p["b2"], stride=1, pad=1, relu=True,
                        residual=x)
    # TODO(synk): genotype-defined attention op of the abstract `block` is
    # unspecified in the reference code and therefore omitted.
    return out


@functools.partial(jax.jit, static_argnums=(2,))
def cifar_attention_resnet_forward(params, x_nchw, config):
    num_classes, block_cfgs = config
    x = jnp.transpose(x_nchw, (0, 2, 3, 1)).astype(jnp.bfloat16)  # NCHW->NHWC
    x = conv_call(x, params["stem_w"], params["stem_b"],
                  stride=1, pad=1, relu=True)
    for p, (stride, has_down) in zip(params["blocks"], block_cfgs):
        x = _block_forward(x, p, stride, has_down)
    logits = pool_fc(x, params["fc_w"], params["fc_b"])
    return logits[:, :num_classes]


# ----------------------------------------------------------------------------
# Demo
# ----------------------------------------------------------------------------
if __name__ == "__main__":
    key = jax.random.PRNGKey(0)
    k_params, k_x = jax.random.split(key)

    # Small shapes: batch=2, 3 input channels (RGB), 16x16 spatial, n_size=1.
    params, config = build_model(k_params, n_size=1, num_classes=10)
    x = jax.random.normal(k_x, (2, 3, 16, 16), jnp.float32)  # NCHW like PyTorch

    logits = cifar_attention_resnet_forward(params, x, config)
    jax.block_until_ready(logits)
    assert logits.shape == (2, 10)
    assert bool(jnp.all(jnp.isfinite(logits)))
    print("KERNEL_OK")
</pallas_src>

<mosaic_0001>
module attributes {stable_mosaic.version = 11 : i64} {
  func.func @kernel(%arg0: i32, %arg1: memref<256x27xbf16, #tpu.memory_space<vmem>>, %arg2: memref<27x128xbf16, #tpu.memory_space<vmem>>, %arg3: memref<1x128xf32, #tpu.memory_space<vmem>>, %arg4: memref<256x128xbf16, #tpu.memory_space<vmem>>) attributes {dimension_semantics = [#tpu.dimension_semantics<parallel>], iteration_bounds = array<i64: 2>, scalar_prefetch = 0 : i64, scratch_operands = 0 : i64, tpu.core_type = #tpu.core_type<tc>, window_params = [{transform_indices = @transform_0, window_bounds = array<i64: 256, 27>}, {pipeline_mode = #tpu.pipeline_mode<synchronous>, transform_indices = @transform_1, window_bounds = array<i64: 27, 128>}, {pipeline_mode = #tpu.pipeline_mode<synchronous>, transform_indices = @transform_2, window_bounds = array<i64: 1, 128>}, {transform_indices = @transform_3, window_bounds = array<i64: 256, 128>}]} {
    %c0 = arith.constant 0 : index
    %c0_0 = arith.constant 0 : index
    %0 = vector.load %arg1[%c0, %c0_0] : memref<256x27xbf16, #tpu.memory_space<vmem>>, vector<256x27xbf16>
    %c0_1 = arith.constant 0 : index
    %c0_2 = arith.constant 0 : index
    %1 = vector.load %arg2[%c0_1, %c0_2] : memref<27x128xbf16, #tpu.memory_space<vmem>>, vector<27x128xbf16>
    %cst = arith.constant dense<0.000000e+00> : vector<256x128xf32>
    %2 = tpu.matmul %0, %1, %cst {dimension_numbers = #tpu.dot_dimension_numbers<[1], [0], [0], [1], [0, 0, 1, 1], [], []>} : vector<256x27xbf16>, vector<27x128xbf16>, vector<256x128xf32> -> vector<256x128xf32>
    %c0_3 = arith.constant 0 : index
    %c0_4 = arith.constant 0 : index
    %3 = vector.load %arg3[%c0_3, %c0_4] : memref<1x128xf32, #tpu.memory_space<vmem>>, vector<1x128xf32>
    %4 = vector.broadcast %3 : vector<1x128xf32> to vector<256x128xf32>
    %5 = arith.addf %2, %4 : vector<256x128xf32>
    %cst_5 = arith.constant 0.000000e+00 : f32
    %6 = vector.broadcast %cst_5 : f32 to vector<256x128xf32>
    %7 = arith.maximumf %5, %6 : vector<256x128xf32>
    %8 = arith.truncf %7 : vector<256x128xf32> to vector<256x128xbf16>
    %c0_6 = arith.constant 0 : index
    %c0_7 = arith.constant 0 : index
    %9 = vector.load %arg4[%c0_6, %c0_7] : memref<256x128xbf16, #tpu.memory_space<vmem>>, vector<256x128xbf16>
    tpu.vector_store %arg4[%c0_6, %c0_7], %8 {strides = array<i32>} : memref<256x128xbf16, #tpu.memory_space<vmem>>, vector<256x128xbf16>,
    return
  }
  func.func @transform_0(%arg0: i32) -> (i32, i32) {
    %c0_i32 = arith.constant 0 : i32
    %c0_i32_0 = arith.constant 0 : i32
    return %arg0, %c0_i32 : i32, i32
  }
  func.func @transform_1(%arg0: i32) -> (i32, i32) {
    %c0_i32 = arith.constant 0 : i32
    %c0_i32_0 = arith.constant 0 : i32
    %c0_i32_1 = arith.constant 0 : i32
    return %c0_i32, %c0_i32_0 : i32, i32
  }
  func.func @transform_2(%arg0: i32) -> (i32, i32) {
    %c0_i32 = arith.constant 0 : i32
    %c0_i32_0 = arith.constant 0 : i32
    %c0_i32_1 = arith.constant 0 : i32
    return %c0_i32, %c0_i32_0 : i32, i32
  }
  func.func @transform_3(%arg0: i32) -> (i32, i32) {
    %c0_i32 = arith.constant 0 : i32
    %c0_i32_0 = arith.constant 0 : i32
    return %arg0, %c0_i32 : i32, i32
  }
}

module attributes {stable_mosaic.version = 11 : i64} {
  func.func @kernel(%arg0: i32, %arg1: memref<256x144xbf16, #tpu.memory_space<vmem>>, %arg2: memref<144x128xbf16, #tpu.memory_space<vmem>>, %arg3: memref<1x128xf32, #tpu.memory_space<vmem>>, %arg4: memref<256x128xbf16, #tpu.memory_space<vmem>>) attributes {dimension_semantics = [#tpu.dimension_semantics<parallel>], iteration_bounds = array<i64: 2>, scalar_prefetch = 0 : i64, scratch_operands = 0 : i64, tpu.core_type = #tpu.core_type<tc>, window_params = [{transform_indices = @transform_0, window_bounds = array<i64: 256, 144>}, {pipeline_mode = #tpu.pipeline_mode<synchronous>, transform_indices = @transform_1, window_bounds = array<i64: 144, 128>}, {pipeline_mode = #tpu.pipeline_mode<synchronous>, transform_indices = @transform_2, window_bounds = array<i64: 1, 128>}, {transform_indices = @transform_3, window_bounds = array<i64: 256, 128>}]} {
    %c0 = arith.constant 0 : index
    %c0_0 = arith.constant 0 : index
    %0 = vector.load %arg1[%c0, %c0_0] : memref<256x144xbf16, #tpu.memory_space<vmem>>, vector<256x144xbf16>
    %c0_1 = arith.constant 0 : index
    %c0_2 = arith.constant 0 : index
    %1 = vector.load %arg2[%c0_1, %c0_2] : memref<144x128xbf16, #tpu.memory_space<vmem>>, vector<144x128xbf16>
    %cst = arith.constant dense<0.000000e+00> : vector<256x128xf32>
    %2 = tpu.matmul %0, %1, %cst {dimension_numbers = #tpu.dot_dimension_numbers<[1], [0], [0], [1], [0, 0, 1, 1], [], []>} : vector<256x144xbf16>, vector<144x128xbf16>, vector<256x128xf32> -> vector<256x128xf32>
    %c0_3 = arith.constant 0 : index
    %c0_4 = arith.constant 0 : index
    %3 = vector.load %arg3[%c0_3, %c0_4] : memref<1x128xf32, #tpu.memory_space<vmem>>, vector<1x128xf32>
    %4 = vector.broadcast %3 : vector<1x128xf32> to vector<256x128xf32>
    %5 = arith.addf %2, %4 : vector<256x128xf32>
    %cst_5 = arith.constant 0.000000e+00 : f32
    %6 = vector.broadcast %cst_5 : f32 to vector<256x128xf32>
    %7 = arith.maximumf %5, %6 : vector<256x128xf32>
    %8 = arith.truncf %7 : vector<256x128xf32> to vector<256x128xbf16>
    %c0_6 = arith.constant 0 : index
    %c0_7 = arith.constant 0 : index
    %9 = vector.load %arg4[%c0_6, %c0_7] : memref<256x128xbf16, #tpu.memory_space<vmem>>, vector<256x128xbf16>
    tpu.vector_store %arg4[%c0_6, %c0_7], %8 {strides = array<i32>} : memref<256x128xbf16, #tpu.memory_space<vmem>>, vector<256x128xbf16>,
    return
  }
  func.func @transform_0(%arg0: i32) -> (i32, i32) {
    %c0_i32 = arith.constant 0 : i32
    %c0_i32_0 = arith.constant 0 : i32
    return %arg0, %c0_i32 : i32, i32
  }
  func.func @transform_1(%arg0: i32) -> (i32, i32) {
    %c0_i32 = arith.constant 0 : i32
    %c0_i32_0 = arith.constant 0 : i32
    %c0_i32_1 = arith.constant 0 : i32
    return %c0_i32, %c0_i32_0 : i32, i32
  }
  func.func @transform_2(%arg0: i32) -> (i32, i32) {
    %c0_i32 = arith.constant 0 : i32
    %c0_i32_0 = arith.constant 0 : i32
    %c0_i32_1 = arith.constant 0 : i32
    return %c0_i32, %c0_i32_0 : i32, i32
  }
  func.func @transform_3(%arg0: i32) -> (i32, i32) {
    %c0_i32 = arith.constant 0 : i32
    %c0_i32_0 = arith.constant 0 : i32
    return %arg0, %c0_i32 : i32, i32
  }
}

module attributes {stable_mosaic.version = 11 : i64} {
  func.func @kernel(%arg0: i32, %arg1: memref<256x144xbf16, #tpu.memory_space<vmem>>, %arg2: memref<144x128xbf16, #tpu.memory_space<vmem>>, %arg3: memref<1x128xf32, #tpu.memory_space<vmem>>, %arg4: memref<256x128xbf16, #tpu.memory_space<vmem>>, %arg5: memref<256x128xbf16, #tpu.memory_space<vmem>>) attributes {dimension_semantics = [#tpu.dimension_semantics<parallel>], iteration_bounds = array<i64: 2>, scalar_prefetch = 0 : i64, scratch_operands = 0 : i64, tpu.core_type = #tpu.core_type<tc>, window_params = [{transform_indices = @transform_0, window_bounds = array<i64: 256, 144>}, {pipeline_mode = #tpu.pipeline_mode<synchronous>, transform_indices = @transform_1, window_bounds = array<i64: 144, 128>}, {pipeline_mode = #tpu.pipeline_mode<synchronous>, transform_indices = @transform_2, window_bounds = array<i64: 1, 128>}, {transform_indices = @transform_3, window_bounds = array<i64: 256, 128>}, {transform_indices = @transform_4, window_bounds = array<i64: 256, 128>}]} {
    %c0 = arith.constant 0 : index
    %c0_0 = arith.constant 0 : index
    %0 = vector.load %arg1[%c0, %c0_0] : memref<256x144xbf16, #tpu.memory_space<vmem>>, vector<256x144xbf16>
    %c0_1 = arith.constant 0 : index
    %c0_2 = arith.constant 0 : index
    %1 = vector.load %arg2[%c0_1, %c0_2] : memref<144x128xbf16, #tpu.memory_space<vmem>>, vector<144x128xbf16>
    %cst = arith.constant dense<0.000000e+00> : vector<256x128xf32>
    %2 = tpu.matmul %0, %1, %cst {dimension_numbers = #tpu.dot_dimension_numbers<[1], [0], [0], [1], [0, 0, 1, 1], [], []>} : vector<256x144xbf16>, vector<144x128xbf16>, vector<256x128xf32> -> vector<256x128xf32>
    %c0_3 = arith.constant 0 : index
    %c0_4 = arith.constant 0 : index
    %3 = vector.load %arg3[%c0_3, %c0_4] : memref<1x128xf32, #tpu.memory_space<vmem>>, vector<1x128xf32>
    %4 = vector.broadcast %3 : vector<1x128xf32> to vector<256x128xf32>
    %5 = arith.addf %2, %4 : vector<256x128xf32>
    %c0_5 = arith.constant 0 : index
    %c0_6 = arith.constant 0 : index
    %6 = vector.load %arg4[%c0_5, %c0_6] : memref<256x128xbf16, #tpu.memory_space<vmem>>, vector<256x128xbf16>
    %7 = arith.extf %6 : vector<256x128xbf16> to vector<256x128xf32>
    %8 = arith.addf %5, %7 : vector<256x128xf32>
    %cst_7 = arith.constant 0.000000e+00 : f32
    %9 = vector.broadcast %cst_7 : f32 to vector<256x128xf32>
    %10 = arith.maximumf %8, %9 : vector<256x128xf32>
    %11 = arith.truncf %10 : vector<256x128xf32> to vector<256x128xbf16>
    %c0_8 = arith.constant 0 : index
    %c0_9 = arith.constant 0 : index
    %12 = vector.load %arg5[%c0_8, %c0_9] : memref<256x128xbf16, #tpu.memory_space<vmem>>, vector<256x128xbf16>
    tpu.vector_store %arg5[%c0_8, %c0_9], %11 {strides = array<i32>} : memref<256x128xbf16, #tpu.memory_space<vmem>>, vector<256x128xbf16>,
    return
  }
  func.func @transform_0(%arg0: i32) -> (i32, i32) {
    %c0_i32 = arith.constant 0 : i32
    %c0_i32_0 = arith.constant 0 : i32
    return %arg0, %c0_i32 : i32, i32
  }
  func.func @transform_1(%arg0: i32) -> (i32, i32) {
    %c0_i32 = arith.constant 0 : i32
    %c0_i32_0 = arith.constant 0 : i32
    %c0_i32_1 = arith.constant 0 : i32
    return %c0_i32, %c0_i32_0 : i32, i32
  }
  func.func @transform_2(%arg0: i32) -> (i32, i32) {
    %c0_i32 = arith.constant 0 : i32
    %c0_i32_0 = arith.constant 0 : i32
    %c0_i32_1 = arith.constant 0 : i32
    return %c0_i32, %c0_i32_0 : i32, i32
  }
  func.func @transform_3(%arg0: i32) -> (i32, i32) {
    %c0_i32 = arith.constant 0 : i32
    %c0_i32_0 = arith.constant 0 : i32
    return %arg0, %c0_i32 : i32, i32
  }
  func.func @transform_4(%arg0: i32) -> (i32, i32) {
    %c0_i32 = arith.constant 0 : i32
    %c0_i32_0 = arith.constant 0 : i32
    return %arg0, %c0_i32 : i32, i32
  }
}

module attributes {stable_mosaic.version = 11 : i64} {
  func.func @kernel(%arg0: i32, %arg1: memref<128x144xbf16, #tpu.memory_space<vmem>>, %arg2: memref<144x128xbf16, #tpu.memory_space<vmem>>, %arg3: memref<1x128xf32, #tpu.memory_space<vmem>>, %arg4: memref<128x128xbf16, #tpu.memory_space<vmem>>) attributes {dimension_semantics = [#tpu.dimension_semantics<parallel>], iteration_bounds = array<i64: 1>, scalar_prefetch = 0 : i64, scratch_operands = 0 : i64, tpu.core_type = #tpu.core_type<tc>, window_params = [{transform_indices = @transform_0, window_bounds = array<i64: 128, 144>}, {pipeline_mode = #tpu.pipeline_mode<synchronous>, transform_indices = @transform_1, window_bounds = array<i64: 144, 128>}, {pipeline_mode = #tpu.pipeline_mode<synchronous>, transform_indices = @transform_2, window_bounds = array<i64: 1, 128>}, {transform_indices = @transform_3, window_bounds = array<i64: 128, 128>}]} {
    %c0 = arith.constant 0 : index
    %c0_0 = arith.constant 0 : index
    %0 = vector.load %arg1[%c0, %c0_0] : memref<128x144xbf16, #tpu.memory_space<vmem>>, vector<128x144xbf16>
    %c0_1 = arith.constant 0 : index
    %c0_2 = arith.constant 0 : index
    %1 = vector.load %arg2[%c0_1, %c0_2] : memref<144x128xbf16, #tpu.memory_space<vmem>>, vector<144x128xbf16>
    %cst = arith.constant dense<0.000000e+00> : vector<128x128xf32>
    %2 = tpu.matmul %0, %1, %cst {dimension_numbers = #tpu.dot_dimension_numbers<[1], [0], [0], [1], [0, 0, 1, 1], [], []>} : vector<128x144xbf16>, vector<144x128xbf16>, vector<128x128xf32> -> vector<128x128xf32>
    %c0_3 = arith.constant 0 : index
    %c0_4 = arith.constant 0 : index
    %3 = vector.load %arg3[%c0_3, %c0_4] : memref<1x128xf32, #tpu.memory_space<vmem>>, vector<1x128xf32>
    %4 = vector.broadcast %3 : vector<1x128xf32> to vector<128x128xf32>
    %5 = arith.addf %2, %4 : vector<128x128xf32>
    %cst_5 = arith.constant 0.000000e+00 : f32
    %6 = vector.broadcast %cst_5 : f32 to vector<128x128xf32>
    %7 = arith.maximumf %5, %6 : vector<128x128xf32>
    %8 = arith.truncf %7 : vector<128x128xf32> to vector<128x128xbf16>
    %c0_6 = arith.constant 0 : index
    %c0_7 = arith.constant 0 : index
    %9 = vector.load %arg4[%c0_6, %c0_7] : memref<128x128xbf16, #tpu.memory_space<vmem>>, vector<128x128xbf16>
    tpu.vector_store %arg4[%c0_6, %c0_7], %8 {strides = array<i32>} : memref<128x128xbf16, #tpu.memory_space<vmem>>, vector<128x128xbf16>,
    return
  }
  func.func @transform_0(%arg0: i32) -> (i32, i32) {
    %c0_i32 = arith.constant 0 : i32
    %c0_i32_0 = arith.constant 0 : i32
    return %arg0, %c0_i32 : i32, i32
  }
  func.func @transform_1(%arg0: i32) -> (i32, i32) {
    %c0_i32 = arith.constant 0 : i32
    %c0_i32_0 = arith.constant 0 : i32
    %c0_i32_1 = arith.constant 0 : i32
    return %c0_i32, %c0_i32_0 : i32, i32
  }
  func.func @transform_2(%arg0: i32) -> (i32, i32) {
    %c0_i32 = arith.constant 0 : i32
    %c0_i32_0 = arith.constant 0 : i32
    %c0_i32_1 = arith.constant 0 : i32
    return %c0_i32, %c0_i32_0 : i32, i32
  }
  func.func @transform_3(%arg0: i32) -> (i32, i32) {
    %c0_i32 = arith.constant 0 : i32
    %c0_i32_0 = arith.constant 0 : i32
    return %arg0, %c0_i32 : i32, i32
  }
}

module attributes {stable_mosaic.version = 11 : i64} {
  func.func @kernel(%arg0: i32, %arg1: memref<128x288xbf16, #tpu.memory_space<vmem>>, %arg2: memref<288x128xbf16, #tpu.memory_space<vmem>>, %arg3: memref<1x128xf32, #tpu.memory_space<vmem>>, %arg4: memref<128x16xbf16, #tpu.memory_space<vmem>>, %arg5: memref<16x128xbf16, #tpu.memory_space<vmem>>, %arg6: memref<1x128xf32, #tpu.memory_space<vmem>>, %arg7: memref<128x128xbf16, #tpu.memory_space<vmem>>) attributes {dimension_semantics = [#tpu.dimension_semantics<parallel>], iteration_bounds = array<i64: 1>, scalar_prefetch = 0 : i64, scratch_operands = 0 : i64, tpu.core_type = #tpu.core_type<tc>, window_params = [{transform_indices = @transform_0, window_bounds = array<i64: 128, 288>}, {pipeline_mode = #tpu.pipeline_mode<synchronous>, transform_indices = @transform_1, window_bounds = array<i64: 288, 128>}, {pipeline_mode = #tpu.pipeline_mode<synchronous>, transform_indices = @transform_2, window_bounds = array<i64: 1, 128>}, {transform_indices = @transform_3, window_bounds = array<i64: 128, 16>}, {pipeline_mode = #tpu.pipeline_mode<synchronous>, transform_indices = @transform_4, window_bounds = array<i64: 16, 128>}, {pipeline_mode = #tpu.pipeline_mode<synchronous>, transform_indices = @transform_5, window_bounds = array<i64: 1, 128>}, {transform_indices = @transform_6, window_bounds = array<i64: 128, 128>}]} {
    %c0 = arith.constant 0 : index
    %c0_0 = arith.constant 0 : index
    %0 = vector.load %arg1[%c0, %c0_0] : memref<128x288xbf16, #tpu.memory_space<vmem>>, vector<128x288xbf16>
    %c0_1 = arith.constant 0 : index
    %c0_2 = arith.constant 0 : index
    %1 = vector.load %arg2[%c0_1, %c0_2] : memref<288x128xbf16, #tpu.memory_space<vmem>>, vector<288x128xbf16>
    %cst = arith.constant dense<0.000000e+00> : vector<128x128xf32>
    %2 = tpu.matmul %0, %1, %cst {dimension_numbers = #tpu.dot_dimension_numbers<[1], [0], [0], [1], [0, 0, 1, 1], [], []>} : vector<128x288xbf16>, vector<288x128xbf16>, vector<128x128xf32> -> vector<128x128xf32>
    %c0_3 = arith.constant 0 : index
    %c0_4 = arith.constant 0 : index
    %3 = vector.load %arg3[%c0_3, %c0_4] : memref<1x128xf32, #tpu.memory_space<vmem>>, vector<1x128xf32>
    %4 = vector.broadcast %3 : vector<1x128xf32> to vector<128x128xf32>
    %5 = arith.addf %2, %4 : vector<128x128xf32>
    %c0_5 = arith.constant 0 : index
    %c0_6 = arith.constant 0 : index
    %6 = vector.load %arg4[%c0_5, %c0_6] : memref<128x16xbf16, #tpu.memory_space<vmem>>, vector<128x16xbf16>
    %c0_7 = arith.constant 0 : index
    %c0_8 = arith.constant 0 : index
    %7 = vector.load %arg5[%c0_7, %c0_8] : memref<16x128xbf16, #tpu.memory_space<vmem>>, vector<16x128xbf16>
    %cst_9 = arith.constant dense<0.000000e+00> : vector<128x128xf32>
    %8 = tpu.matmul %6, %7, %cst_9 {dimension_numbers = #tpu.dot_dimension_numbers<[1], [0], [0], [1], [0, 0, 1, 1], [], []>} : vector<128x16xbf16>, vector<16x128xbf16>, vector<128x128xf32> -> vector<128x128xf32>
    %9 = arith.addf %5, %8 : vector<128x128xf32>
    %c0_10 = arith.constant 0 : index
    %c0_11 = arith.constant 0 : index
    %10 = vector.load %arg6[%c0_10, %c0_11] : memref<1x128xf32, #tpu.memory_space<vmem>>, vector<1x128xf32>
    %11 = vector.broadcast %10 : vector<1x128xf32> to vector<128x128xf32>
    %12 = arith.addf %9, %11 : vector<128x128xf32>
    %cst_12 = arith.constant 0.000000e+00 : f32
    %13 = vector.broadcast %cst_12 : f32 to vector<128x128xf32>
    %14 = arith.maximumf %12, %13 : vector<128x128xf32>
    %15 = arith.truncf %14 : vector<128x128xf32> to vector<128x128xbf16>
    %c0_13 = arith.constant 0 : index
    %c0_14 = arith.constant 0 : index
    %16 = vector.load %arg7[%c0_13, %c0_14] : memref<128x128xbf16, #tpu.memory_space<vmem>>, vector<128x128xbf16>
    tpu.vector_store %arg7[%c0_13, %c0_14], %15 {strides = array<i32>} : memref<128x128xbf16, #tpu.memory_space<vmem>>, vector<128x128xbf16>,
    return
  }
  func.func @transform_0(%arg0: i32) -> (i32, i32) {
    %c0_i32 = arith.constant 0 : i32
    %c0_i32_0 = arith.constant 0 : i32
    return %arg0, %c0_i32 : i32, i32
  }
  func.func @transform_1(%arg0: i32) -> (i32, i32) {
    %c0_i32 = arith.constant 0 : i32
    %c0_i32_0 = arith.constant 0 : i32
    %c0_i32_1 = arith.constant 0 : i32
    return %c0_i32, %c0_i32_0 : i32, i32
  }
  func.func @transform_2(%arg0: i32) -> (i32, i32) {
    %c0_i32 = arith.constant 0 : i32
    %c0_i32_0 = arith.constant 0 : i32
    %c0_i32_1 = arith.constant 0 : i32
    return %c0_i32, %c0_i32_0 : i32, i32
  }
  func.func @transform_3(%arg0: i32) -> (i32, i32) {
    %c0_i32 = arith.constant 0 : i32
    %c0_i32_0 = arith.constant 0 : i32
    return %arg0, %c0_i32 : i32, i32
  }
  func.func @transform_4(%arg0: i32) -> (i32, i32) {
    %c0_i32 = arith.constant 0 : i32
    %c0_i32_0 = arith.constant 0 : i32
    %c0_i32_1 = arith.constant 0 : i32
    return %c0_i32, %c0_i32_0 : i32, i32
  }
  func.func @transform_5(%arg0: i32) -> (i32, i32) {
    %c0_i32 = arith.constant 0 : i32
    %c0_i32_0 = arith.constant 0 : i32
    %c0_i32_1 = arith.constant 0 : i32
    return %c0_i32, %c0_i32_0 : i32, i32
  }
  func.func @transform_6(%arg0: i32) -> (i32, i32) {
    %c0_i32 = arith.constant 0 : i32
    %c0_i32_0 = arith.constant 0 : i32
    return %arg0, %c0_i32 : i32, i32
  }
}

module attributes {stable_mosaic.version = 11 : i64} {
  func.func @kernel(%arg0: i32, %arg1: memref<32x288xbf16, #tpu.memory_space<vmem>>, %arg2: memref<288x128xbf16, #tpu.memory_space<vmem>>, %arg3: memref<1x128xf32, #tpu.memory_space<vmem>>, %arg4: memref<32x128xbf16, #tpu.memory_space<vmem>>) attributes {dimension_semantics = [#tpu.dimension_semantics<parallel>], iteration_bounds = array<i64: 1>, scalar_prefetch = 0 : i64, scratch_operands = 0 : i64, tpu.core_type = #tpu.core_type<tc>, window_params = [{transform_indices = @transform_0, window_bounds = array<i64: 32, 288>}, {pipeline_mode = #tpu.pipeline_mode<synchronous>, transform_indices = @transform_1, window_bounds = array<i64: 288, 128>}, {pipeline_mode = #tpu.pipeline_mode<synchronous>, transform_indices = @transform_2, window_bounds = array<i64: 1, 128>}, {transform_indices = @transform_3, window_bounds = array<i64: 32, 128>}]} {
    %c0 = arith.constant 0 : index
    %c0_0 = arith.constant 0 : index
    %0 = vector.load %arg1[%c0, %c0_0] : memref<32x288xbf16, #tpu.memory_space<vmem>>, vector<32x288xbf16>
    %c0_1 = arith.constant 0 : index
    %c0_2 = arith.constant 0 : index
    %1 = vector.load %arg2[%c0_1, %c0_2] : memref<288x128xbf16, #tpu.memory_space<vmem>>, vector<288x128xbf16>
    %cst = arith.constant dense<0.000000e+00> : vector<32x128xf32>
    %2 = tpu.matmul %0, %1, %cst {dimension_numbers = #tpu.dot_dimension_numbers<[1], [0], [0], [1], [0, 0, 1, 1], [], []>} : vector<32x288xbf16>, vector<288x128xbf16>, vector<32x128xf32> -> vector<32x128xf32>
    %c0_3 = arith.constant 0 : index
    %c0_4 = arith.constant 0 : index
    %3 = vector.load %arg3[%c0_3, %c0_4] : memref<1x128xf32, #tpu.memory_space<vmem>>, vector<1x128xf32>
    %4 = vector.broadcast %3 : vector<1x128xf32> to vector<32x128xf32>
    %5 = arith.addf %2, %4 : vector<32x128xf32>
    %cst_5 = arith.constant 0.000000e+00 : f32
    %6 = vector.broadcast %cst_5 : f32 to vector<32x128xf32>
    %7 = arith.maximumf %5, %6 : vector<32x128xf32>
    %8 = arith.truncf %7 : vector<32x128xf32> to vector<32x128xbf16>
    %c0_6 = arith.constant 0 : index
    %c0_7 = arith.constant 0 : index
    %9 = vector.load %arg4[%c0_6, %c0_7] : memref<32x128xbf16, #tpu.memory_space<vmem>>, vector<32x128xbf16>
    tpu.vector_store %arg4[%c0_6, %c0_7], %8 {strides = array<i32>} : memref<32x128xbf16, #tpu.memory_space<vmem>>, vector<32x128xbf16>,
    return
  }
  func.func @transform_0(%arg0: i32) -> (i32, i32) {
    %c0_i32 = arith.constant 0 : i32
    %c0_i32_0 = arith.constant 0 : i32
    return %arg0, %c0_i32 : i32, i32
  }
  func.func @transform_1(%arg0: i32) -> (i32, i32) {
    %c0_i32 = arith.constant 0 : i32
    %c0_i32_0 = arith.constant 0 : i32
    %c0_i32_1 = arith.constant 0 : i32
    return %c0_i32, %c0_i32_0 : i32, i32
  }
  func.func @transform_2(%arg0: i32) -> (i32, i32) {
    %c0_i32 = arith.constant 0 : i32
    %c0_i32_0 = arith.constant 0 : i32
    %c0_i32_1 = arith.constant 0 : i32
    return %c0_i32, %c0_i32_0 : i32, i32
  }
  func.func @transform_3(%arg0: i32) -> (i32, i32) {
    %c0_i32 = arith.constant 0 : i32
    %c0_i32_0 = arith.constant 0 : i32
    return %arg0, %c0_i32 : i32, i32
  }
}

module attributes {stable_mosaic.version = 11 : i64} {
  func.func @kernel(%arg0: i32, %arg1: memref<32x576xbf16, #tpu.memory_space<vmem>>, %arg2: memref<576x128xbf16, #tpu.memory_space<vmem>>, %arg3: memref<1x128xf32, #tpu.memory_space<vmem>>, %arg4: memref<32x32xbf16, #tpu.memory_space<vmem>>, %arg5: memref<32x128xbf16, #tpu.memory_space<vmem>>, %arg6: memref<1x128xf32, #tpu.memory_space<vmem>>, %arg7: memref<32x128xbf16, #tpu.memory_space<vmem>>) attributes {dimension_semantics = [#tpu.dimension_semantics<parallel>], iteration_bounds = array<i64: 1>, scalar_prefetch = 0 : i64, scratch_operands = 0 : i64, tpu.core_type = #tpu.core_type<tc>, window_params = [{transform_indices = @transform_0, window_bounds = array<i64: 32, 576>}, {pipeline_mode = #tpu.pipeline_mode<synchronous>, transform_indices = @transform_1, window_bounds = array<i64: 576, 128>}, {pipeline_mode = #tpu.pipeline_mode<synchronous>, transform_indices = @transform_2, window_bounds = array<i64: 1, 128>}, {transform_indices = @transform_3, window_bounds = array<i64: 32, 32>}, {pipeline_mode = #tpu.pipeline_mode<synchronous>, transform_indices = @transform_4, window_bounds = array<i64: 32, 128>}, {pipeline_mode = #tpu.pipeline_mode<synchronous>, transform_indices = @transform_5, window_bounds = array<i64: 1, 128>}, {transform_indices = @transform_6, window_bounds = array<i64: 32, 128>}]} {
    %c0 = arith.constant 0 : index
    %c0_0 = arith.constant 0 : index
    %0 = vector.load %arg1[%c0, %c0_0] : memref<32x576xbf16, #tpu.memory_space<vmem>>, vector<32x576xbf16>
    %c0_1 = arith.constant 0 : index
    %c0_2 = arith.constant 0 : index
    %1 = vector.load %arg2[%c0_1, %c0_2] : memref<576x128xbf16, #tpu.memory_space<vmem>>, vector<576x128xbf16>
    %cst = arith.constant dense<0.000000e+00> : vector<32x128xf32>
    %2 = tpu.matmul %0, %1, %cst {dimension_numbers = #tpu.dot_dimension_numbers<[1], [0], [0], [1], [0, 0, 1, 1], [], []>} : vector<32x576xbf16>, vector<576x128xbf16>, vector<32x128xf32> -> vector<32x128xf32>
    %c0_3 = arith.constant 0 : index
    %c0_4 = arith.constant 0 : index
    %3 = vector.load %arg3[%c0_3, %c0_4] : memref<1x128xf32, #tpu.memory_space<vmem>>, vector<1x128xf32>
    %4 = vector.broadcast %3 : vector<1x128xf32> to vector<32x128xf32>
    %5 = arith.addf %2, %4 : vector<32x128xf32>
    %c0_5 = arith.constant 0 : index
    %c0_6 = arith.constant 0 : index
    %6 = vector.load %arg4[%c0_5, %c0_6] : memref<32x32xbf16, #tpu.memory_space<vmem>>, vector<32x32xbf16>
    %c0_7 = arith.constant 0 : index
    %c0_8 = arith.constant 0 : index
    %7 = vector.load %arg5[%c0_7, %c0_8] : memref<32x128xbf16, #tpu.memory_space<vmem>>, vector<32x128xbf16>
    %cst_9 = arith.constant dense<0.000000e+00> : vector<32x128xf32>
    %8 = tpu.matmul %6, %7, %cst_9 {dimension_numbers = #tpu.dot_dimension_numbers<[1], [0], [0], [1], [0, 0, 1, 1], [], []>} : vector<32x32xbf16>, vector<32x128xbf16>, vector<32x128xf32> -> vector<32x128xf32>
    %9 = arith.addf %5, %8 : vector<32x128xf32>
    %c0_10 = arith.constant 0 : index
    %c0_11 = arith.constant 0 : index
    %10 = vector.load %arg6[%c0_10, %c0_11] : memref<1x128xf32, #tpu.memory_space<vmem>>, vector<1x128xf32>
    %11 = vector.broadcast %10 : vector<1x128xf32> to vector<32x128xf32>
    %12 = arith.addf %9, %11 : vector<32x128xf32>
    %cst_12 = arith.constant 0.000000e+00 : f32
    %13 = vector.broadcast %cst_12 : f32 to vector<32x128xf32>
    %14 = arith.maximumf %12, %13 : vector<32x128xf32>
    %15 = arith.truncf %14 : vector<32x128xf32> to vector<32x128xbf16>
    %c0_13 = arith.constant 0 : index
    %c0_14 = arith.constant 0 : index
    %16 = vector.load %arg7[%c0_13, %c0_14] : memref<32x128xbf16, #tpu.memory_space<vmem>>, vector<32x128xbf16>
    tpu.vector_store %arg7[%c0_13, %c0_14], %15 {strides = array<i32>} : memref<32x128xbf16, #tpu.memory_space<vmem>>, vector<32x128xbf16>,
    return
  }
  func.func @transform_0(%arg0: i32) -> (i32, i32) {
    %c0_i32 = arith.constant 0 : i32
    %c0_i32_0 = arith.constant 0 : i32
    return %arg0, %c0_i32 : i32, i32
  }
  func.func @transform_1(%arg0: i32) -> (i32, i32) {
    %c0_i32 = arith.constant 0 : i32
    %c0_i32_0 = arith.constant 0 : i32
    %c0_i32_1 = arith.constant 0 : i32
    return %c0_i32, %c0_i32_0 : i32, i32
  }
  func.func @transform_2(%arg0: i32) -> (i32, i32) {
    %c0_i32 = arith.constant 0 : i32
    %c0_i32_0 = arith.constant 0 : i32
    %c0_i32_1 = arith.constant 0 : i32
    return %c0_i32, %c0_i32_0 : i32, i32
  }
  func.func @transform_3(%arg0: i32) -> (i32, i32) {
    %c0_i32 = arith.constant 0 : i32
    %c0_i32_0 = arith.constant 0 : i32
    return %arg0, %c0_i32 : i32, i32
  }
  func.func @transform_4(%arg0: i32) -> (i32, i32) {
    %c0_i32 = arith.constant 0 : i32
    %c0_i32_0 = arith.constant 0 : i32
    %c0_i32_1 = arith.constant 0 : i32
    return %c0_i32, %c0_i32_0 : i32, i32
  }
  func.func @transform_5(%arg0: i32) -> (i32, i32) {
    %c0_i32 = arith.constant 0 : i32
    %c0_i32_0 = arith.constant 0 : i32
    %c0_i32_1 = arith.constant 0 : i32
    return %c0_i32, %c0_i32_0 : i32, i32
  }
  func.func @transform_6(%arg0: i32) -> (i32, i32) {
    %c0_i32 = arith.constant 0 : i32
    %c0_i32_0 = arith.constant 0 : i32
    return %arg0, %c0_i32 : i32, i32
  }
}

module attributes {stable_mosaic.version = 11 : i64} {
  func.func @_pool_fc_kernel(%arg0: i32, %arg1: memref<2x16x128xbf16, #tpu.memory_space<vmem>>, %arg2: memref<128x128xf32, #tpu.memory_space<vmem>>, %arg3: memref<1x128xf32, #tpu.memory_space<vmem>>, %arg4: memref<2x128xf32, #tpu.memory_space<vmem>>) attributes {dimension_semantics = [#tpu.dimension_semantics<arbitrary>], iteration_bounds = array<i64: 1>, scalar_prefetch = 0 : i64, scratch_operands = 0 : i64, tpu.core_type = #tpu.core_type<tc>, window_params = [{pipeline_mode = #tpu.pipeline_mode<synchronous>, transform_indices = @transform_0, window_bounds = array<i64: 2, 16, 128>}, {pipeline_mode = #tpu.pipeline_mode<synchronous>, transform_indices = @transform_1, window_bounds = array<i64: 128, 128>}, {pipeline_mode = #tpu.pipeline_mode<synchronous>, transform_indices = @transform_2, window_bounds = array<i64: 1, 128>}, {pipeline_mode = #tpu.pipeline_mode<synchronous>, transform_indices = @transform_3, window_bounds = array<i64: 2, 128>}]} {
    %c0 = arith.constant 0 : index
    %c0_0 = arith.constant 0 : index
    %c0_1 = arith.constant 0 : index
    %0 = vector.load %arg1[%c0, %c0_0, %c0_1] : memref<2x16x128xbf16, #tpu.memory_space<vmem>>, vector<2x16x128xbf16>
    %1 = arith.extf %0 : vector<2x16x128xbf16> to vector<2x16x128xf32>
    %cst = arith.constant dense<0.000000e+00> : vector<2x128xf32>
    %2 = vector.multi_reduction <add>, %1, %cst [1] : vector<2x16x128xf32> to vector<2x128xf32>
    %c0_2 = arith.constant 0 : index
    %c0_3 = arith.constant 0 : index
    %3 = vector.load %arg2[%c0_2, %c0_3] : memref<128x128xf32, #tpu.memory_space<vmem>>, vector<128x128xf32>
    %cst_4 = arith.constant dense<0.000000e+00> : vector<2x128xf32>
    %4 = tpu.matmul %2, %3, %cst_4 {dimension_numbers = #tpu.dot_dimension_numbers<[1], [0], [0], [1], [0, 0, 1, 1], [], []>} : vector<2x128xf32>, vector<128x128xf32>, vector<2x128xf32> -> vector<2x128xf32>
    %c0_5 = arith.constant 0 : index
    %c0_6 = arith.constant 0 : index
    %5 = vector.load %arg3[%c0_5, %c0_6] : memref<1x128xf32, #tpu.memory_space<vmem>>, vector<1x128xf32>
    %6 = vector.broadcast %5 : vector<1x128xf32> to vector<2x128xf32>
    %7 = arith.addf %4, %6 : vector<2x128xf32>
    %c0_7 = arith.constant 0 : index
    %c0_8 = arith.constant 0 : index
    %8 = vector.load %arg4[%c0_7, %c0_8] : memref<2x128xf32, #tpu.memory_space<vmem>>, vector<2x128xf32>
    tpu.vector_store %arg4[%c0_7, %c0_8], %7 {strides = array<i32>} : memref<2x128xf32, #tpu.memory_space<vmem>>, vector<2x128xf32>,
    return
  }
  func.func @transform_0(%arg0: i32) -> (i32, i32, i32) {
    %c0_i32 = arith.constant 0 : i32
    %c0_i32_0 = arith.constant 0 : i32
    %c0_i32_1 = arith.constant 0 : i32
    %c0_i32_2 = arith.constant 0 : i32
    return %c0_i32, %c0_i32_0, %c0_i32_1 : i32, i32, i32
  }
  func.func @transform_1(%arg0: i32) -> (i32, i32) {
    %c0_i32 = arith.constant 0 : i32
    %c0_i32_0 = arith.constant 0 : i32
    %c0_i32_1 = arith.constant 0 : i32
    return %c0_i32, %c0_i32_0 : i32, i32
  }
  func.func @transform_2(%arg0: i32) -> (i32, i32) {
    %c0_i32 = arith.constant 0 : i32
    %c0_i32_0 = arith.constant 0 : i32
    %c0_i32_1 = arith.constant 0 : i32
    return %c0_i32, %c0_i32_0 : i32, i32
  }
  func.func @transform_3(%arg0: i32) -> (i32, i32) {
    %c0_i32 = arith.constant 0 : i32
    %c0_i32_0 = arith.constant 0 : i32
    %c0_i32_1 = arith.constant 0 : i32
    return %c0_i32, %c0_i32_0 : i32, i32
  }
}

</mosaic_0001>

<bundles_post_ra>
// kernel: cifar_attention_resnet_forward.8
= control target key start
LH: loop header
LB: loop body
LE: loop exit
PB: predicated region body
PF: predicated region fallthrough
CT: control target
= control target key end

     0   :  { %s860_s12 = smov 0   ;;  %s982_s0 = inlined_call_operand.vmem [shape: bf16[512,27], index: 0, kind: input, shape index: {}]   ;;  %s983_s1 = inlined_call_operand.vmem [shape: bf16[27,128], index: 1, kind: input, shape index: {}]   ;;  %s984_s2 = inlined_call_operand.vmem [shape: f32[1,128], index: 2, kind: input, shape index: {}]   ;;  %s985_s3 = inlined_call_operand.vmem [shape: bf16[512,128], index: 3, kind: output, shape index: {}]  }
   0x1 LB: > { %s603_s13 = sadd.s32 4294967295, %s837_s12   ;;  %p607_p0 = scmp.ge.s32.totalorder %s837_s12, 1  ;;  %s837_s12 = sphi %s860_s12, %s13_s12  }
   0x2   : > { %p138_p1 = scmp.lt.s32.totalorder %s837_s12, 3 }
   0x4   : > { %p139_p2 = pnand %p607_p0, %p138_p1 }
   0x5   : > { %s608_s18 = sshll.u32 (!%p139_p2), %s603_s13, 5 }
   0x6   : > { %142 = sbr.rel (%p139_p2) target bundleno = 221 (0xdd), region = 32  ;;  %p163_p3 = scmp.lt.s32.totalorder (!%p139_p2), %s608_s18, 63 }
   0xb   : > { %v682_v0 = vld [vmem:[%s983_s1 + $0x8] sm:$0xf]  ;;  %v719_v1 = vld [vmem:[%s983_s1 + $0x8] sm:$0x30]  ;;  %vm355_vm0 = vcmask 1044480   ;;  %vm356_vm1 = vcmask 1045504  }
   0xc   : > { %v683_v2 = vor.u32 %v719_v1, %v682_v0  ;;  %v839_v3 = vmov 65535   ;;  %s987_s18 = smov (!%p163_p3, %s608_s18), 63  ;;  %v718_v7 = vld [vmem:[%s983_s1] sm:$0xff]  ;;  %vm306_vm2 = vcmask 220160  }
   0xd   : > { %v357_v4 = vsel %vm355_vm0, 4294967295, %v839_v3  ;;  %s609_s21 = sshll.u32 %s987_s18, 2  ;;  %v922_v26 = vld [vmem:[%s984_s2] ss:$0 sm:$0xff] }
   0xe   : > { %v358_v5 = vsel %vm356_vm1, %v357_v4, 0  ;;  %s885_s24 = scalar_lea.vmem %s982_s0, %s609_s21  ;;  %s933_s29 = scalar_lea.vmem %s985_s3, %s609_s21 }
   0xf   : > { %v360_v6 = vand.u32 %v683_v2, %v358_v5  ;;  %v702_v8 = vld [vmem:[%s885_s24] sm:$0xff]  ;;  %v703_v12 = vld [vmem:[%s885_s24 + $0x8] sm:$0xff]  ;;  %v704_v16 = vld [vmem:[%s885_s24 + $0x10] sm:$0xff] }
  0x10   : > { %v706_v9 = vld [vmem:[%s885_s24 + $0x20] sm:$0xff]  ;;  %v707_v13 = vld [vmem:[%s885_s24 + $0x28] sm:$0xff]  ;;  %v708_v17 = vld [vmem:[%s885_s24 + $0x30] sm:$0xff] }
  0x11   : > { %368 = vmatpush.bf16.msra.mxu0 %v360_v6  ;;  %815 = vmatpush.bf16.msra.mxu1 %v360_v6  ;;  %v710_v10 = vld [vmem:[%s885_s24 + $0x40] sm:$0xff]  ;;  %v711_v14 = vld [vmem:[%s885_s24 + $0x48] sm:$0xff]  ;;  %v712_v18 = vld [vmem:[%s885_s24 + $0x50] sm:$0xff] }
  0x12   : > { %816 = vmatpush.bf16.msra.mxu2 %v360_v6  ;;  %817 = vmatpush.bf16.msra.mxu3 %v360_v6  ;;  %v714_v11 = vld [vmem:[%s885_s24 + $0x60] sm:$0xff]  ;;  %v715_v15 = vld [vmem:[%s885_s24 + $0x68] sm:$0xff]  ;;  %v716_v19 = vld [vmem:[%s885_s24 + $0x70] sm:$0xff] }
  0x13   : > { %v705_v20 = vld [vmem:[%s885_s24 + $0x18] sm:$0xff] }
  0x14   : > { %v709_v21 = vld [vmem:[%s885_s24 + $0x38] sm:$0xff] }
  0x15   : > { %369 = vmatpush.bf16.msra.mxu0 %v718_v7  ;;  %818 = vmatpush.bf16.msra.mxu1 %v718_v7  ;;  %v713_v22 = vld [vmem:[%s885_s24 + $0x58] sm:$0xff] }
  0x16   : > { %819 = vmatpush.bf16.msra.mxu2 %v718_v7  ;;  %820 = vmatpush.bf16.msra.mxu3 %v718_v7  ;;  %v717_v23 = vld [vmem:[%s885_s24 + $0x78] sm:$0xff] }
  0x18   : > { %684 = vmatmul.msk.bf16.vlgmr.msra.gmra.mxu0 %vm306_vm2, %v702_v8  ;;  %688 = vmatmul.msk.bf16.vlgmr.msra.gmra.mxu1 %vm306_vm2, %v706_v9 }
  0x19   : > { %692 = vmatmul.msk.bf16.vlgmr.msra.gmra.mxu2 %vm306_vm2, %v710_v10  ;;  %696 = vmatmul.msk.bf16.vlgmr.msra.gmra.mxu3 %vm306_vm2, %v714_v11 }
  0x28   : > { %685 = vmatmul.msk.bf16.gmra.mxu0 %vm306_vm2, %v703_v12  ;;  %689 = vmatmul.msk.bf16.gmra.mxu1 %vm306_vm2, %v707_v13 }
  0x29   : > { %693 = vmatmul.msk.bf16.gmra.mxu2 %vm306_vm2, %v711_v14  ;;  %697 = vmatmul.msk.bf16.gmra.mxu3 %vm306_vm2, %v715_v15 }
  0x38   : > { %686 = vmatmul.msk.bf16.gmra.mxu0 %vm306_vm2, %v704_v16  ;;  %690 = vmatmul.msk.bf16.gmra.mxu1 %vm306_vm2, %v708_v17 }
  0x39   : > { %694 = vmatmul.msk.bf16.gmra.mxu2 %vm306_vm2, %v712_v18  ;;  %698 = vmatmul.msk.bf16.gmra.mxu3 %vm306_vm2, %v716_v19 }
  0x48   : > { %687 = vmatmul.msk.bf16.gmra.mxu0 %vm306_vm2, %v705_v20  ;;  %691 = vmatmul.msk.bf16.gmra.mxu1 %vm306_vm2, %v709_v21 }
  0x49   : > { %695 = vmatmul.msk.bf16.gmra.mxu2 %vm306_vm2, %v713_v22  ;;  %699 = vmatmul.msk.bf16.gmra.mxu3 %vm306_vm2, %v717_v23 }
  0x95   : > { %v371_v24 = vpop.f32.mrf.mxu0  ;;  %v391_v25 = vpop.f32.mrf.mxu1 }
  0x96   : > { %v372_v27 = vadd.f32 %v922_v26, %v371_v24  ;;  %v392_v28 = vadd.f32 %v922_v26, %v391_v25 }
  0x98   : > { %v451_v35 = vmax.f32 %v372_v27, 0.0  ;;  %v459_v36 = vmax.f32 %v392_v28, 0.0 }
  0x9c   : > { %v411_v29 = vpop.f32.mrf.mxu2  ;;  %v431_v30 = vpop.f32.mrf.mxu3 }
  0x9d   : > { %v373_v31 = vpop.f32.mrf.mxu0  ;;  %v393_v32 = vpop.f32.mrf.mxu1  ;;  %v412_v41 = vadd.f32 %v922_v26, %v411_v29  ;;  %v432_v42 = vadd.f32 %v922_v26, %v431_v30 }
  0x9e   : > { %v374_v33 = vadd.f32 %v922_v26, %v373_v31  ;;  %v394_v34 = vadd.f32 %v922_v26, %v393_v32 }
  0x9f   : > { %v467_v49 = vmax.f32 %v412_v41, 0.0  ;;  %v475_v50 = vmax.f32 %v432_v42, 0.0 }
  0xa0   : > { %v452_v37 = vmax.f32 %v374_v33, 0.0  ;;  %v460_v38 = vmax.f32 %v394_v34, 0.0 }
  0xa2   : > { %v723_v39 = vpack.c.bf16 %v452_v37, %v451_v35  ;;  %v743_v40 = vpack.c.bf16 %v460_v38, %v459_v36 }
  0xa4   : > { %724 = vst [vmem:[%s933_s29] sm:$0xff] %v723_v39   ;;  %v413_v43 = vpop.f32.mrf.mxu2  ;;  %v433_v44 = vpop.f32.mrf.mxu3 }
  0xa5   : > { %803 = vst [vmem:[%s933_s29 + $0x20] sm:$0xff] %v743_v40   ;;  %v414_v45 = vadd.f32 %v922_v26, %v413_v43  ;;  %v434_v46 = vadd.f32 %v922_v26, %v433_v44  ;;  %v376_v47 = vpop.f32.mrf.mxu0  ;;  %v396_v48 = vpop.f32.mrf.mxu1 }
  0xa6   : > { %v377_v55 = vadd.f32 %v922_v26, %v376_v47  ;;  %v397_v56 = vadd.f32 %v922_v26, %v396_v48 }
  0xa7   : > { %v468_v51 = vmax.f32 %v414_v45, 0.0  ;;  %v476_v52 = vmax.f32 %v434_v46, 0.0 }
  0xa8   : > { %v453_v63 = vmax.f32 %v377_v55, 0.0  ;;  %v461_v0 = vmax.f32 %v397_v56, 0.0 }
  0xa9   : > { %v763_v53 = vpack.c.bf16 %v468_v51, %v467_v49  ;;  %v783_v54 = vpack.c.bf16 %v476_v52, %v475_v50 }
  0xab   : > { %807 = vst [vmem:[%s933_s29 + $0x40] sm:$0xff] %v763_v53  }
  0xac   : > { %811 = vst [vmem:[%s933_s29 + $0x60] sm:$0xff] %v783_v54   ;;  %v416_v57 = vpop.f32.mrf.mxu2  ;;  %v436_v58 = vpop.f32.mrf.mxu3 }
  0xad   : > { %v378_v59 = vpop.f32.mrf.mxu0  ;;  %v398_v60 = vpop.f32.mrf.mxu1  ;;  %v417_v5 = vadd.f32 %v922_v26, %v416_v57  ;;  %v437_v6 = vadd.f32 %v922_v26, %v436_v58 }
  0xae   : > { %v379_v61 = vadd.f32 %v922_v26, %v378_v59  ;;  %v399_v62 = vadd.f32 %v922_v26, %v398_v60 }
  0xaf   : > { %v469_v13 = vmax.f32 %v417_v5, 0.0  ;;  %v477_v14 = vmax.f32 %v437_v6, 0.0 }
  0xb0   : > { %v454_v1 = vmax.f32 %v379_v61, 0.0  ;;  %v462_v2 = vmax.f32 %v399_v62, 0.0 }
  0xb2   : > { %v728_v3 = vpack.c.bf16 %v454_v1, %v453_v63  ;;  %v748_v4 = vpack.c.bf16 %v462_v2, %v461_v0 }
  0xb4   : > { %800 = vst [vmem:[%s933_s29 + $0x8] sm:$0xff] %v728_v3   ;;  %v418_v7 = vpop.f32.mrf.mxu2  ;;  %v438_v8 = vpop.f32.mrf.mxu3 }
  0xb5   : > { %804 = vst [vmem:[%s933_s29 + $0x28] sm:$0xff] %v748_v4   ;;  %v419_v9 = vadd.f32 %v922_v26, %v418_v7  ;;  %v439_v10 = vadd.f32 %v922_v26, %v438_v8  ;;  %v381_v11 = vpop.f32.mrf.mxu0  ;;  %v401_v12 = vpop.f32.mrf.mxu1 }
  0xb6   : > { %v382_v19 = vadd.f32 %v922_v26, %v381_v11  ;;  %v402_v20 = vadd.f32 %v922_v26, %v401_v12 }
  0xb7   : > { %v470_v15 = vmax.f32 %v419_v9, 0.0  ;;  %v478_v16 = vmax.f32 %v439_v10, 0.0 }
  0xb8   : > { %v455_v28 = vmax.f32 %v382_v19, 0.0  ;;  %v463_v29 = vmax.f32 %v402_v20, 0.0 }
  0xb9   : > { %v768_v17 = vpack.c.bf16 %v470_v15, %v469_v13  ;;  %v788_v18 = vpack.c.bf16 %v478_v16, %v477_v14 }
  0xbb   : > { %808 = vst [vmem:[%s933_s29 + $0x48] sm:$0xff] %v768_v17  }
  0xbc   : > { %812 = vst [vmem:[%s933_s29 + $0x68] sm:$0xff] %v788_v18   ;;  %v421_v21 = vpop.f32.mrf.mxu2  ;;  %v441_v22 = vpop.f32.mrf.mxu3 }
  0xbd   : > { %v383_v23 = vpop.f32.mrf.mxu0  ;;  %v403_v24 = vpop.f32.mrf.mxu1  ;;  %v422_v34 = vadd.f32 %v922_v26, %v421_v21  ;;  %v442_v35 = vadd.f32 %v922_v26, %v441_v22 }
  0xbe   : > { %v384_v25 = vadd.f32 %v922_v26, %v383_v23  ;;  %v404_v27 = vadd.f32 %v922_v26, %v403_v24 }
  0xbf   : > { %v471_v42 = vmax.f32 %v422_v34, 0.0  ;;  %v479_v43 = vmax.f32 %v442_v35, 0.0 }
  0xc0   : > { %v456_v30 = vmax.f32 %v384_v25, 0.0  ;;  %v464_v31 = vmax.f32 %v404_v27, 0.0 }
  0xc2   : > { %v733_v32 = vpack.c.bf16 %v456_v30, %v455_v28  ;;  %v753_v33 = vpack.c.bf16 %v464_v31, %v463_v29 }
  0xc4   : > { %801 = vst [vmem:[%s933_s29 + $0x10] sm:$0xff] %v733_v32   ;;  %v423_v36 = vpop.f32.mrf.mxu2  ;;  %v443_v37 = vpop.f32.mrf.mxu3 }
  0xc5   : > { %805 = vst [vmem:[%s933_s29 + $0x30] sm:$0xff] %v753_v33   ;;  %v424_v38 = vadd.f32 %v922_v26, %v423_v36  ;;  %v444_v39 = vadd.f32 %v922_v26, %v443_v37  ;;  %v386_v40 = vpop.f32.mrf.mxu0  ;;  %v406_v41 = vpop.f32.mrf.mxu1 }
  0xc6   : > { %v387_v48 = vadd.f32 %v922_v26, %v386_v40  ;;  %v407_v49 = vadd.f32 %v922_v26, %v406_v41 }
  0xc7   : > { %v472_v44 = vmax.f32 %v424_v38, 0.0  ;;  %v480_v45 = vmax.f32 %v444_v39, 0.0 }
  0xc8   : > { %v457_v56 = vmax.f32 %v387_v48, 0.0  ;;  %v465_v57 = vmax.f32 %v407_v49, 0.0 }
  0xc9   : > { %v773_v46 = vpack.c.bf16 %v472_v44, %v471_v42  ;;  %v793_v47 = vpack.c.bf16 %v480_v45, %v479_v43 }
  0xcb   : > { %809 = vst [vmem:[%s933_s29 + $0x50] sm:$0xff] %v773_v46  }
  0xcc   : > { %813 = vst [vmem:[%s933_s29 + $0x70] sm:$0xff] %v793_v47   ;;  %v426_v50 = vpop.f32.mrf.mxu2  ;;  %v446_v51 = vpop.f32.mrf.mxu3 }
  0xcd   : > { %v388_v52 = vpop.f32.mrf.mxu0  ;;  %v408_v53 = vpop.f32.mrf.mxu1  ;;  %v427_v62 = vadd.f32 %v922_v26, %v426_v50  ;;  %v447_v63 = vadd.f32 %v922_v26, %v446_v51 }
  0xce   : > { %v389_v54 = vadd.f32 %v922_v26, %v388_v52  ;;  %v409_v55 = vadd.f32 %v922_v26, %v408_v53 }
  0xcf   : > { %v473_v4 = vmax.f32 %v427_v62, 0.0  ;;  %v481_v5 = vmax.f32 %v447_v63, 0.0 }
  0xd0   : > { %v458_v58 = vmax.f32 %v389_v54, 0.0  ;;  %v466_v59 = vmax.f32 %v409_v55, 0.0 }
  0xd2   : > { %v738_v60 = vpack.c.bf16 %v458_v58, %v457_v56  ;;  %v758_v61 = vpack.c.bf16 %v466_v59, %v465_v57 }
  0xd4   : > { %802 = vst [vmem:[%s933_s29 + $0x18] sm:$0xff] %v738_v60   ;;  %v428_v0 = vpop.f32.mrf.mxu2  ;;  %v448_v1 = vpop.f32.mrf.mxu3 }
  0xd5   : > { %806 = vst [vmem:[%s933_s29 + $0x38] sm:$0xff] %v758_v61   ;;  %v429_v2 = vadd.f32 %v922_v26, %v428_v0  ;;  %v449_v3 = vadd.f32 %v922_v26, %v448_v1 }
  0xd7   : > { %v474_v6 = vmax.f32 %v429_v2, 0.0  ;;  %v482_v7 = vmax.f32 %v449_v3, 0.0 }
  0xd9   : > { %v778_v8 = vpack.c.bf16 %v474_v6, %v473_v4  ;;  %v798_v9 = vpack.c.bf16 %v482_v7, %v481_v5 }
  0xdb   : > { %810 = vst [vmem:[%s933_s29 + $0x58] sm:$0xff] %v778_v8  }
  0xdc   : > { %814 = vst [vmem:[%s933_s29 + $0x78] sm:$0xff] %v798_v9  }
  0xdd PF: > { %s13_s12 = sadd.s32 1, %s837_s12  }
  0xde   : > { %p10_p4 = scmp.ge.s32.totalorder %s13_s12, 4  }
  0xe0   :  { %12 = sbr.rel (!%p10_p4) target bundleno = 1 (0x1), region = 62 }

// kernel: cifar_attention_resnet_forward.9
= control target key start
LH: loop header
LB: loop body
LE: loop exit
PB: predicated region body
PF: predicated region fallthrough
CT: control target
= control target key end

     0   :  { %s1184_s12 = smov 0   ;;  %s1375_s0 = inlined_call_operand.vmem [shape: bf16[512,144], index: 0, kind: input, shape index: {}]   ;;  %s1376_s1 = inlined_call_operand.vmem [shape: bf16[144,128], index: 1, kind: input, shape index: {}]   ;;  %s1377_s2 = inlined_call_operand.vmem [shape: f32[1,128], index: 2, kind: input, shape index: {}]   ;;  %s1378_s3 = inlined_call_operand.vmem [shape: bf16[512,128], index: 3, kind: output, shape index: {}]  }
   0x1 LB: > { %s809_s13 = sadd.s32 4294967295, %s1162_s12   ;;  %p813_p0 = scmp.ge.s32.totalorder %s1162_s12, 1  ;;  %s1162_s12 = sphi %s1184_s12, %s13_s12  }
   0x2   : > { %p139_p1 = scmp.lt.s32.totalorder %s1162_s12, 3 }
   0x4   : > { %p140_p2 = pnand %p813_p0, %p139_p1 }
   0x5   : > { %s814_s18 = sshll.u32 (!%p140_p2), %s809_s13, 5 }
   0x6   : > { %143 = sbr.rel (%p140_p2) target bundleno = 304 (0x130), region = 32  ;;  %p165_p3 = scmp.lt.s32.totalorder (!%p140_p2), %s814_s18, 63 }
   0xb   : > { %v1041_v0 = vld [vmem:[%s1376_s1 + $0x38] sm:$0xff]  ;;  %v1042_v1 = vld [vmem:[%s1376_s1 + $0x40] sm:$0xff]  ;;  %v1040_v2 = vld [vmem:[%s1376_s1 + $0x30] sm:$0xff]  ;;  %s1380_s18 = smov (!%p165_p3, %s814_s18), 63  ;;  %vm430_vm0 = vcmask 130048  }
   0xc   : > { %479 = vmatpush.bf16.msra.mxu0 %v1041_v0  ;;  %1138 = vmatpush.bf16.msra.mxu2 %v1041_v0  ;;  %s1001_s21 = sshll.u32 %s1380_s18, 3  ;;  %v1039_v3 = vld [vmem:[%s1376_s1 + $0x28] sm:$0xff]  ;;  %v1038_v7 = vld [vmem:[%s1376_s1 + $0x20] sm:$0xff]  ;;  %v1037_v11 = vld [vmem:[%s1376_s1 + $0x18] sm:$0xff]  ;;  %s818_s13 = sshll.u32 %s1380_s18, 2 }
   0xd   : > { %575 = vmatpush.bf16.msra.mxu1 %v1042_v1  ;;  %1146 = vmatpush.bf16.msra.mxu3 %v1042_v1  ;;  %s1207_s24 = scalar_lea.vmem %s1375_s0, %s1001_s21  ;;  %v1036_v12 = vld [vmem:[%s1376_s1 + $0x10] sm:$0xff]  ;;  %v1035_v16 = vld [vmem:[%s1376_s1 + $0x8] sm:$0xff]  ;;  %v1034_v19 = vld [vmem:[%s1376_s1] sm:$0xff]  ;;  %s1320_s16 = scalar_lea.vmem %s1378_s3, %s818_s13 }
   0xe   : > { %v1002_v4 = vld [vmem:[%s1207_s24 + $0x4] sm:$0xf]  ;;  %v823_v5 = vld [vmem:[%s1207_s24 + $0x8] sm:$0xf0]  ;;  %v1020_v8 = vld [vmem:[%s1207_s24 + $0x94] sm:$0xf] }
   0xf   : > { %v826_v6 = vor.u32 %v1002_v4, %v823_v5  ;;  %v895_v9 = vld [vmem:[%s1207_s24 + $0x98] sm:$0xf0]  ;;  %v1004_v13 = vld [vmem:[%s1207_s24 + $0x14] sm:$0xf]  ;;  %v1022_v17 = vld [vmem:[%s1207_s24 + $0xa4] sm:$0xf] }
  0x10   : > { %480 = vmatpush.bf16.msra.mxu0 %v1040_v2  ;;  %1139 = vmatpush.bf16.msra.mxu2 %v1040_v2  ;;  %v898_v10 = vor.u32 %v1020_v8, %v895_v9  ;;  %v831_v14 = vld [vmem:[%s1207_s24 + $0x18] sm:$0xf0]  ;;  %v903_v18 = vld [vmem:[%s1207_s24 + $0xa8] sm:$0xf0]  ;;  %v821_v20 = vld [vmem:[%s1207_s24] sm:$0xf] }
  0x11   : > { %983 = vmatmul.msk.bf16.vlgmr.msra.gmra.mxu1 %vm430_vm0, %v826_v6  ;;  %v834_v15 = vor.u32 %v1004_v13, %v831_v14  ;;  %v1003_v21 = vld [vmem:[%s1207_s24 + $0x4] sm:$0xf0]  ;;  %v906_v22 = vor.u32 %v1022_v17, %v903_v18  ;;  %v885_v23 = vld [vmem:[%s1207_s24 + $0x80] sm:$0xf]  ;;  %v1006_v27 = vld [vmem:[%s1207_s24 + $0x24] sm:$0xf] }
  0x12   : > { %992 = vmatmul.msk.bf16.vlgmr.msra.gmra.mxu3 %vm430_vm0, %v898_v10  ;;  %v1019_v24 = vld [vmem:[%s1207_s24 + $0x84] sm:$0xf0]  ;;  %v822_v25 = vor.u32 %v1003_v21, %v821_v20  ;;  %v839_v28 = vld [vmem:[%s1207_s24 + $0x28] sm:$0xf0]  ;;  %v1024_v30 = vld [vmem:[%s1207_s24 + $0xb4] sm:$0xf] }
  0x13   : > { %v886_v26 = vor.u32 %v1019_v24, %v885_v23  ;;  %v842_v29 = vor.u32 %v1006_v27, %v839_v28  ;;  %v911_v31 = vld [vmem:[%s1207_s24 + $0xb8] sm:$0xf0]  ;;  %v829_v32 = vld [vmem:[%s1207_s24 + $0x10] sm:$0xf]  ;;  %v1005_v33 = vld [vmem:[%s1207_s24 + $0x14] sm:$0xf0] }
  0x14   : > { %481 = vmatpush.bf16.msra.mxu0 %v1039_v3  ;;  %1140 = vmatpush.bf16.msra.mxu2 %v1039_v3  ;;  %v914_v34 = vor.u32 %v1024_v30, %v911_v31  ;;  %v893_v35 = vld [vmem:[%s1207_s24 + $0x90] sm:$0xf]  ;;  %v1021_v36 = vld [vmem:[%s1207_s24 + $0x94] sm:$0xf0]  ;;  %v830_v37 = vor.u32 %v1005_v33, %v829_v32  ;;  %v1008_v39 = vld [vmem:[%s1207_s24 + $0x34] sm:$0xf] }
  0x15   : > { %v894_v38 = vor.u32 %v1021_v36, %v893_v35  ;;  %v847_v40 = vld [vmem:[%s1207_s24 + $0x38] sm:$0xf0]  ;;  %v1026_v42 = vld [vmem:[%s1207_s24 + $0xc4] sm:$0xf]  ;;  %v919_v43 = vld [vmem:[%s1207_s24 + $0xc8] sm:$0xf0] }
  0x16   : > { %v850_v41 = vor.u32 %v1008_v39, %v847_v40  ;;  %v837_v44 = vld [vmem:[%s1207_s24 + $0x20] sm:$0xf]  ;;  %v1007_v45 = vld [vmem:[%s1207_s24 + $0x24] sm:$0xf0]  ;;  %v922_v46 = vor.u32 %v1026_v42, %v919_v43  ;;  %v1010_v51 = vld [vmem:[%s1207_s24 + $0x44] sm:$0xf] }
  0x17   : > { %v901_v47 = vld [vmem:[%s1207_s24 + $0xa0] sm:$0xf]  ;;  %v1023_v48 = vld [vmem:[%s1207_s24 + $0xa4] sm:$0xf0]  ;;  %v838_v49 = vor.u32 %v1007_v45, %v837_v44  ;;  %v855_v52 = vld [vmem:[%s1207_s24 + $0x48] sm:$0xf0] }
  0x18   : > { %482 = vmatpush.bf16.msra.mxu0 %v1038_v7  ;;  %1141 = vmatpush.bf16.msra.mxu2 %v1038_v7  ;;  %v902_v50 = vor.u32 %v1023_v48, %v901_v47  ;;  %v858_v53 = vor.u32 %v1010_v51, %v855_v52  ;;  %v1028_v54 = vld [vmem:[%s1207_s24 + $0xd4] sm:$0xf]  ;;  %v927_v55 = vld [vmem:[%s1207_s24 + $0xd8] sm:$0xf0]  ;;  %v845_v56 = vld [vmem:[%s1207_s24 + $0x30] sm:$0xf] }
  0x19   : > { %v1009_v57 = vld [vmem:[%s1207_s24 + $0x34] sm:$0xf0]  ;;  %v930_v58 = vor.u32 %v1028_v54, %v927_v55  ;;  %v909_v59 = vld [vmem:[%s1207_s24 + $0xb0] sm:$0xf]  ;;  %v1012_v63 = vld [vmem:[%s1207_s24 + $0x54] sm:$0xf] }
  0x1a   : > { %v1025_v60 = vld [vmem:[%s1207_s24 + $0xb4] sm:$0xf0]  ;;  %v846_v61 = vor.u32 %v1009_v57, %v845_v56  ;;  %v863_v0 = vld [vmem:[%s1207_s24 + $0x58] sm:$0xf0]  ;;  %v1030_v2 = vld [vmem:[%s1207_s24 + $0xe4] sm:$0xf] }
  0x1b   : > { %v910_v62 = vor.u32 %v1025_v60, %v909_v59  ;;  %v866_v1 = vor.u32 %v1012_v63, %v863_v0  ;;  %v935_v3 = vld [vmem:[%s1207_s24 + $0xe8] sm:$0xf0]  ;;  %v853_v4 = vld [vmem:[%s1207_s24 + $0x40] sm:$0xf]  ;;  %v1011_v5 = vld [vmem:[%s1207_s24 + $0x44] sm:$0xf0] }
  0x1c   : > { %483 = vmatpush.bf16.msra.mxu0 %v1037_v11  ;;  %1142 = vmatpush.bf16.msra.mxu2 %v1037_v11  ;;  %v938_v6 = vor.u32 %v1030_v2, %v935_v3  ;;  %v917_v7 = vld [vmem:[%s1207_s24 + $0xc0] sm:$0xf]  ;;  %v1027_v8 = vld [vmem:[%s1207_s24 + $0xc4] sm:$0xf0]  ;;  %v854_v9 = vor.u32 %v1011_v5, %v853_v4  ;;  %v1014_v11 = vld [vmem:[%s1207_s24 + $0x64] sm:$0xf] }
  0x1d   : > { %v918_v10 = vor.u32 %v1027_v8, %v917_v7  ;;  %v1032_v14 = vld [vmem:[%s1207_s24 + $0xf4] sm:$0xf]  ;;  %v1013_v17 = vld [vmem:[%s1207_s24 + $0x54] sm:$0xf0]  ;;  %v879_v24 = vld [vmem:[%s1207_s24 + $0x78] sm:$0xf0] }
  0x1e   : > { %v1029_v20 = vld [vmem:[%s1207_s24 + $0xd4] sm:$0xf0]  ;;  %v1016_v23 = vld [vmem:[%s1207_s24 + $0x74] sm:$0xf]  ;;  %v1015_v27 = vld [vmem:[%s1207_s24 + $0x64] sm:$0xf0] }
  0x1f   : > { %v933_v28 = vld [vmem:[%s1207_s24 + $0xe0] sm:$0xf]  ;;  %v1018_v32 = vld [vmem:[%s1207_s24 + $0x84] sm:$0xf]  ;;  %v887_v33 = vld [vmem:[%s1207_s24 + $0x88] sm:$0xf0] }
  0x20   : > { %484 = vmatpush.bf16.msra.mxu0 %v1036_v12  ;;  %1143 = vmatpush.bf16.msra.mxu2 %v1036_v12  ;;  %v871_v12 = vld [vmem:[%s1207_s24 + $0x68] sm:$0xf0]  ;;  %v877_v36 = vld [vmem:[%s1207_s24 + $0x70] sm:$0xf]  ;;  %v1033_v39 = vld [vmem:[%s1207_s24 + $0xf4] sm:$0xf0] }
  0x21   : > { %984 = vmatmul.msk.bf16.gmra.mxu1 %vm430_vm0, %v834_v15  ;;  %v874_v13 = vor.u32 %v1014_v11, %v871_v12  ;;  %v943_v15 = vld [vmem:[%s1207_s24 + $0xf8] sm:$0xf0] }
  0x22   : > { %993 = vmatmul.msk.bf16.gmra.mxu3 %vm430_vm0, %v906_v22  ;;  %v946_v18 = vor.u32 %v1032_v14, %v943_v15 }
  0x24   : > { %485 = vmatpush.bf16.msra.mxu0 %v1035_v16  ;;  %1144 = vmatpush.bf16.msra.mxu2 %v1035_v16  ;;  %v861_v16 = vld [vmem:[%s1207_s24 + $0x50] sm:$0xf] }
  0x25   : > { %v862_v21 = vor.u32 %v1013_v17, %v861_v16 }
  0x28   : > { %486 = vmatpush.bf16.msra.mxu0 %v1034_v19  ;;  %1145 = vmatpush.bf16.msra.mxu2 %v1034_v19  ;;  %v925_v19 = vld [vmem:[%s1207_s24 + $0xd0] sm:$0xf] }
  0x29   : > { %v926_v22 = vor.u32 %v1029_v20, %v925_v19 }
  0x2b   : > { %487 = vmatmul.bf16.vlgmr.msra.gmra.mxu0 %v822_v25  ;;  %527 = vmatmul.bf16.vlgmr.msra.gmra.mxu2 %v886_v26  ;;  %v882_v25 = vor.u32 %v1016_v23, %v879_v24  ;;  %v869_v26 = vld [vmem:[%s1207_s24 + $0x60] sm:$0xf] }
  0x2c   : > { %v870_v30 = vor.u32 %v1015_v27, %v869_v26 }
  0x31   : > { %985 = vmatmul.msk.bf16.gmra.mxu1 %vm430_vm0, %v842_v29  ;;  %v1031_v29 = vld [vmem:[%s1207_s24 + $0xe4] sm:$0xf0] }
  0x32   : > { %994 = vmatmul.msk.bf16.gmra.mxu3 %vm430_vm0, %v914_v34  ;;  %v934_v31 = vor.u32 %v1031_v29, %v933_v28  ;;  %v890_v34 = vor.u32 %v1018_v32, %v887_v33 }
  0x3b   : > { %492 = vmatmul.bf16.gmra.mxu0 %v830_v37  ;;  %532 = vmatmul.bf16.gmra.mxu2 %v894_v38  ;;  %v1017_v37 = vld [vmem:[%s1207_s24 + $0x74] sm:$0xf0]  ;;  %v941_v38 = vld [vmem:[%s1207_s24 + $0xf0] sm:$0xf] }
  0x3c   : > { %v878_v40 = vor.u32 %v1017_v37, %v877_v36 }
  0x41   : > { %986 = vmatmul.msk.bf16.gmra.mxu1 %vm430_vm0, %v850_v41  ;;  %v942_v41 = vor.u32 %v1033_v39, %v941_v38 }
  0x42   : > { %995 = vmatmul.msk.bf16.gmra.mxu3 %vm430_vm0, %v922_v46  ;;  %v1310_v46 = vld [vmem:[%s1377_s2] ss:$0 sm:$0xff] }
  0x4b   : > { %497 = vmatmul.bf16.gmra.mxu0 %v838_v49  ;;  %537 = vmatmul.bf16.gmra.mxu2 %v902_v50 }
  0x51   : > { %987 = vmatmul.msk.bf16.gmra.mxu1 %vm430_vm0, %v858_v53 }
  0x52   : > { %996 = vmatmul.msk.bf16.gmra.mxu3 %vm430_vm0, %v930_v58 }
  0x5b   : > { %502 = vmatmul.bf16.gmra.mxu0 %v846_v61  ;;  %542 = vmatmul.bf16.gmra.mxu2 %v910_v62 }
  0x61   : > { %988 = vmatmul.msk.bf16.gmra.mxu1 %vm430_vm0, %v866_v1 }
  0x62   : > { %997 = vmatmul.msk.bf16.gmra.mxu3 %vm430_vm0, %v938_v6 }
  0x6b   : > { %507 = vmatmul.bf16.gmra.mxu0 %v854_v9  ;;  %547 = vmatmul.bf16.gmra.mxu2 %v918_v10 }
  0x71   : > { %989 = vmatmul.msk.bf16.gmra.mxu1 %vm430_vm0, %v874_v13 }
  0x72   : > { %998 = vmatmul.msk.bf16.gmra.mxu3 %vm430_vm0, %v946_v18 }
  0x7b   : > { %512 = vmatmul.bf16.gmra.mxu0 %v862_v21  ;;  %552 = vmatmul.bf16.gmra.mxu2 %v926_v22 }
  0x81   : > { %990 = vmatmul.msk.bf16.gmra.mxu1 %vm430_vm0, %v882_v25 }
  0x8b   : > { %517 = vmatmul.bf16.gmra.mxu0 %v870_v30  ;;  %557 = vmatmul.bf16.gmra.mxu2 %v934_v31 }
  0x8e   : > { %v577_v35 = vpop.f32.mrf.mxu1 }
  0x91   : > { %991 = vmatmul.msk.bf16.gmra.mxu1 %vm430_vm0, %v890_v34 }
  0x95   : > { %v622_v44 = vpop.f32.mrf.mxu3 }
  0x96   : > { %v579_v42 = vpop.f32.mrf.mxu1 }
  0x9b   : > { %522 = vmatmul.bf16.gmra.mxu0 %v878_v40  ;;  %562 = vmatmul.bf16.gmra.mxu2 %v942_v41 }
  0x9d   : > { %v624_v54 = vpop.f32.mrf.mxu3 }
  0x9e   : > { %v582_v43 = vpop.f32.mrf.mxu1 }
  0xa5   : > { %v627_v62 = vpop.f32.mrf.mxu3 }
  0xa6   : > { %v584_v47 = vpop.f32.mrf.mxu1 }
  0xa8   : > { %v488_v45 = vpop.f32.mrf.mxu0 }
  0xa9   : > { %v489_v48 = vadd.f32 %v1310_v46, %v488_v45 }
  0xab   : > { %v578_v51 = vadd.f32 %v577_v35, %v489_v48 }
  0xad   : > { %v657_v56 = vmax.f32 %v578_v51, 0.0  ;;  %v629_v9 = vpop.f32.mrf.mxu3 }
  0xae   : > { %v1313_v49 = vpop.f32.mrf.mxu2  ;;  %v587_v53 = vpop.f32.mrf.mxu1 }
  0xb0   : > { %v490_v50 = vpop.f32.mrf.mxu0 }
  0xb1   : > { %v491_v52 = vadd.f32 %v1310_v46, %v490_v50 }
  0xb3   : > { %v580_v55 = vadd.f32 %v579_v42, %v491_v52 }
  0xb5   : > { %v658_v57 = vmax.f32 %v580_v55, 0.0  ;;  %v632_v22 = vpop.f32.mrf.mxu3 }
  0xb6   : > { %v1322_v59 = vpop.f32.mrf.mxu2  ;;  %v589_v61 = vpop.f32.mrf.mxu1 }
  0xb7   : > { %v1046_v58 = vpack.c.bf16 %v658_v57, %v657_v56 }
  0xb8   : > { %v493_v60 = vpop.f32.mrf.mxu0 }
  0xb9   : > { %1047 = vst [vmem:[%s1320_s16] sm:$0xff] %v1046_v58   ;;  %v494_v63 = vadd.f32 %v1310_v46, %v493_v60 }
  0xbb   : > { %v583_v2 = vadd.f32 %v582_v43, %v494_v63 }
  0xbd   : > { %v659_v7 = vmax.f32 %v583_v2, 0.0  ;;  %v634_v37 = vpop.f32.mrf.mxu3 }
  0xbe   : > { %v533_v0 = vpop.f32.mrf.mxu2  ;;  %v592_v4 = vpop.f32.mrf.mxu1 }
  0xbf   : > { %v534_v6 = vadd.f32 %v1310_v46, %v533_v0 }
  0xc0   : > { %v495_v1 = vpop.f32.mrf.mxu0 }
  0xc1   : > { %v496_v3 = vadd.f32 %v1310_v46, %v495_v1  ;;  %v623_v12 = vadd.f32 %v622_v44, %v534_v6 }
  0xc3   : > { %v585_v5 = vadd.f32 %v584_v47, %v496_v3  ;;  %v675_v17 = vmax.f32 %v623_v12, 0.0 }
  0xc5   : > { %v660_v8 = vmax.f32 %v585_v5, 0.0  ;;  %v637_v51 = vpop.f32.mrf.mxu3 }
  0xc6   : > { %v535_v11 = vpop.f32.mrf.mxu2  ;;  %v594_v15 = vpop.f32.mrf.mxu1 }
  0xc7   : > { %v1051_v10 = vpack.c.bf16 %v660_v8, %v659_v7  ;;  %v536_v13 = vadd.f32 %v1310_v46, %v535_v11 }
  0xc8   : > { %v498_v14 = vpop.f32.mrf.mxu0 }
  0xc9   : > { %1123 = vst [vmem:[%s1320_s16 + $0x8] sm:$0xff] %v1051_v10   ;;  %v625_v16 = vadd.f32 %v624_v54, %v536_v13  ;;  %v499_v19 = vadd.f32 %v1310_v46, %v498_v14 }
  0xcb   : > { %v676_v18 = vmax.f32 %v625_v16, 0.0  ;;  %v588_v24 = vadd.f32 %v587_v53, %v499_v19 }
  0xcd   : > { %v1091_v20 = vpack.c.bf16 %v676_v18, %v675_v17  ;;  %v661_v29 = vmax.f32 %v588_v24, 0.0  ;;  %v639_v2 = vpop.f32.mrf.mxu3 }
  0xce   : > { %v538_v21 = vpop.f32.mrf.mxu2  ;;  %v597_v26 = vpop.f32.mrf.mxu1 }
  0xcf   : > { %1131 = vst [vmem:[%s1320_s16 + $0x48] sm:$0xff] %v1091_v20   ;;  %v539_v28 = vadd.f32 %v1310_v46, %v538_v21 }
  0xd0   : > { %v500_v23 = vpop.f32.mrf.mxu0 }
  0xd1   : > { %v501_v25 = vadd.f32 %v1310_v46, %v500_v23  ;;  %v628_v33 = vadd.f32 %v627_v62, %v539_v28 }
  0xd3   : > { %v590_v27 = vadd.f32 %v589_v61, %v501_v25  ;;  %v677_v39 = vmax.f32 %v628_v33, 0.0 }
  0xd5   : > { %v662_v30 = vmax.f32 %v590_v27, 0.0 }
  0xd6   : > { %v540_v32 = vpop.f32.mrf.mxu2  ;;  %v599_v36 = vpop.f32.mrf.mxu1 }
  0xd7   : > { %v1056_v31 = vpack.c.bf16 %v662_v30, %v661_v29  ;;  %v541_v34 = vadd.f32 %v1310_v46, %v540_v32 }
  0xd8   : > { %v503_v35 = vpop.f32.mrf.mxu0 }
  0xd9   : > { %1124 = vst [vmem:[%s1320_s16 + $0x10] sm:$0xff] %v1056_v31   ;;  %v630_v38 = vadd.f32 %v629_v9, %v541_v34  ;;  %v504_v41 = vadd.f32 %v1310_v46, %v503_v35 }
  0xdb   : > { %v678_v40 = vmax.f32 %v630_v38, 0.0  ;;  %v593_v45 = vadd.f32 %v592_v4, %v504_v41 }
  0xdd   : > { %v1096_v42 = vpack.c.bf16 %v678_v40, %v677_v39  ;;  %v663_v53 = vmax.f32 %v593_v45, 0.0 }
  0xde   : > { %v543_v43 = vpop.f32.mrf.mxu2  ;;  %v602_v48 = vpop.f32.mrf.mxu1 }
  0xdf   : > { %1132 = vst [vmem:[%s1320_s16 + $0x50] sm:$0xff] %v1096_v42   ;;  %v544_v52 = vadd.f32 %v1310_v46, %v543_v43 }
  0xe0   : > { %v505_v44 = vpop.f32.mrf.mxu0 }
  0xe1   : > { %v506_v47 = vadd.f32 %v1310_v46, %v505_v44  ;;  %v633_v57 = vadd.f32 %v632_v22, %v544_v52 }
  0xe3   : > { %v595_v50 = vadd.f32 %v594_v15, %v506_v47  ;;  %v679_v63 = vmax.f32 %v633_v57, 0.0  ;;  %v642_v15 = vpop.f32.mrf.mxu3 }
  0xe5   : > { %v664_v54 = vmax.f32 %v595_v50, 0.0 }
  0xe6   : > { %v545_v56 = vpop.f32.mrf.mxu2  ;;  %v604_v61 = vpop.f32.mrf.mxu1 }
  0xe7   : > { %v1061_v55 = vpack.c.bf16 %v664_v54, %v663_v53  ;;  %v546_v58 = vadd.f32 %v1310_v46, %v545_v56 }
  0xe8   : > { %v508_v60 = vpop.f32.mrf.mxu0 }
  0xe9   : > { %1125 = vst [vmem:[%s1320_s16 + $0x18] sm:$0xff] %v1061_v55   ;;  %v635_v62 = vadd.f32 %v634_v37, %v546_v58  ;;  %v509_v1 = vadd.f32 %v1310_v46, %v508_v60  ;;  %v529_v60 = vadd.f32 %v1310_v46, %v1313_v49 }
  0xeb   : > { %v680_v0 = vmax.f32 %v635_v62, 0.0  ;;  %v598_v6 = vadd.f32 %v597_v26, %v509_v1  ;;  %v644_v30 = vpop.f32.mrf.mxu3 }
  0xed   : > { %v1101_v3 = vpack.c.bf16 %v680_v0, %v679_v63  ;;  %v665_v11 = vmax.f32 %v598_v6, 0.0  ;;  %v531_v63 = vadd.f32 %v1310_v46, %v1322_v59 }
  0xee   : > { %v548_v4 = vpop.f32.mrf.mxu2  ;;  %v607_v8 = vpop.f32.mrf.mxu1 }
  0xef   : > { %1133 = vst [vmem:[%s1320_s16 + $0x58] sm:$0xff] %v1101_v3   ;;  %v549_v10 = vadd.f32 %v1310_v46, %v548_v4 }
  0xf0   : > { %v510_v5 = vpop.f32.mrf.mxu0 }
  0xf1   : > { %v511_v7 = vadd.f32 %v1310_v46, %v510_v5  ;;  %v638_v16 = vadd.f32 %v637_v51, %v549_v10 }
  0xf3   : > { %v600_v9 = vadd.f32 %v599_v36, %v511_v7  ;;  %v681_v21 = vmax.f32 %v638_v16, 0.0  ;;  %v647_v42 = vpop.f32.mrf.mxu3 }
  0xf5   : > { %v666_v12 = vmax.f32 %v600_v9, 0.0 }
  0xf6   : > { %v550_v14 = vpop.f32.mrf.mxu2  ;;  %v609_v19 = vpop.f32.mrf.mxu1 }
  0xf7   : > { %v1066_v13 = vpack.c.bf16 %v666_v12, %v665_v11  ;;  %v551_v17 = vadd.f32 %v1310_v46, %v550_v14 }
  0xf8   : > { %v513_v18 = vpop.f32.mrf.mxu0 }
  0xf9   : > { %1126 = vst [vmem:[%s1320_s16 + $0x20] sm:$0xff] %v1066_v13   ;;  %v640_v20 = vadd.f32 %v639_v2, %v551_v17  ;;  %v514_v23 = vadd.f32 %v1310_v46, %v513_v18 }
  0xfb   : > { %v682_v22 = vmax.f32 %v640_v20, 0.0  ;;  %v603_v27 = vadd.f32 %v602_v48, %v514_v23  ;;  %v649_v58 = vpop.f32.mrf.mxu3 }
  0xfd   : > { %v1106_v24 = vpack.c.bf16 %v682_v22, %v681_v21  ;;  %v667_v33 = vmax.f32 %v603_v27, 0.0 }
  0xfe   : > { %v553_v25 = vpop.f32.mrf.mxu2  ;;  %v612_v29 = vpop.f32.mrf.mxu1 }
  0xff   : > { %1134 = vst [vmem:[%s1320_s16 + $0x60] sm:$0xff] %v1106_v24   ;;  %v554_v32 = vadd.f32 %v1310_v46, %v553_v25 }
 0x100   : > { %v515_v26 = vpop.f32.mrf.mxu0 }
 0x101   : > { %v516_v28 = vadd.f32 %v1310_v46, %v515_v26  ;;  %v643_v37 = vadd.f32 %v642_v15, %v554_v32 }
 0x103   : > { %v605_v31 = vadd.f32 %v604_v61, %v516_v28  ;;  %v683_v43 = vmax.f32 %v643_v37, 0.0  ;;  %v652_v59 = vpop.f32.mrf.mxu3 }
 0x105   : > { %v668_v34 = vmax.f32 %v605_v31, 0.0 }
 0x106   : > { %v555_v36 = vpop.f32.mrf.mxu2  ;;  %v614_v40 = vpop.f32.mrf.mxu1 }
 0x107   : > { %v1071_v35 = vpack.c.bf16 %v668_v34, %v667_v33  ;;  %v556_v38 = vadd.f32 %v1310_v46, %v555_v36 }
 0x108   : > { %v518_v39 = vpop.f32.mrf.mxu0 }
 0x109   : > { %1127 = vst [vmem:[%s1320_s16 + $0x28] sm:$0xff] %v1071_v35   ;;  %v645_v41 = vadd.f32 %v644_v30, %v556_v38  ;;  %v519_v45 = vadd.f32 %v1310_v46, %v518_v39 }
 0x10b   : > { %v684_v44 = vmax.f32 %v645_v41, 0.0  ;;  %v608_v51 = vadd.f32 %v607_v8, %v519_v45  ;;  %v654_v25 = vpop.f32.mrf.mxu3 }
 0x10d   : > { %v1111_v47 = vpack.c.bf16 %v684_v44, %v683_v43  ;;  %v669_v56 = vmax.f32 %v608_v51, 0.0 }
 0x10e   : > { %v558_v48 = vpop.f32.mrf.mxu2  ;;  %v617_v53 = vpop.f32.mrf.mxu1 }
 0x10f   : > { %1135 = vst [vmem:[%s1320_s16 + $0x68] sm:$0xff] %v1111_v47   ;;  %v559_v55 = vadd.f32 %v1310_v46, %v558_v48  ;;  %v618_v1 = vadd.f32 %v617_v53, %v529_v60 }
 0x110   : > { %v520_v50 = vpop.f32.mrf.mxu0 }
 0x111   : > { %v521_v52 = vadd.f32 %v1310_v46, %v520_v50  ;;  %v648_v0 = vadd.f32 %v647_v42, %v559_v55  ;;  %v673_v8 = vmax.f32 %v618_v1, 0.0 }
 0x113   : > { %v610_v54 = vadd.f32 %v609_v19, %v521_v52  ;;  %v685_v7 = vmax.f32 %v648_v0, 0.0 }
 0x115   : > { %v670_v57 = vmax.f32 %v610_v54, 0.0 }
 0x116   : > { %v560_v62 = vpop.f32.mrf.mxu2  ;;  %v619_v4 = vpop.f32.mrf.mxu1 }
 0x117   : > { %v1076_v61 = vpack.c.bf16 %v670_v57, %v669_v56  ;;  %v561_v2 = vadd.f32 %v1310_v46, %v560_v62  ;;  %v620_v6 = vadd.f32 %v619_v4, %v531_v63 }
 0x118   : > { %v523_v3 = vpop.f32.mrf.mxu0 }
 0x119   : > { %1128 = vst [vmem:[%s1320_s16 + $0x30] sm:$0xff] %v1076_v61   ;;  %v650_v5 = vadd.f32 %v649_v58, %v561_v2  ;;  %v674_v49 = vmax.f32 %v620_v6, 0.0  ;;  %v524_v10 = vadd.f32 %v1310_v46, %v523_v3 }
 0x11b   : > { %v686_v9 = vmax.f32 %v650_v5, 0.0  ;;  %v1086_v12 = vpack.c.bf16 %v674_v49, %v673_v8  ;;  %v613_v15 = vadd.f32 %v612_v29, %v524_v10 }
 0x11d   : > { %v1116_v11 = vpack.c.bf16 %v686_v9, %v685_v7  ;;  %1130 = vst [vmem:[%s1320_s16 + $0x40] sm:$0xff] %v1086_v12   ;;  %v671_v19 = vmax.f32 %v613_v15, 0.0 }
 0x11e   : > { %v563_v13 = vpop.f32.mrf.mxu2 }
 0x11f   : > { %1136 = vst [vmem:[%s1320_s16 + $0x70] sm:$0xff] %v1116_v11   ;;  %v564_v18 = vadd.f32 %v1310_v46, %v563_v13 }
 0x120   : > { %v525_v14 = vpop.f32.mrf.mxu0 }
 0x121   : > { %v526_v16 = vadd.f32 %v1310_v46, %v525_v14  ;;  %v653_v23 = vadd.f32 %v652_v59, %v564_v18 }
 0x123   : > { %v615_v17 = vadd.f32 %v614_v40, %v526_v16  ;;  %v687_v27 = vmax.f32 %v653_v23, 0.0 }
 0x125   : > { %v672_v20 = vmax.f32 %v615_v17, 0.0 }
 0x126   : > { %v565_v22 = vpop.f32.mrf.mxu2 }
 0x127   : > { %v1081_v21 = vpack.c.bf16 %v672_v20, %v671_v19  ;;  %v566_v24 = vadd.f32 %v1310_v46, %v565_v22 }
 0x129   : > { %1129 = vst [vmem:[%s1320_s16 + $0x38] sm:$0xff] %v1081_v21   ;;  %v655_v26 = vadd.f32 %v654_v25, %v566_v24 }
 0x12b   : > { %v688_v28 = vmax.f32 %v655_v26, 0.0 }
 0x12d   : > { %v1121_v29 = vpack.c.bf16 %v688_v28, %v687_v27 }
 0x12f   : > { %1137 = vst [vmem:[%s1320_s16 + $0x78] sm:$0xff] %v1121_v29  }
 0x130 PF: > { %s13_s12 = sadd.s32 1, %s1162_s12  }
 0x131   : > { %p10_p4 = scmp.ge.s32.totalorder %s13_s12, 4  }
 0x133   :  { %12 = sbr.rel (!%p10_p4) target bundleno = 1 (0x1), region = 62 }

// kernel: cifar_attention_resnet_forward.10
= control target key start
LH: loop header
LB: loop body
LE: loop exit
PB: predicated region body
PF: predicated region fallthrough
CT: control target
= control target key end

     0   :  { %s1427_s15 = smov 0   ;;  %s1645_s0 = inlined_call_operand.vmem [shape: bf16[512,144], index: 0, kind: input, shape index: {}]   ;;  %s1646_s1 = inlined_call_operand.vmem [shape: bf16[144,128], index: 1, kind: input, shape index: {}]   ;;  %s1647_s2 = inlined_call_operand.vmem [shape: f32[1,128], index: 2, kind: input, shape index: {}]   ;;  %s1648_s3 = inlined_call_operand.vmem [shape: bf16[512,128], index: 3, kind: input, shape index: {}]   ;;  %s1649_s4 = inlined_call_operand.vmem [shape: bf16[512,128], index: 4, kind: output, shape index: {}]  }
   0x1 LB: > { %s966_s16 = sadd.s32 4294967295, %s1400_s15   ;;  %p970_p0 = scmp.ge.s32.totalorder %s1400_s15, 1  ;;  %s1400_s15 = sphi %s1427_s15, %s14_s15  }
   0x2   : > { %p175_p1 = scmp.lt.s32.totalorder %s1400_s15, 3 }
   0x4   : > { %p176_p2 = pnand %p970_p0, %p175_p1 }
   0x5   : > { %s971_s21 = sshll.u32 (!%p176_p2), %s966_s16, 5 }
   0x6   : > { %179 = sbr.rel (%p176_p2) target bundleno = 306 (0x132), region = 36  ;;  %p208_p3 = scmp.lt.s32.totalorder (!%p176_p2), %s971_s21, 63 }
   0xb   : > { %v1200_v0 = vld [vmem:[%s1646_s1 + $0x38] sm:$0xff]  ;;  %v1201_v1 = vld [vmem:[%s1646_s1 + $0x40] sm:$0xff]  ;;  %v1199_v2 = vld [vmem:[%s1646_s1 + $0x30] sm:$0xff]  ;;  %s1651_s21 = smov (!%p208_p3, %s971_s21), 63  ;;  %vm479_vm0 = vcmask 130048  }
   0xc   : > { %528 = vmatpush.bf16.msra.mxu0 %v1200_v0  ;;  %1376 = vmatpush.bf16.msra.mxu2 %v1200_v0  ;;  %s1160_s24 = sshll.u32 %s1651_s21, 3  ;;  %v1198_v3 = vld [vmem:[%s1646_s1 + $0x28] sm:$0xff]  ;;  %v1197_v7 = vld [vmem:[%s1646_s1 + $0x20] sm:$0xff]  ;;  %v1196_v11 = vld [vmem:[%s1646_s1 + $0x18] sm:$0xff]  ;;  %s975_s14 = sshll.u32 %s1651_s21, 2 }
   0xd   : > { %624 = vmatpush.bf16.msra.mxu1 %v1201_v1  ;;  %1384 = vmatpush.bf16.msra.mxu3 %v1201_v1  ;;  %s1450_s27 = scalar_lea.vmem %s1645_s0, %s1160_s24  ;;  %v1195_v12 = vld [vmem:[%s1646_s1 + $0x10] sm:$0xff]  ;;  %v1194_v16 = vld [vmem:[%s1646_s1 + $0x8] sm:$0xff]  ;;  %v1193_v19 = vld [vmem:[%s1646_s1] sm:$0xff]  ;;  %s1559_s20 = scalar_lea.vmem %s1648_s3, %s975_s14 }
   0xe   : > { %v1161_v4 = vld [vmem:[%s1450_s27 + $0x4] sm:$0xf]  ;;  %v982_v5 = vld [vmem:[%s1450_s27 + $0x8] sm:$0xf0]  ;;  %v1179_v8 = vld [vmem:[%s1450_s27 + $0x94] sm:$0xf]  ;;  %s1571_s23 = scalar_lea.vmem %s1649_s4, %s975_s14 }
   0xf   : > { %v985_v6 = vor.u32 %v1161_v4, %v982_v5  ;;  %v1054_v9 = vld [vmem:[%s1450_s27 + $0x98] sm:$0xf0]  ;;  %v1163_v13 = vld [vmem:[%s1450_s27 + $0x14] sm:$0xf]  ;;  %v1181_v17 = vld [vmem:[%s1450_s27 + $0xa4] sm:$0xf] }
  0x10   : > { %529 = vmatpush.bf16.msra.mxu0 %v1199_v2  ;;  %1377 = vmatpush.bf16.msra.mxu2 %v1199_v2  ;;  %v1057_v10 = vor.u32 %v1179_v8, %v1054_v9  ;;  %v990_v14 = vld [vmem:[%s1450_s27 + $0x18] sm:$0xf0]  ;;  %v1062_v18 = vld [vmem:[%s1450_s27 + $0xa8] sm:$0xf0]  ;;  %v980_v20 = vld [vmem:[%s1450_s27] sm:$0xf] }
  0x11   : > { %1142 = vmatmul.msk.bf16.vlgmr.msra.gmra.mxu1 %vm479_vm0, %v985_v6  ;;  %v993_v15 = vor.u32 %v1163_v13, %v990_v14  ;;  %v1162_v21 = vld [vmem:[%s1450_s27 + $0x4] sm:$0xf0]  ;;  %v1065_v22 = vor.u32 %v1181_v17, %v1062_v18  ;;  %v1044_v23 = vld [vmem:[%s1450_s27 + $0x80] sm:$0xf]  ;;  %v1165_v27 = vld [vmem:[%s1450_s27 + $0x24] sm:$0xf] }
  0x12   : > { %1151 = vmatmul.msk.bf16.vlgmr.msra.gmra.mxu3 %vm479_vm0, %v1057_v10  ;;  %v1178_v24 = vld [vmem:[%s1450_s27 + $0x84] sm:$0xf0]  ;;  %v981_v25 = vor.u32 %v1162_v21, %v980_v20  ;;  %v998_v28 = vld [vmem:[%s1450_s27 + $0x28] sm:$0xf0]  ;;  %v1183_v30 = vld [vmem:[%s1450_s27 + $0xb4] sm:$0xf] }
  0x13   : > { %v1045_v26 = vor.u32 %v1178_v24, %v1044_v23  ;;  %v1001_v29 = vor.u32 %v1165_v27, %v998_v28  ;;  %v1070_v31 = vld [vmem:[%s1450_s27 + $0xb8] sm:$0xf0]  ;;  %v988_v32 = vld [vmem:[%s1450_s27 + $0x10] sm:$0xf]  ;;  %v1164_v33 = vld [vmem:[%s1450_s27 + $0x14] sm:$0xf0] }
  0x14   : > { %530 = vmatpush.bf16.msra.mxu0 %v1198_v3  ;;  %1378 = vmatpush.bf16.msra.mxu2 %v1198_v3  ;;  %v1073_v34 = vor.u32 %v1183_v30, %v1070_v31  ;;  %v1052_v35 = vld [vmem:[%s1450_s27 + $0x90] sm:$0xf]  ;;  %v1180_v36 = vld [vmem:[%s1450_s27 + $0x94] sm:$0xf0]  ;;  %v989_v37 = vor.u32 %v1164_v33, %v988_v32  ;;  %v1167_v39 = vld [vmem:[%s1450_s27 + $0x34] sm:$0xf] }
  0x15   : > { %v1053_v38 = vor.u32 %v1180_v36, %v1052_v35  ;;  %v1006_v40 = vld [vmem:[%s1450_s27 + $0x38] sm:$0xf0]  ;;  %v1185_v42 = vld [vmem:[%s1450_s27 + $0xc4] sm:$0xf]  ;;  %v1078_v43 = vld [vmem:[%s1450_s27 + $0xc8] sm:$0xf0] }
  0x16   : > { %v1009_v41 = vor.u32 %v1167_v39, %v1006_v40  ;;  %v996_v44 = vld [vmem:[%s1450_s27 + $0x20] sm:$0xf]  ;;  %v1166_v45 = vld [vmem:[%s1450_s27 + $0x24] sm:$0xf0]  ;;  %v1081_v46 = vor.u32 %v1185_v42, %v1078_v43  ;;  %v1169_v51 = vld [vmem:[%s1450_s27 + $0x44] sm:$0xf] }
  0x17   : > { %v1060_v47 = vld [vmem:[%s1450_s27 + $0xa0] sm:$0xf]  ;;  %v1182_v48 = vld [vmem:[%s1450_s27 + $0xa4] sm:$0xf0]  ;;  %v997_v49 = vor.u32 %v1166_v45, %v996_v44  ;;  %v1014_v52 = vld [vmem:[%s1450_s27 + $0x48] sm:$0xf0] }
  0x18   : > { %531 = vmatpush.bf16.msra.mxu0 %v1197_v7  ;;  %1379 = vmatpush.bf16.msra.mxu2 %v1197_v7  ;;  %v1061_v50 = vor.u32 %v1182_v48, %v1060_v47  ;;  %v1017_v53 = vor.u32 %v1169_v51, %v1014_v52  ;;  %v1187_v54 = vld [vmem:[%s1450_s27 + $0xd4] sm:$0xf]  ;;  %v1086_v55 = vld [vmem:[%s1450_s27 + $0xd8] sm:$0xf0]  ;;  %v1004_v56 = vld [vmem:[%s1450_s27 + $0x30] sm:$0xf] }
  0x19   : > { %v1168_v57 = vld [vmem:[%s1450_s27 + $0x34] sm:$0xf0]  ;;  %v1089_v58 = vor.u32 %v1187_v54, %v1086_v55  ;;  %v1068_v59 = vld [vmem:[%s1450_s27 + $0xb0] sm:$0xf]  ;;  %v1171_v63 = vld [vmem:[%s1450_s27 + $0x54] sm:$0xf] }
  0x1a   : > { %v1184_v60 = vld [vmem:[%s1450_s27 + $0xb4] sm:$0xf0]  ;;  %v1005_v61 = vor.u32 %v1168_v57, %v1004_v56  ;;  %v1022_v0 = vld [vmem:[%s1450_s27 + $0x58] sm:$0xf0]  ;;  %v1189_v2 = vld [vmem:[%s1450_s27 + $0xe4] sm:$0xf] }
  0x1b   : > { %v1069_v62 = vor.u32 %v1184_v60, %v1068_v59  ;;  %v1025_v1 = vor.u32 %v1171_v63, %v1022_v0  ;;  %v1094_v3 = vld [vmem:[%s1450_s27 + $0xe8] sm:$0xf0]  ;;  %v1012_v4 = vld [vmem:[%s1450_s27 + $0x40] sm:$0xf]  ;;  %v1170_v5 = vld [vmem:[%s1450_s27 + $0x44] sm:$0xf0] }
  0x1c   : > { %532 = vmatpush.bf16.msra.mxu0 %v1196_v11  ;;  %1380 = vmatpush.bf16.msra.mxu2 %v1196_v11  ;;  %v1097_v6 = vor.u32 %v1189_v2, %v1094_v3  ;;  %v1076_v7 = vld [vmem:[%s1450_s27 + $0xc0] sm:$0xf]  ;;  %v1186_v8 = vld [vmem:[%s1450_s27 + $0xc4] sm:$0xf0]  ;;  %v1013_v9 = vor.u32 %v1170_v5, %v1012_v4  ;;  %v1173_v11 = vld [vmem:[%s1450_s27 + $0x64] sm:$0xf] }
  0x1d   : > { %v1077_v10 = vor.u32 %v1186_v8, %v1076_v7  ;;  %v1191_v14 = vld [vmem:[%s1450_s27 + $0xf4] sm:$0xf]  ;;  %v1172_v17 = vld [vmem:[%s1450_s27 + $0x54] sm:$0xf0]  ;;  %v1038_v24 = vld [vmem:[%s1450_s27 + $0x78] sm:$0xf0] }
  0x1e   : > { %v1188_v20 = vld [vmem:[%s1450_s27 + $0xd4] sm:$0xf0]  ;;  %v1175_v23 = vld [vmem:[%s1450_s27 + $0x74] sm:$0xf]  ;;  %v1174_v27 = vld [vmem:[%s1450_s27 + $0x64] sm:$0xf0] }
  0x1f   : > { %v1092_v28 = vld [vmem:[%s1450_s27 + $0xe0] sm:$0xf]  ;;  %v1177_v32 = vld [vmem:[%s1450_s27 + $0x84] sm:$0xf]  ;;  %v1046_v33 = vld [vmem:[%s1450_s27 + $0x88] sm:$0xf0] }
  0x20   : > { %533 = vmatpush.bf16.msra.mxu0 %v1195_v12  ;;  %1381 = vmatpush.bf16.msra.mxu2 %v1195_v12  ;;  %v1030_v12 = vld [vmem:[%s1450_s27 + $0x68] sm:$0xf0]  ;;  %v1036_v36 = vld [vmem:[%s1450_s27 + $0x70] sm:$0xf]  ;;  %v1192_v39 = vld [vmem:[%s1450_s27 + $0xf4] sm:$0xf0] }
  0x21   : > { %1143 = vmatmul.msk.bf16.gmra.mxu1 %vm479_vm0, %v993_v15  ;;  %v1033_v13 = vor.u32 %v1173_v11, %v1030_v12  ;;  %v1102_v15 = vld [vmem:[%s1450_s27 + $0xf8] sm:$0xf0]  ;;  %v1554_v44 = vld [vmem:[%s1647_s2] ss:$0 sm:$0xff]  ;;  %v1346_v5 = vld [vmem:[%s1559_s20 + $0x8] sm:$0xff]  }
  0x22   : > { %1152 = vmatmul.msk.bf16.gmra.mxu3 %vm479_vm0, %v1065_v22  ;;  %v1105_v18 = vor.u32 %v1191_v14, %v1102_v15  ;;  %v1208_v7 = vunpack.c.l.bf16 %v1346_v5  ;;  %v1209_v11 = vunpack.c.h.bf16 %v1346_v5  ;;  %v1354_v15 = vld [vmem:[%s1559_s20 + $0x48] sm:$0xff]  }
  0x24   : > { %534 = vmatpush.bf16.msra.mxu0 %v1194_v16  ;;  %1382 = vmatpush.bf16.msra.mxu2 %v1194_v16  ;;  %v1020_v16 = vld [vmem:[%s1450_s27 + $0x50] sm:$0xf] }
  0x25   : > { %v1021_v21 = vor.u32 %v1172_v17, %v1020_v16 }
  0x28   : > { %535 = vmatpush.bf16.msra.mxu0 %v1193_v19  ;;  %1383 = vmatpush.bf16.msra.mxu2 %v1193_v19  ;;  %v1084_v19 = vld [vmem:[%s1450_s27 + $0xd0] sm:$0xf] }
  0x29   : > { %v1085_v22 = vor.u32 %v1188_v20, %v1084_v19  ;;  %v1240_v20 = vunpack.c.l.bf16 %v1354_v15 }
  0x2b   : > { %536 = vmatmul.bf16.vlgmr.msra.gmra.mxu0 %v981_v25  ;;  %576 = vmatmul.bf16.vlgmr.msra.gmra.mxu2 %v1045_v26  ;;  %v1041_v25 = vor.u32 %v1175_v23, %v1038_v24  ;;  %v1028_v26 = vld [vmem:[%s1450_s27 + $0x60] sm:$0xf] }
  0x2c   : > { %v1029_v30 = vor.u32 %v1174_v27, %v1028_v26 }
  0x31   : > { %1144 = vmatmul.msk.bf16.gmra.mxu1 %vm479_vm0, %v1001_v29  ;;  %v1190_v29 = vld [vmem:[%s1450_s27 + $0xe4] sm:$0xf0] }
  0x32   : > { %1153 = vmatmul.msk.bf16.gmra.mxu3 %vm479_vm0, %v1073_v34  ;;  %v1093_v31 = vor.u32 %v1190_v29, %v1092_v28  ;;  %v1049_v34 = vor.u32 %v1177_v32, %v1046_v33  ;;  %v1347_v33 = vld [vmem:[%s1559_s20 + $0x10] sm:$0xff]  }
  0x3b   : > { %541 = vmatmul.bf16.gmra.mxu0 %v989_v37  ;;  %581 = vmatmul.bf16.gmra.mxu2 %v1053_v38  ;;  %v1176_v37 = vld [vmem:[%s1450_s27 + $0x74] sm:$0xf0]  ;;  %v1100_v38 = vld [vmem:[%s1450_s27 + $0xf0] sm:$0xf] }
  0x3c   : > { %v1037_v40 = vor.u32 %v1176_v37, %v1036_v36  ;;  %v1212_v37 = vunpack.c.l.bf16 %v1347_v33 }
  0x41   : > { %1145 = vmatmul.msk.bf16.gmra.mxu1 %vm479_vm0, %v1009_v41  ;;  %v1101_v41 = vor.u32 %v1192_v39, %v1100_v38 }
  0x42   : > { %1154 = vmatmul.msk.bf16.gmra.mxu3 %vm479_vm0, %v1081_v46 }
  0x4b   : > { %546 = vmatmul.bf16.gmra.mxu0 %v997_v49  ;;  %586 = vmatmul.bf16.gmra.mxu2 %v1061_v50  ;;  %v1203_v49 = vld [vmem:[%s1559_s20] sm:$0xff]  }
  0x4c   : > { %v1204_v51 = vunpack.c.l.bf16 %v1203_v49  ;;  %v1205_v55 = vunpack.c.h.bf16 %v1203_v49 }
  0x51   : > { %1146 = vmatmul.msk.bf16.gmra.mxu1 %vm479_vm0, %v1017_v53 }
  0x52   : > { %1155 = vmatmul.msk.bf16.gmra.mxu3 %vm479_vm0, %v1089_v58 }
  0x5b   : > { %551 = vmatmul.bf16.gmra.mxu0 %v1005_v61  ;;  %591 = vmatmul.bf16.gmra.mxu2 %v1069_v62 }
  0x61   : > { %1147 = vmatmul.msk.bf16.gmra.mxu1 %vm479_vm0, %v1025_v1 }
  0x62   : > { %1156 = vmatmul.msk.bf16.gmra.mxu3 %vm479_vm0, %v1097_v6 }
  0x6b   : > { %556 = vmatmul.bf16.gmra.mxu0 %v1013_v9  ;;  %596 = vmatmul.bf16.gmra.mxu2 %v1077_v10 }
  0x71   : > { %1148 = vmatmul.msk.bf16.gmra.mxu1 %vm479_vm0, %v1033_v13 }
  0x72   : > { %1157 = vmatmul.msk.bf16.gmra.mxu3 %vm479_vm0, %v1105_v18 }
  0x7b   : > { %561 = vmatmul.bf16.gmra.mxu0 %v1021_v21  ;;  %601 = vmatmul.bf16.gmra.mxu2 %v1085_v22 }
  0x81   : > { %1149 = vmatmul.msk.bf16.gmra.mxu1 %vm479_vm0, %v1041_v25  ;;  %v1241_v25 = vunpack.c.h.bf16 %v1354_v15 }
  0x8b   : > { %566 = vmatmul.bf16.gmra.mxu0 %v1029_v30  ;;  %606 = vmatmul.bf16.gmra.mxu2 %v1093_v31 }
  0x8e   : > { %v626_v35 = vpop.f32.mrf.mxu1 }
  0x91   : > { %1150 = vmatmul.msk.bf16.gmra.mxu1 %vm479_vm0, %v1049_v34 }
  0x95   : > { %v671_v45 = vpop.f32.mrf.mxu3 }
  0x96   : > { %v628_v42 = vpop.f32.mrf.mxu1 }
  0x9b   : > { %571 = vmatmul.bf16.gmra.mxu0 %v1037_v40  ;;  %611 = vmatmul.bf16.gmra.mxu2 %v1101_v41 }
  0x9d   : > { %v673_v57 = vpop.f32.mrf.mxu3 }
  0x9e   : > { %v631_v43 = vpop.f32.mrf.mxu1 }
  0xa5   : > { %v676_v4 = vpop.f32.mrf.mxu3 }
  0xa6   : > { %v633_v47 = vpop.f32.mrf.mxu1 }
  0xa8   : > { %v537_v46 = vpop.f32.mrf.mxu0 }
  0xa9   : > { %v538_v48 = vadd.f32 %v1554_v44, %v537_v46 }
  0xab   : > { %v627_v50 = vadd.f32 %v626_v35, %v538_v48  ;;  %v1355_v48 = vld [vmem:[%s1559_s20 + $0x50] sm:$0xff]  }
  0xad   : > { %v770_v58 = vadd.f32 %v1204_v51, %v627_v50  ;;  %v678_v18 = vpop.f32.mrf.mxu3 }
  0xae   : > { %v1563_v52 = vpop.f32.mrf.mxu2  ;;  %v636_v56 = vpop.f32.mrf.mxu1 }
  0xaf   : > { %v802_v61 = vmax.f32 %v770_v58, 0.0  ;;  %v1245_v58 = vunpack.c.h.bf16 %v1355_v48 }
  0xb0   : > { %v539_v53 = vpop.f32.mrf.mxu0 }
  0xb1   : > { %v540_v54 = vadd.f32 %v1554_v44, %v539_v53  ;;  %v1244_v53 = vunpack.c.l.bf16 %v1355_v48 }
  0xb3   : > { %v629_v59 = vadd.f32 %v628_v42, %v540_v54 }
  0xb5   : > { %v771_v60 = vadd.f32 %v1205_v55, %v629_v59  ;;  %v681_v39 = vpop.f32.mrf.mxu3 }
  0xb6   : > { %v1566_v63 = vpop.f32.mrf.mxu2  ;;  %v638_v2 = vpop.f32.mrf.mxu1 }
  0xb7   : > { %v803_v62 = vmax.f32 %v771_v60, 0.0 }
  0xb8   : > { %v542_v0 = vpop.f32.mrf.mxu0 }
  0xb9   : > { %v1269_v1 = vpack.c.bf16 %v803_v62, %v802_v61  ;;  %v543_v3 = vadd.f32 %v1554_v44, %v542_v0 }
  0xbb   : > { %1270 = vst [vmem:[%s1571_s23] sm:$0xff] %v1269_v1   ;;  %v632_v6 = vadd.f32 %v631_v43, %v543_v3  ;;  %v1213_v43 = vunpack.c.h.bf16 %v1347_v33 }
  0xbd   : > { %v772_v14 = vadd.f32 %v1208_v7, %v632_v6  ;;  %v683_v62 = vpop.f32.mrf.mxu3 }
  0xbe   : > { %v582_v8 = vpop.f32.mrf.mxu2  ;;  %v641_v12 = vpop.f32.mrf.mxu1 }
  0xbf   : > { %v583_v13 = vadd.f32 %v1554_v44, %v582_v8  ;;  %v804_v21 = vmax.f32 %v772_v14, 0.0 }
  0xc0   : > { %v544_v9 = vpop.f32.mrf.mxu0 }
  0xc1   : > { %v545_v10 = vadd.f32 %v1554_v44, %v544_v9  ;;  %v672_v19 = vadd.f32 %v671_v45, %v583_v13 }
  0xc3   : > { %v634_v16 = vadd.f32 %v633_v47, %v545_v10  ;;  %v788_v29 = vadd.f32 %v1240_v20, %v672_v19 }
  0xc5   : > { %v773_v17 = vadd.f32 %v1209_v11, %v634_v16  ;;  %v820_v34 = vmax.f32 %v788_v29, 0.0  ;;  %v686_v20 = vpop.f32.mrf.mxu3 }
  0xc6   : > { %v584_v23 = vpop.f32.mrf.mxu2  ;;  %v643_v28 = vpop.f32.mrf.mxu1 }
  0xc7   : > { %v805_v22 = vmax.f32 %v773_v17, 0.0  ;;  %v585_v24 = vadd.f32 %v1554_v44, %v584_v23 }
  0xc8   : > { %v547_v26 = vpop.f32.mrf.mxu0 }
  0xc9   : > { %v1274_v27 = vpack.c.bf16 %v805_v22, %v804_v21  ;;  %v674_v30 = vadd.f32 %v673_v57, %v585_v24  ;;  %v548_v31 = vadd.f32 %v1554_v44, %v547_v26 }
  0xcb   : > { %1361 = vst [vmem:[%s1571_s23 + $0x8] sm:$0xff] %v1274_v27   ;;  %v789_v32 = vadd.f32 %v1241_v25, %v674_v30  ;;  %v637_v36 = vadd.f32 %v636_v56, %v548_v31 }
  0xcd   : > { %v821_v35 = vmax.f32 %v789_v32, 0.0  ;;  %v774_v47 = vadd.f32 %v1212_v37, %v637_v36  ;;  %v688_v36 = vpop.f32.mrf.mxu3 }
  0xce   : > { %v587_v38 = vpop.f32.mrf.mxu2  ;;  %v646_v45 = vpop.f32.mrf.mxu1 }
  0xcf   : > { %v1314_v40 = vpack.c.bf16 %v821_v35, %v820_v34  ;;  %v588_v46 = vadd.f32 %v1554_v44, %v587_v38  ;;  %v806_v54 = vmax.f32 %v774_v47, 0.0  ;;  %v1349_v35 = vld [vmem:[%s1559_s20 + $0x20] sm:$0xff]  }
  0xd0   : > { %v549_v41 = vpop.f32.mrf.mxu0  ;;  %v1221_v47 = vunpack.c.h.bf16 %v1349_v35 }
  0xd1   : > { %v550_v42 = vadd.f32 %v1554_v44, %v549_v41  ;;  %1369 = vst [vmem:[%s1571_s23 + $0x48] sm:$0xff] %v1314_v40   ;;  %v677_v51 = vadd.f32 %v676_v4, %v588_v46  ;;  %v1348_v4 = vld [vmem:[%s1559_s20 + $0x18] sm:$0xff]   ;;  %v1220_v40 = vunpack.c.l.bf16 %v1349_v35 }
  0xd2   : > { %v1216_v8 = vunpack.c.l.bf16 %v1348_v4  ;;  %v1217_v14 = vunpack.c.h.bf16 %v1348_v4 }
  0xd3   : > { %v639_v49 = vadd.f32 %v638_v2, %v550_v42  ;;  %v790_v0 = vadd.f32 %v1244_v53, %v677_v51  ;;  %v1357_v51 = vld [vmem:[%s1559_s20 + $0x60] sm:$0xff]  }
  0xd5   : > { %v775_v50 = vadd.f32 %v1213_v43, %v639_v49  ;;  %v822_v5 = vmax.f32 %v790_v0, 0.0 }
  0xd6   : > { %v589_v56 = vpop.f32.mrf.mxu2  ;;  %v648_v61 = vpop.f32.mrf.mxu1 }
  0xd7   : > { %v807_v55 = vmax.f32 %v775_v50, 0.0  ;;  %v590_v57 = vadd.f32 %v1554_v44, %v589_v56  ;;  %v1252_v56 = vunpack.c.l.bf16 %v1357_v51 }
  0xd8   : > { %v552_v59 = vpop.f32.mrf.mxu0 }
  0xd9   : > { %v1279_v60 = vpack.c.bf16 %v807_v55, %v806_v54  ;;  %v679_v1 = vadd.f32 %v678_v18, %v590_v57  ;;  %v553_v2 = vadd.f32 %v1554_v44, %v552_v59  ;;  %v1356_v18 = vld [vmem:[%s1559_s20 + $0x58] sm:$0xff]   ;;  %v691_v59 = vpop.f32.mrf.mxu3 }
  0xda   : > { %v1249_v27 = vunpack.c.h.bf16 %v1356_v18 }
  0xdb   : > { %1362 = vst [vmem:[%s1571_s23 + $0x10] sm:$0xff] %v1279_v60   ;;  %v791_v3 = vadd.f32 %v1245_v58, %v679_v1  ;;  %v642_v7 = vadd.f32 %v641_v12, %v553_v2  ;;  %v1248_v12 = vunpack.c.l.bf16 %v1356_v18 }
  0xdd   : > { %v823_v6 = vmax.f32 %v791_v3, 0.0  ;;  %v776_v17 = vadd.f32 %v1216_v8, %v642_v7 }
  0xde   : > { %v592_v9 = vpop.f32.mrf.mxu2  ;;  %v651_v15 = vpop.f32.mrf.mxu1 }
  0xdf   : > { %v1319_v10 = vpack.c.bf16 %v823_v6, %v822_v5  ;;  %v593_v16 = vadd.f32 %v1554_v44, %v592_v9  ;;  %v808_v23 = vmax.f32 %v776_v17, 0.0  ;;  %v1350_v6 = vld [vmem:[%s1559_s20 + $0x28] sm:$0xff]  }
  0xe0   : > { %v554_v11 = vpop.f32.mrf.mxu0  ;;  %v1225_v17 = vunpack.c.h.bf16 %v1350_v6 }
  0xe1   : > { %v555_v13 = vadd.f32 %v1554_v44, %v554_v11  ;;  %1370 = vst [vmem:[%s1571_s23 + $0x50] sm:$0xff] %v1319_v10   ;;  %v682_v22 = vadd.f32 %v681_v39, %v593_v16  ;;  %v1224_v10 = vunpack.c.l.bf16 %v1350_v6 }
  0xe3   : > { %v644_v19 = vadd.f32 %v643_v28, %v555_v13  ;;  %v792_v32 = vadd.f32 %v1248_v12, %v682_v22  ;;  %v1358_v22 = vld [vmem:[%s1559_s20 + $0x68] sm:$0xff]  }
  0xe5   : > { %v777_v21 = vadd.f32 %v1217_v14, %v644_v19  ;;  %v824_v37 = vmax.f32 %v792_v32, 0.0  ;;  %v693_v19 = vpop.f32.mrf.mxu3 }
  0xe6   : > { %v594_v25 = vpop.f32.mrf.mxu2  ;;  %v653_v31 = vpop.f32.mrf.mxu1 }
  0xe7   : > { %v809_v24 = vmax.f32 %v777_v21, 0.0  ;;  %v595_v26 = vadd.f32 %v1554_v44, %v594_v25 }
  0xe8   : > { %v557_v29 = vpop.f32.mrf.mxu0 }
  0xe9   : > { %v1284_v30 = vpack.c.bf16 %v809_v24, %v808_v23  ;;  %v684_v33 = vadd.f32 %v683_v62, %v595_v26  ;;  %v558_v28 = vadd.f32 %v1554_v44, %v557_v29  ;;  %v1253_v62 = vunpack.c.h.bf16 %v1357_v51 }
  0xeb   : > { %1363 = vst [vmem:[%s1571_s23 + $0x18] sm:$0xff] %v1284_v30   ;;  %v793_v34 = vadd.f32 %v1249_v27, %v684_v33  ;;  %v647_v39 = vadd.f32 %v646_v45, %v558_v28  ;;  %v1257_v30 = vunpack.c.h.bf16 %v1358_v22 }
  0xed   : > { %v825_v38 = vmax.f32 %v793_v34, 0.0  ;;  %v778_v50 = vadd.f32 %v1220_v40, %v647_v39 }
  0xee   : > { %v597_v41 = vpop.f32.mrf.mxu2  ;;  %v656_v48 = vpop.f32.mrf.mxu1 }
  0xef   : > { %v1324_v42 = vpack.c.bf16 %v825_v38, %v824_v37  ;;  %v598_v49 = vadd.f32 %v1554_v44, %v597_v41  ;;  %v810_v45 = vmax.f32 %v778_v50, 0.0  ;;  %v1351_v38 = vld [vmem:[%s1559_s20 + $0x30] sm:$0xff]  }
  0xf0   : > { %v559_v43 = vpop.f32.mrf.mxu0  ;;  %v1229_v50 = vunpack.c.h.bf16 %v1351_v38 }
  0xf1   : > { %v560_v46 = vadd.f32 %v1554_v44, %v559_v43  ;;  %1371 = vst [vmem:[%s1571_s23 + $0x58] sm:$0xff] %v1324_v42   ;;  %v687_v55 = vadd.f32 %v686_v20, %v598_v49  ;;  %v1228_v42 = vunpack.c.l.bf16 %v1351_v38 }
  0xf3   : > { %v649_v53 = vadd.f32 %v648_v61, %v560_v46  ;;  %v794_v3 = vadd.f32 %v1252_v56, %v687_v55  ;;  %v1359_v55 = vld [vmem:[%s1559_s20 + $0x70] sm:$0xff]  }
  0xf5   : > { %v779_v54 = vadd.f32 %v1221_v47, %v649_v53  ;;  %v826_v7 = vmax.f32 %v794_v3, 0.0 }
  0xf6   : > { %v599_v58 = vpop.f32.mrf.mxu2  ;;  %v658_v2 = vpop.f32.mrf.mxu1 }
  0xf7   : > { %v811_v57 = vmax.f32 %v779_v54, 0.0  ;;  %v600_v60 = vadd.f32 %v1554_v44, %v599_v58 }
  0xf8   : > { %v562_v0 = vpop.f32.mrf.mxu0 }
  0xf9   : > { %v1289_v1 = vpack.c.bf16 %v811_v57, %v810_v45  ;;  %v689_v4 = vadd.f32 %v688_v36, %v600_v60  ;;  %v563_v61 = vadd.f32 %v1554_v44, %v562_v0  ;;  %v696_v36 = vpop.f32.mrf.mxu3  ;;  %v1353_v45 = vld [vmem:[%s1559_s20 + $0x40] sm:$0xff]   ;;  %v578_v57 = vadd.f32 %v1554_v44, %v1563_v52 }
  0xfa   : > { %v1260_v60 = vunpack.c.l.bf16 %v1359_v55  ;;  %v1236_v0 = vunpack.c.l.bf16 %v1353_v45 }
  0xfb   : > { %1364 = vst [vmem:[%s1571_s23 + $0x20] sm:$0xff] %v1289_v1   ;;  %v795_v5 = vadd.f32 %v1253_v62, %v689_v4  ;;  %v652_v9 = vadd.f32 %v651_v15, %v563_v61  ;;  %v1256_v15 = vunpack.c.l.bf16 %v1358_v22  ;;  %v580_v61 = vadd.f32 %v1554_v44, %v1566_v63 }
  0xfd   : > { %v827_v8 = vmax.f32 %v795_v5, 0.0  ;;  %v780_v21 = vadd.f32 %v1224_v10, %v652_v9  ;;  %v1261_v5 = vunpack.c.h.bf16 %v1359_v55 }
  0xfe   : > { %v602_v11 = vpop.f32.mrf.mxu2  ;;  %v1608_v18 = vpop.f32.mrf.mxu1 }
  0xff   : > { %v1329_v13 = vpack.c.bf16 %v827_v8, %v826_v7  ;;  %v603_v20 = vadd.f32 %v1554_v44, %v602_v11  ;;  %v812_v25 = vmax.f32 %v780_v21, 0.0  ;;  %v1237_v7 = vunpack.c.h.bf16 %v1353_v45 }
 0x100   : > { %v564_v14 = vpop.f32.mrf.mxu0 }
 0x101   : > { %v565_v16 = vadd.f32 %v1554_v44, %v564_v14  ;;  %1372 = vst [vmem:[%s1571_s23 + $0x60] sm:$0xff] %v1329_v13   ;;  %v692_v24 = vadd.f32 %v691_v59, %v603_v20 }
 0x103   : > { %v654_v12 = vadd.f32 %v653_v31, %v565_v16  ;;  %v796_v34 = vadd.f32 %v1256_v15, %v692_v24 }
 0x105   : > { %v781_v23 = vadd.f32 %v1225_v17, %v654_v12  ;;  %v828_v39 = vmax.f32 %v796_v34, 0.0  ;;  %v1352_v17 = vld [vmem:[%s1559_s20 + $0x38] sm:$0xff]  }
 0x106   : > { %v604_v27 = vpop.f32.mrf.mxu2  ;;  %v1614_v28 = vpop.f32.mrf.mxu1  ;;  %v1360_v34 = vld [vmem:[%s1559_s20 + $0x78] sm:$0xff]  }
 0x107   : > { %v813_v26 = vmax.f32 %v781_v23, 0.0  ;;  %v605_v29 = vadd.f32 %v1554_v44, %v604_v27  ;;  %v1232_v23 = vunpack.c.l.bf16 %v1352_v17 }
 0x108   : > { %v567_v32 = vpop.f32.mrf.mxu0 }
 0x109   : > { %v1294_v33 = vpack.c.bf16 %v813_v26, %v812_v25  ;;  %v694_v35 = vadd.f32 %v693_v19, %v605_v29  ;;  %v568_v31 = vadd.f32 %v1554_v44, %v567_v32 }
 0x10b   : > { %1365 = vst [vmem:[%s1571_s23 + $0x28] sm:$0xff] %v1294_v33   ;;  %v797_v37 = vadd.f32 %v1257_v30, %v694_v35  ;;  %v657_v41 = vadd.f32 %v656_v48, %v568_v31  ;;  %v698_v48 = vpop.f32.mrf.mxu3  ;;  %v1233_v30 = vunpack.c.h.bf16 %v1352_v17 }
 0x10d   : > { %v829_v40 = vmax.f32 %v797_v37, 0.0  ;;  %v782_v54 = vadd.f32 %v1228_v42, %v657_v41  ;;  %v1265_v41 = vunpack.c.h.bf16 %v1360_v34 }
 0x10e   : > { %v607_v43 = vpop.f32.mrf.mxu2  ;;  %v666_v51 = vpop.f32.mrf.mxu1 }
 0x10f   : > { %v1334_v46 = vpack.c.bf16 %v829_v40, %v828_v39  ;;  %v608_v53 = vadd.f32 %v1554_v44, %v607_v43  ;;  %v667_v62 = vadd.f32 %v666_v51, %v578_v57  ;;  %v814_v1 = vmax.f32 %v782_v54, 0.0 }
 0x110   : > { %v569_v47 = vpop.f32.mrf.mxu0 }
 0x111   : > { %v570_v49 = vadd.f32 %v1554_v44, %v569_v47  ;;  %1373 = vst [vmem:[%s1571_s23 + $0x68] sm:$0xff] %v1334_v46   ;;  %v697_v59 = vadd.f32 %v696_v36, %v608_v53  ;;  %v786_v10 = vadd.f32 %v1236_v0, %v667_v62  ;;  %v1264_v36 = vunpack.c.l.bf16 %v1360_v34 }
 0x113   : > { %v659_v56 = vadd.f32 %v658_v2, %v570_v49  ;;  %v798_v9 = vadd.f32 %v1260_v60, %v697_v59  ;;  %v818_v63 = vmax.f32 %v786_v10, 0.0  ;;  %v701_v24 = vpop.f32.mrf.mxu3 }
 0x115   : > { %v783_v58 = vadd.f32 %v1229_v50, %v659_v56  ;;  %v830_v20 = vmax.f32 %v798_v9, 0.0 }
 0x116   : > { %v609_v4 = vpop.f32.mrf.mxu2  ;;  %v668_v8 = vpop.f32.mrf.mxu1 }
 0x117   : > { %v815_v3 = vmax.f32 %v783_v58, 0.0  ;;  %v610_v2 = vadd.f32 %v1554_v44, %v609_v4  ;;  %v669_v13 = vadd.f32 %v668_v8, %v580_v61 }
 0x118   : > { %v572_v6 = vpop.f32.mrf.mxu0 }
 0x119   : > { %v1299_v52 = vpack.c.bf16 %v815_v3, %v814_v1  ;;  %v699_v11 = vadd.f32 %v698_v48, %v610_v2  ;;  %v573_v14 = vadd.f32 %v1554_v44, %v572_v6  ;;  %v787_v19 = vadd.f32 %v1237_v7, %v669_v13 }
 0x11b   : > { %1366 = vst [vmem:[%s1571_s23 + $0x30] sm:$0xff] %v1299_v52   ;;  %v799_v16 = vadd.f32 %v1261_v5, %v699_v11  ;;  %v819_v22 = vmax.f32 %v787_v19, 0.0  ;;  %v662_v12 = vadd.f32 %v1608_v18, %v573_v14  ;;  %v703_v43 = vpop.f32.mrf.mxu3 }
 0x11d   : > { %v831_v21 = vmax.f32 %v799_v16, 0.0  ;;  %v1309_v26 = vpack.c.bf16 %v819_v22, %v818_v63  ;;  %v784_v33 = vadd.f32 %v1232_v23, %v662_v12 }
 0x11e   : > { %v612_v15 = vpop.f32.mrf.mxu2 }
 0x11f   : > { %v1339_v25 = vpack.c.bf16 %v831_v21, %v830_v20  ;;  %v613_v32 = vadd.f32 %v1554_v44, %v612_v15  ;;  %1368 = vst [vmem:[%s1571_s23 + $0x40] sm:$0xff] %v1309_v26   ;;  %v816_v37 = vmax.f32 %v784_v33, 0.0 }
 0x120   : > { %v574_v27 = vpop.f32.mrf.mxu0 }
 0x121   : > { %v575_v29 = vadd.f32 %v1554_v44, %v574_v27  ;;  %1374 = vst [vmem:[%s1571_s23 + $0x70] sm:$0xff] %v1339_v25   ;;  %v702_v18 = vadd.f32 %v701_v24, %v613_v32 }
 0x123   : > { %v664_v35 = vadd.f32 %v1614_v28, %v575_v29  ;;  %v800_v46 = vadd.f32 %v1264_v36, %v702_v18 }
 0x125   : > { %v785_v31 = vadd.f32 %v1233_v30, %v664_v35  ;;  %v832_v50 = vmax.f32 %v800_v46, 0.0 }
 0x126   : > { %v614_v39 = vpop.f32.mrf.mxu2 }
 0x127   : > { %v817_v38 = vmax.f32 %v785_v31, 0.0  ;;  %v615_v40 = vadd.f32 %v1554_v44, %v614_v39 }
 0x129   : > { %v1304_v42 = vpack.c.bf16 %v817_v38, %v816_v37  ;;  %v704_v47 = vadd.f32 %v703_v43, %v615_v40 }
 0x12b   : > { %1367 = vst [vmem:[%s1571_s23 + $0x38] sm:$0xff] %v1304_v42   ;;  %v801_v49 = vadd.f32 %v1265_v41, %v704_v47 }
 0x12d   : > { %v833_v51 = vmax.f32 %v801_v49, 0.0 }
 0x12f   : > { %v1344_v53 = vpack.c.bf16 %v833_v51, %v832_v50 }
 0x131   : > { %1375 = vst [vmem:[%s1571_s23 + $0x78] sm:$0xff] %v1344_v53  }
 0x132 PF: > { %s14_s15 = sadd.s32 1, %s1400_s15  }
 0x133   : > { %p11_p4 = scmp.ge.s32.totalorder %s14_s15, 4  }
 0x135   :  { %13 = sbr.rel (!%p11_p4) target bundleno = 1 (0x1), region = 69 }

// kernel: cifar_attention_resnet_forward.11
= control target key start
LH: loop header
LB: loop body
LE: loop exit
PB: predicated region body
PF: predicated region fallthrough
CT: control target
= control target key end

     0   :  { %vm179_vm0 = vcmask 130048   ;;  %s740_s1 = inlined_call_operand.vmem [shape: bf16[144,128], index: 1, kind: input, shape index: {}]   ;;  %s741_s0 = inlined_call_operand.vmem [shape: bf16[128,144], index: 0, kind: input, shape index: {}]   ;;  %s742_s2 = inlined_call_operand.vmem [shape: f32[1,128], index: 2, kind: input, shape index: {}]   ;;  %s743_s3 = inlined_call_operand.vmem [shape: bf16[128,128], index: 3, kind: output, shape index: {}]  }
   0x1   :  { %v485_v0 = vld [vmem:[%s740_s1 + $0x38] sm:$0xff]  ;;  %v486_v1 = vld [vmem:[%s740_s1 + $0x40] sm:$0xff]  ;;  %v358_v3 = vld [vmem:[%s741_s0 + $0x8] sm:$0xf0] }
   0x2   :  { %v462_v2 = vld [vmem:[%s741_s0 + $0x4] sm:$0xf]  ;;  %204 = vmatpush.bf16.msra.mxu0 %v485_v0  ;;  %534 = vmatpush.bf16.msra.mxu2 %v485_v0  ;;  %v484_v5 = vld [vmem:[%s740_s1 + $0x30] sm:$0xff]  ;;  %v483_v6 = vld [vmem:[%s740_s1 + $0x28] sm:$0xff] }
   0x3   :  { %v361_v4 = vor.u32 %v462_v2, %v358_v3  ;;  %260 = vmatpush.bf16.msra.mxu1 %v486_v1  ;;  %542 = vmatpush.bf16.msra.mxu3 %v486_v1  ;;  %v472_v7 = vld [vmem:[%s741_s0 + $0x54] sm:$0xf]  ;;  %v398_v8 = vld [vmem:[%s741_s0 + $0x58] sm:$0xf0]  ;;  %v482_v10 = vld [vmem:[%s740_s1 + $0x20] sm:$0xff] }
   0x4   :  { %v401_v9 = vor.u32 %v472_v7, %v398_v8  ;;  %v481_v11 = vld [vmem:[%s740_s1 + $0x18] sm:$0xff]  ;;  %v464_v12 = vld [vmem:[%s741_s0 + $0x14] sm:$0xf]  ;;  %v479_v16 = vld [vmem:[%s740_s1 + $0x8] sm:$0xff] }
   0x5   :  { %v366_v13 = vld [vmem:[%s741_s0 + $0x18] sm:$0xf0]  ;;  %v480_v15 = vld [vmem:[%s740_s1 + $0x10] sm:$0xff]  ;;  %v474_v17 = vld [vmem:[%s741_s0 + $0x64] sm:$0xf] }
   0x6   :  { %454 = vmatmul.msk.bf16.vlgmr.msra.gmra.mxu1 %vm179_vm0, %v361_v4  ;;  %205 = vmatpush.bf16.msra.mxu0 %v484_v5  ;;  %v369_v14 = vor.u32 %v464_v12, %v366_v13  ;;  %v406_v18 = vld [vmem:[%s741_s0 + $0x68] sm:$0xf0]  ;;  %v478_v20 = vld [vmem:[%s740_s1] sm:$0xff]  ;;  %v463_v22 = vld [vmem:[%s741_s0 + $0x4] sm:$0xf0] }
   0x7   :  { %535 = vmatpush.bf16.msra.mxu2 %v484_v5  ;;  %459 = vmatmul.msk.bf16.vlgmr.msra.gmra.mxu3 %vm179_vm0, %v401_v9  ;;  %v409_v19 = vor.u32 %v474_v17, %v406_v18  ;;  %v356_v21 = vld [vmem:[%s741_s0] sm:$0xf]  ;;  %v471_v24 = vld [vmem:[%s741_s0 + $0x44] sm:$0xf0]  ;;  %v466_v27 = vld [vmem:[%s741_s0 + $0x24] sm:$0xf] }
   0x8   :  { %v388_v23 = vld [vmem:[%s741_s0 + $0x40] sm:$0xf]  ;;  %v357_v25 = vor.u32 %v463_v22, %v356_v21  ;;  %v374_v28 = vld [vmem:[%s741_s0 + $0x28] sm:$0xf0]  ;;  %v476_v30 = vld [vmem:[%s741_s0 + $0x74] sm:$0xf] }
   0x9   :  { %v389_v26 = vor.u32 %v471_v24, %v388_v23  ;;  %v377_v29 = vor.u32 %v466_v27, %v374_v28  ;;  %v414_v31 = vld [vmem:[%s741_s0 + $0x78] sm:$0xf0]  ;;  %v364_v33 = vld [vmem:[%s741_s0 + $0x10] sm:$0xf]  ;;  %v465_v34 = vld [vmem:[%s741_s0 + $0x14] sm:$0xf0] }
   0xa   :  { %206 = vmatpush.bf16.msra.mxu0 %v483_v6  ;;  %v417_v32 = vor.u32 %v476_v30, %v414_v31  ;;  %v396_v35 = vld [vmem:[%s741_s0 + $0x50] sm:$0xf]  ;;  %v473_v36 = vld [vmem:[%s741_s0 + $0x54] sm:$0xf0]  ;;  %v365_v37 = vor.u32 %v465_v34, %v364_v33  ;;  %v468_v39 = vld [vmem:[%s741_s0 + $0x34] sm:$0xf] }
   0xb   :  { %536 = vmatpush.bf16.msra.mxu2 %v483_v6  ;;  %v397_v38 = vor.u32 %v473_v36, %v396_v35  ;;  %v382_v40 = vld [vmem:[%s741_s0 + $0x38] sm:$0xf0]  ;;  %v372_v42 = vld [vmem:[%s741_s0 + $0x20] sm:$0xf]  ;;  %v467_v43 = vld [vmem:[%s741_s0 + $0x24] sm:$0xf0] }
   0xc   :  { %v385_v41 = vor.u32 %v468_v39, %v382_v40  ;;  %v404_v44 = vld [vmem:[%s741_s0 + $0x60] sm:$0xf]  ;;  %v475_v45 = vld [vmem:[%s741_s0 + $0x64] sm:$0xf0]  ;;  %v373_v46 = vor.u32 %v467_v43, %v372_v42  ;;  %v470_v48 = vld [vmem:[%s741_s0 + $0x44] sm:$0xf] }
   0xd   :  { %v405_v47 = vor.u32 %v475_v45, %v404_v44  ;;  %v390_v49 = vld [vmem:[%s741_s0 + $0x48] sm:$0xf0]  ;;  %v380_v51 = vld [vmem:[%s741_s0 + $0x30] sm:$0xf]  ;;  %v469_v52 = vld [vmem:[%s741_s0 + $0x34] sm:$0xf0] }
   0xe   :  { %207 = vmatpush.bf16.msra.mxu0 %v482_v10  ;;  %v393_v50 = vor.u32 %v470_v48, %v390_v49  ;;  %v412_v53 = vld [vmem:[%s741_s0 + $0x70] sm:$0xf]  ;;  %v477_v54 = vld [vmem:[%s741_s0 + $0x74] sm:$0xf0]  ;;  %v381_v55 = vor.u32 %v469_v52, %v380_v51  ;;  %v698_v62 = vld [vmem:[%s742_s2] ss:$0 sm:$0xff] }
   0xf   :  { %537 = vmatpush.bf16.msra.mxu2 %v482_v10  ;;  %v413_v56 = vor.u32 %v477_v54, %v412_v53 }
  0x12   :  { %208 = vmatpush.bf16.msra.mxu0 %v481_v11 }
  0x13   :  { %538 = vmatpush.bf16.msra.mxu2 %v481_v11 }
  0x16   :  { %455 = vmatmul.msk.bf16.gmra.mxu1 %vm179_vm0, %v369_v14  ;;  %209 = vmatpush.bf16.msra.mxu0 %v480_v15 }
  0x17   :  { %539 = vmatpush.bf16.msra.mxu2 %v480_v15  ;;  %460 = vmatmul.msk.bf16.gmra.mxu3 %vm179_vm0, %v409_v19 }
  0x1a   :  { %210 = vmatpush.bf16.msra.mxu0 %v479_v16 }
  0x1b   :  { %540 = vmatpush.bf16.msra.mxu2 %v479_v16 }
  0x1e   :  { %211 = vmatpush.bf16.msra.mxu0 %v478_v20 }
  0x1f   :  { %541 = vmatpush.bf16.msra.mxu2 %v478_v20 }
  0x21   :  { %212 = vmatmul.bf16.vlgmr.msra.gmra.mxu0 %v357_v25 }
  0x22   :  { %232 = vmatmul.bf16.vlgmr.msra.gmra.mxu2 %v389_v26 }
  0x26   :  { %456 = vmatmul.msk.bf16.gmra.mxu1 %vm179_vm0, %v377_v29 }
  0x27   :  { %461 = vmatmul.msk.bf16.gmra.mxu3 %vm179_vm0, %v417_v32 }
  0x31   :  { %217 = vmatmul.bf16.gmra.mxu0 %v365_v37 }
  0x32   :  { %237 = vmatmul.bf16.gmra.mxu2 %v397_v38 }
  0x36   :  { %457 = vmatmul.msk.bf16.gmra.mxu1 %vm179_vm0, %v385_v41 }
  0x41   :  { %222 = vmatmul.bf16.gmra.mxu0 %v373_v46 }
  0x42   :  { %242 = vmatmul.bf16.gmra.mxu2 %v405_v47 }
  0x46   :  { %458 = vmatmul.msk.bf16.gmra.mxu1 %vm179_vm0, %v393_v50 }
  0x51   :  { %227 = vmatmul.bf16.gmra.mxu0 %v381_v55 }
  0x52   :  { %247 = vmatmul.bf16.gmra.mxu2 %v413_v56 }
  0x83   :  { %v262_v57 = vpop.f32.mrf.mxu1 }
  0x8a   :  { %v287_v11 = vpop.f32.mrf.mxu3 }
  0x8b   :  { %v264_v58 = vpop.f32.mrf.mxu1 }
  0x92   :  { %v289_v19 = vpop.f32.mrf.mxu3 }
  0x93   :  { %v267_v59 = vpop.f32.mrf.mxu1 }
  0x9a   :  { %v292_v31 = vpop.f32.mrf.mxu3 }
  0x9b   :  { %v269_v60 = vpop.f32.mrf.mxu1 }
  0x9e   :  { %v213_v61 = vpop.f32.mrf.mxu0 }
  0x9f   :  { %v214_v63 = vadd.f32 %v698_v62, %v213_v61 }
  0xa1   :  { %v263_v3 = vadd.f32 %v262_v57, %v214_v63 }
  0xa2   :  { %v294_v48 = vpop.f32.mrf.mxu3 }
  0xa3   :  { %v272_v0 = vpop.f32.mrf.mxu1  ;;  %v302_v6 = vmax.f32 %v263_v3, 0.0 }
  0xa5   :  { %v233_v1 = vpop.f32.mrf.mxu2 }
  0xa6   :  { %v215_v2 = vpop.f32.mrf.mxu0  ;;  %v234_v41 = vadd.f32 %v698_v62, %v233_v1 }
  0xa7   :  { %v216_v4 = vadd.f32 %v698_v62, %v215_v2 }
  0xa9   :  { %v265_v5 = vadd.f32 %v264_v58, %v216_v4 }
  0xaa   :  { %v297_v1 = vpop.f32.mrf.mxu3 }
  0xab   :  { %v303_v7 = vmax.f32 %v265_v5, 0.0  ;;  %v274_v8 = vpop.f32.mrf.mxu1 }
  0xad   :  { %v490_v9 = vpack.c.bf16 %v303_v7, %v302_v6  ;;  %v235_v10 = vpop.f32.mrf.mxu2 }
  0xae   :  { %v218_v12 = vpop.f32.mrf.mxu0  ;;  %v236_v43 = vadd.f32 %v698_v62, %v235_v10 }
  0xaf   :  { %491 = vst [vmem:[%s743_s3] sm:$0xff] %v490_v9   ;;  %v219_v13 = vadd.f32 %v698_v62, %v218_v12 }
  0xb1   :  { %v268_v17 = vadd.f32 %v267_v59, %v219_v13 }
  0xb3   :  { %v277_v14 = vpop.f32.mrf.mxu1  ;;  %v304_v22 = vmax.f32 %v268_v17, 0.0 }
  0xb5   :  { %v238_v15 = vpop.f32.mrf.mxu2 }
  0xb6   :  { %v220_v16 = vpop.f32.mrf.mxu0  ;;  %v239_v21 = vadd.f32 %v698_v62, %v238_v15  ;;  %v299_v15 = vpop.f32.mrf.mxu3 }
  0xb7   :  { %v221_v18 = vadd.f32 %v698_v62, %v220_v16 }
  0xb8   :  { %v288_v27 = vadd.f32 %v287_v11, %v239_v21 }
  0xb9   :  { %v270_v20 = vadd.f32 %v269_v60, %v221_v18 }
  0xba   :  { %v312_v32 = vmax.f32 %v288_v27, 0.0 }
  0xbb   :  { %v305_v23 = vmax.f32 %v270_v20, 0.0  ;;  %v279_v24 = vpop.f32.mrf.mxu1 }
  0xbd   :  { %v495_v25 = vpack.c.bf16 %v305_v23, %v304_v22  ;;  %v240_v26 = vpop.f32.mrf.mxu2 }
  0xbe   :  { %v241_v28 = vadd.f32 %v698_v62, %v240_v26  ;;  %v223_v29 = vpop.f32.mrf.mxu0 }
  0xbf   :  { %527 = vst [vmem:[%s743_s3 + $0x8] sm:$0xff] %v495_v25   ;;  %v224_v34 = vadd.f32 %v698_v62, %v223_v29 }
  0xc0   :  { %v290_v30 = vadd.f32 %v289_v19, %v241_v28 }
  0xc1   :  { %v273_v39 = vadd.f32 %v272_v0, %v224_v34 }
  0xc2   :  { %v313_v33 = vmax.f32 %v290_v30, 0.0 }
  0xc3   :  { %v282_v35 = vpop.f32.mrf.mxu1  ;;  %v306_v46 = vmax.f32 %v273_v39, 0.0 }
  0xc4   :  { %v515_v36 = vpack.c.bf16 %v313_v33, %v312_v32  ;;  %v283_v44 = vadd.f32 %v282_v35, %v234_v41 }
  0xc5   :  { %v243_v37 = vpop.f32.mrf.mxu2 }
  0xc6   :  { %531 = vst [vmem:[%s743_s3 + $0x28] sm:$0xff] %v515_v36   ;;  %v225_v38 = vpop.f32.mrf.mxu0  ;;  %v244_v45 = vadd.f32 %v698_v62, %v243_v37  ;;  %v310_v53 = vmax.f32 %v283_v44, 0.0 }
  0xc7   :  { %v226_v40 = vadd.f32 %v698_v62, %v225_v38 }
  0xc8   :  { %v293_v54 = vadd.f32 %v292_v31, %v244_v45 }
  0xc9   :  { %v275_v42 = vadd.f32 %v274_v8, %v226_v40 }
  0xca   :  { %v314_v60 = vmax.f32 %v293_v54, 0.0 }
  0xcb   :  { %v307_v47 = vmax.f32 %v275_v42, 0.0  ;;  %v284_v49 = vpop.f32.mrf.mxu1 }
  0xcc   :  { %v285_v50 = vadd.f32 %v284_v49, %v236_v43 }
  0xcd   :  { %v500_v51 = vpack.c.bf16 %v307_v47, %v306_v46  ;;  %v245_v52 = vpop.f32.mrf.mxu2 }
  0xce   :  { %v311_v55 = vmax.f32 %v285_v50, 0.0  ;;  %v246_v56 = vadd.f32 %v698_v62, %v245_v52  ;;  %v228_v57 = vpop.f32.mrf.mxu0 }
  0xcf   :  { %528 = vst [vmem:[%s743_s3 + $0x10] sm:$0xff] %v500_v51   ;;  %v229_v63 = vadd.f32 %v698_v62, %v228_v57 }
  0xd0   :  { %v510_v58 = vpack.c.bf16 %v311_v55, %v310_v53  ;;  %v295_v59 = vadd.f32 %v294_v48, %v246_v56 }
  0xd1   :  { %v278_v4 = vadd.f32 %v277_v14, %v229_v63 }
  0xd2   :  { %530 = vst [vmem:[%s743_s3 + $0x20] sm:$0xff] %v510_v58   ;;  %v315_v61 = vmax.f32 %v295_v59, 0.0 }
  0xd3   :  { %v308_v8 = vmax.f32 %v278_v4, 0.0 }
  0xd4   :  { %v520_v0 = vpack.c.bf16 %v315_v61, %v314_v60 }
  0xd5   :  { %v248_v2 = vpop.f32.mrf.mxu2 }
  0xd6   :  { %532 = vst [vmem:[%s743_s3 + $0x30] sm:$0xff] %v520_v0   ;;  %v230_v3 = vpop.f32.mrf.mxu0  ;;  %v249_v7 = vadd.f32 %v698_v62, %v248_v2 }
  0xd7   :  { %v231_v5 = vadd.f32 %v698_v62, %v230_v3 }
  0xd8   :  { %v298_v12 = vadd.f32 %v297_v1, %v249_v7 }
  0xd9   :  { %v280_v6 = vadd.f32 %v279_v24, %v231_v5 }
  0xda   :  { %v316_v17 = vmax.f32 %v298_v12, 0.0 }
  0xdb   :  { %v309_v9 = vmax.f32 %v280_v6, 0.0 }
  0xdd   :  { %v505_v10 = vpack.c.bf16 %v309_v9, %v308_v8  ;;  %v250_v11 = vpop.f32.mrf.mxu2 }
  0xde   :  { %v251_v13 = vadd.f32 %v698_v62, %v250_v11 }
  0xdf   :  { %529 = vst [vmem:[%s743_s3 + $0x18] sm:$0xff] %v505_v10  }
  0xe0   :  { %v300_v16 = vadd.f32 %v299_v15, %v251_v13 }
  0xe2   :  { %v317_v14 = vmax.f32 %v300_v16, 0.0 }
  0xe4   :  { %v525_v18 = vpack.c.bf16 %v317_v14, %v316_v17 }
  0xe6   :  { %533 = vst [vmem:[%s743_s3 + $0x38] sm:$0xff] %v525_v18  }

// kernel: cifar_attention_resnet_forward.12
= control target key start
LH: loop header
LB: loop body
LE: loop exit
PB: predicated region body
PF: predicated region fallthrough
CT: control target
= control target key end

     0   :  { %vm324_vm0 = vcmask 261120   ;;  %vm560_vm1 = vcmask 130048   ;;  %s1384_s1 = inlined_call_operand.vmem [shape: bf16[288,128], index: 1, kind: input, shape index: {}]   ;;  %s1385_s4 = inlined_call_operand.vmem [shape: bf16[16,128], index: 4, kind: input, shape index: {}]   ;;  %s1386_s0 = inlined_call_operand.vmem [shape: bf16[128,288], index: 0, kind: input, shape index: {}]   ;;  %s1387_s3 = inlined_call_operand.vmem [shape: bf16[128,16], index: 3, kind: input, shape index: {}]   ;;  %s1388_s2 = inlined_call_operand.vmem [shape: f32[1,128], index: 2, kind: input, shape index: {}]   ;;  %s1389_s5 = inlined_call_operand.vmem [shape: f32[1,128], index: 5, kind: input, shape index: {}]   ;;  %s1390_s6 = inlined_call_operand.vmem [shape: bf16[128,128], index: 6, kind: output, shape index: {}]  }
   0x1   :  { %v973_v0 = vld [vmem:[%s1384_s1 + $0x38] sm:$0xff]  ;;  %v972_v2 = vld [vmem:[%s1384_s1 + $0x30] sm:$0xff]  ;;  %v983_v4 = vld [vmem:[%s1384_s1 + $0x88] sm:$0xff] }
   0x2   :  { %v981_v1 = vld [vmem:[%s1384_s1 + $0x78] sm:$0xff]  ;;  %349 = vmatpush.bf16.msra.mxu0 %v973_v0  ;;  %v980_v3 = vld [vmem:[%s1384_s1 + $0x70] sm:$0xff]  ;;  %453 = vmatpush.bf16.msra.mxu2 %v983_v4  ;;  %v982_v5 = vld [vmem:[%s1384_s1 + $0x80] sm:$0xff] }
   0x3   :  { %398 = vmatpush.bf16.msra.mxu1 %v981_v1  ;;  %v992_v6 = vld [vmem:[%s1385_s4] sm:$0xff]  ;;  %v732_v7 = vld [vmem:[%s1386_s0 + $0x8] sm:$0xf]  ;;  %v944_v8 = vld [vmem:[%s1386_s0 + $0x10] sm:$0xf0] }
   0x4   :  { %v971_v9 = vld [vmem:[%s1384_s1 + $0x28] sm:$0xff]  ;;  %592 = vmatpush.bf16.msra.mxu3 %v992_v6  ;;  %v733_v11 = vor.u32 %v944_v8, %v732_v7  ;;  %v984_v12 = vld [vmem:[%s1387_s3] sm:$0xff]  ;;  %v969_v15 = vld [vmem:[%s1384_s1 + $0x18] sm:$0xff] }
   0x5   :  { %v979_v10 = vld [vmem:[%s1384_s1 + $0x68] sm:$0xff]  ;;  %v970_v13 = vld [vmem:[%s1384_s1 + $0x20] sm:$0xff]  ;;  %v977_v16 = vld [vmem:[%s1384_s1 + $0x58] sm:$0xff] }
   0x6   :  { %350 = vmatpush.bf16.msra.mxu0 %v972_v2  ;;  %454 = vmatpush.bf16.msra.mxu2 %v982_v5  ;;  %v978_v14 = vld [vmem:[%s1384_s1 + $0x60] sm:$0xff]  ;;  %v968_v17 = vld [vmem:[%s1384_s1 + $0x10] sm:$0xff]  ;;  %v947_v20 = vld [vmem:[%s1386_s0 + $0x28] sm:$0xf0] }
   0x7   :  { %399 = vmatpush.bf16.msra.mxu1 %v980_v3  ;;  %934 = vmatmul.msk.bf16.vlgmr.msra.gmra.mxu3 %vm560_vm1, %v984_v12  ;;  %v976_v18 = vld [vmem:[%s1384_s1 + $0x50] sm:$0xff]  ;;  %v744_v19 = vld [vmem:[%s1386_s0 + $0x20] sm:$0xf]  ;;  %v967_v21 = vld [vmem:[%s1384_s1 + $0x8] sm:$0xff] }
   0x8   :  { %v975_v22 = vld [vmem:[%s1384_s1 + $0x48] sm:$0xff]  ;;  %v745_v23 = vor.u32 %v947_v20, %v744_v19  ;;  %v966_v25 = vld [vmem:[%s1384_s1] sm:$0xff]  ;;  %v726_v30 = vld [vmem:[%s1386_s0 + $0xc] sm:$0xf0] }
   0x9   :  { %890 = vmatmul.msk.bf16.vlgmr.msra.gmra.mxu2 %vm324_vm0, %v733_v11  ;;  %v985_v24 = vld [vmem:[%s1387_s3 + $0x8] sm:$0xff]  ;;  %v974_v26 = vld [vmem:[%s1384_s1 + $0x40] sm:$0xff]  ;;  %v756_v33 = vld [vmem:[%s1386_s0 + $0x38] sm:$0xf] }
   0xa   :  { %351 = vmatpush.bf16.msra.mxu0 %v971_v9  ;;  %v724_v27 = vld [vmem:[%s1386_s0] sm:$0xf]  ;;  %v943_v28 = vld [vmem:[%s1386_s0 + $0x8] sm:$0xf0]  ;;  %v942_v29 = vld [vmem:[%s1386_s0 + $0x4] sm:$0xf] }
   0xb   :  { %400 = vmatpush.bf16.msra.mxu1 %v979_v10  ;;  %v725_v31 = vor.u32 %v943_v28, %v724_v27  ;;  %v729_v32 = vor.u32 %v942_v29, %v726_v30  ;;  %v950_v34 = vld [vmem:[%s1386_s0 + $0x40] sm:$0xf0]  ;;  %v986_v36 = vld [vmem:[%s1387_s3 + $0x10] sm:$0xff]  ;;  %v736_v37 = vld [vmem:[%s1386_s0 + $0x18] sm:$0xf] }
   0xc   :  { %v757_v35 = vor.u32 %v950_v34, %v756_v33  ;;  %v946_v38 = vld [vmem:[%s1386_s0 + $0x20] sm:$0xf0]  ;;  %v945_v39 = vld [vmem:[%s1386_s0 + $0x1c] sm:$0xf]  ;;  %v738_v40 = vld [vmem:[%s1386_s0 + $0x24] sm:$0xf0] }
   0xd   :  { %v737_v41 = vor.u32 %v946_v38, %v736_v37  ;;  %v741_v42 = vor.u32 %v945_v39, %v738_v40  ;;  %v768_v43 = vld [vmem:[%s1386_s0 + $0x50] sm:$0xf]  ;;  %v953_v44 = vld [vmem:[%s1386_s0 + $0x58] sm:$0xf0]  ;;  %v948_v49 = vld [vmem:[%s1386_s0 + $0x34] sm:$0xf] }
   0xe   :  { %352 = vmatpush.bf16.msra.mxu0 %v970_v13  ;;  %v769_v45 = vor.u32 %v953_v44, %v768_v43  ;;  %v987_v46 = vld [vmem:[%s1387_s3 + $0x18] sm:$0xff]  ;;  %v748_v47 = vld [vmem:[%s1386_s0 + $0x30] sm:$0xf]  ;;  %v750_v50 = vld [vmem:[%s1386_s0 + $0x3c] sm:$0xf0] }
   0xf   :  { %401 = vmatpush.bf16.msra.mxu1 %v978_v14  ;;  %v949_v48 = vld [vmem:[%s1386_s0 + $0x38] sm:$0xf0]  ;;  %v753_v52 = vor.u32 %v948_v49, %v750_v50  ;;  %v780_v53 = vld [vmem:[%s1386_s0 + $0x68] sm:$0xf]  ;;  %v956_v54 = vld [vmem:[%s1386_s0 + $0x70] sm:$0xf0] }
  0x10   :  { %v749_v51 = vor.u32 %v949_v48, %v748_v47  ;;  %v781_v55 = vor.u32 %v956_v54, %v780_v53  ;;  %v988_v56 = vld [vmem:[%s1387_s3 + $0x20] sm:$0xff]  ;;  %v760_v57 = vld [vmem:[%s1386_s0 + $0x48] sm:$0xf]  ;;  %v952_v58 = vld [vmem:[%s1386_s0 + $0x50] sm:$0xf0] }
  0x11   :  { %v951_v59 = vld [vmem:[%s1386_s0 + $0x4c] sm:$0xf]  ;;  %v762_v60 = vld [vmem:[%s1386_s0 + $0x54] sm:$0xf0]  ;;  %v761_v61 = vor.u32 %v952_v58, %v760_v57  ;;  %v792_v63 = vld [vmem:[%s1386_s0 + $0x80] sm:$0xf] }
  0x12   :  { %353 = vmatpush.bf16.msra.mxu0 %v969_v15  ;;  %v765_v62 = vor.u32 %v951_v59, %v762_v60  ;;  %v959_v0 = vld [vmem:[%s1386_s0 + $0x88] sm:$0xf0]  ;;  %v772_v3 = vld [vmem:[%s1386_s0 + $0x60] sm:$0xf]  ;;  %v954_v5 = vld [vmem:[%s1386_s0 + $0x64] sm:$0xf] }
  0x13   :  { %402 = vmatpush.bf16.msra.mxu1 %v977_v16  ;;  %v793_v1 = vor.u32 %v959_v0, %v792_v63  ;;  %v989_v2 = vld [vmem:[%s1387_s3 + $0x28] sm:$0xff]  ;;  %v774_v6 = vld [vmem:[%s1386_s0 + $0x6c] sm:$0xf0]  ;;  %v804_v9 = vld [vmem:[%s1386_s0 + $0x98] sm:$0xf] }
  0x14   :  { %v955_v4 = vld [vmem:[%s1386_s0 + $0x68] sm:$0xf0]  ;;  %v777_v8 = vor.u32 %v954_v5, %v774_v6  ;;  %v962_v10 = vld [vmem:[%s1386_s0 + $0xa0] sm:$0xf0]  ;;  %v990_v12 = vld [vmem:[%s1387_s3 + $0x30] sm:$0xff] }
  0x15   :  { %v773_v7 = vor.u32 %v955_v4, %v772_v3  ;;  %v805_v11 = vor.u32 %v962_v10, %v804_v9  ;;  %v784_v13 = vld [vmem:[%s1386_s0 + $0x78] sm:$0xf]  ;;  %v958_v14 = vld [vmem:[%s1386_s0 + $0x80] sm:$0xf0]  ;;  %v957_v15 = vld [vmem:[%s1386_s0 + $0x7c] sm:$0xf] }
  0x16   :  { %354 = vmatpush.bf16.msra.mxu0 %v968_v17  ;;  %v786_v16 = vld [vmem:[%s1386_s0 + $0x84] sm:$0xf0]  ;;  %v785_v17 = vor.u32 %v958_v14, %v784_v13  ;;  %v816_v19 = vld [vmem:[%s1386_s0 + $0xb0] sm:$0xf]  ;;  %v965_v20 = vld [vmem:[%s1386_s0 + $0xb8] sm:$0xf0] }
  0x17   :  { %403 = vmatpush.bf16.msra.mxu1 %v976_v18  ;;  %935 = vmatmul.msk.bf16.gmra.mxu3 %vm560_vm1, %v985_v24  ;;  %v789_v18 = vor.u32 %v957_v15, %v786_v16  ;;  %v961_v24 = vld [vmem:[%s1386_s0 + $0x98] sm:$0xf0]  ;;  %v808_v29 = vld [vmem:[%s1386_s0 + $0xa8] sm:$0xf]  ;;  %v964_v30 = vld [vmem:[%s1386_s0 + $0xb0] sm:$0xf0] }
  0x18   :  { %v809_v33 = vor.u32 %v964_v30, %v808_v29  ;;  %v1321_v39 = vld [vmem:[%s1388_s2] ss:$0 sm:$0xff] }
  0x19   :  { %891 = vmatmul.msk.bf16.gmra.mxu2 %vm324_vm0, %v745_v23  ;;  %v796_v23 = vld [vmem:[%s1386_s0 + $0x90] sm:$0xf]  ;;  %v1328_v53 = vld [vmem:[%s1389_s5] ss:$0 sm:$0xff] }
  0x1a   :  { %355 = vmatpush.bf16.msra.mxu0 %v967_v21  ;;  %v817_v21 = vor.u32 %v965_v20, %v816_v19  ;;  %v797_v27 = vor.u32 %v961_v24, %v796_v23 }
  0x1b   :  { %404 = vmatpush.bf16.msra.mxu1 %v975_v22  ;;  %v991_v22 = vld [vmem:[%s1387_s3 + $0x38] sm:$0xff] }
  0x1e   :  { %356 = vmatpush.bf16.msra.mxu0 %v966_v25  ;;  %v960_v25 = vld [vmem:[%s1386_s0 + $0x94] sm:$0xf] }
  0x1f   :  { %405 = vmatpush.bf16.msra.mxu1 %v974_v26  ;;  %v798_v26 = vld [vmem:[%s1386_s0 + $0x9c] sm:$0xf0] }
  0x20   :  { %v801_v28 = vor.u32 %v960_v25, %v798_v26 }
  0x21   :  { %357 = vmatmul.bf16.vlgmr.msra.gmra.mxu0 %v725_v31  ;;  %v963_v31 = vld [vmem:[%s1386_s0 + $0xac] sm:$0xf] }
  0x22   :  { %406 = vmatmul.bf16.vlgmr.msra.gmra.mxu1 %v729_v32  ;;  %v810_v32 = vld [vmem:[%s1386_s0 + $0xb4] sm:$0xf0] }
  0x23   :  { %v813_v34 = vor.u32 %v963_v31, %v810_v32 }
  0x27   :  { %936 = vmatmul.msk.bf16.gmra.mxu3 %vm560_vm1, %v986_v36 }
  0x29   :  { %892 = vmatmul.msk.bf16.gmra.mxu2 %vm324_vm0, %v757_v35 }
  0x31   :  { %362 = vmatmul.bf16.gmra.mxu0 %v737_v41 }
  0x32   :  { %411 = vmatmul.bf16.gmra.mxu1 %v741_v42 }
  0x37   :  { %937 = vmatmul.msk.bf16.gmra.mxu3 %vm560_vm1, %v987_v46 }
  0x39   :  { %893 = vmatmul.msk.bf16.gmra.mxu2 %vm324_vm0, %v769_v45 }
  0x41   :  { %367 = vmatmul.bf16.gmra.mxu0 %v749_v51 }
  0x42   :  { %416 = vmatmul.bf16.gmra.mxu1 %v753_v52 }
  0x47   :  { %938 = vmatmul.msk.bf16.gmra.mxu3 %vm560_vm1, %v988_v56 }
  0x49   :  { %894 = vmatmul.msk.bf16.gmra.mxu2 %vm324_vm0, %v781_v55 }
  0x51   :  { %372 = vmatmul.bf16.gmra.mxu0 %v761_v61 }
  0x52   :  { %421 = vmatmul.bf16.gmra.mxu1 %v765_v62 }
  0x57   :  { %939 = vmatmul.msk.bf16.gmra.mxu3 %vm560_vm1, %v989_v2 }
  0x59   :  { %895 = vmatmul.msk.bf16.gmra.mxu2 %vm324_vm0, %v793_v1 }
  0x61   :  { %377 = vmatmul.bf16.gmra.mxu0 %v773_v7 }
  0x62   :  { %426 = vmatmul.bf16.gmra.mxu1 %v777_v8 }
  0x67   :  { %940 = vmatmul.msk.bf16.gmra.mxu3 %vm560_vm1, %v990_v12 }
  0x69   :  { %896 = vmatmul.msk.bf16.gmra.mxu2 %vm324_vm0, %v805_v11 }
  0x71   :  { %382 = vmatmul.bf16.gmra.mxu0 %v785_v17 }
  0x72   :  { %431 = vmatmul.bf16.gmra.mxu1 %v789_v18 }
  0x77   :  { %941 = vmatmul.msk.bf16.gmra.mxu3 %vm560_vm1, %v991_v22 }
  0x79   :  { %897 = vmatmul.msk.bf16.gmra.mxu2 %vm324_vm0, %v817_v21 }
  0x81   :  { %387 = vmatmul.bf16.gmra.mxu0 %v797_v27 }
  0x82   :  { %436 = vmatmul.bf16.gmra.mxu1 %v801_v28 }
  0x8a   :  { %v594_v36 = vpop.f32.mrf.mxu3 }
  0x8c   :  { %v456_v35 = vpop.f32.mrf.mxu2 }
  0x91   :  { %392 = vmatmul.bf16.gmra.mxu0 %v809_v33 }
  0x92   :  { %441 = vmatmul.bf16.gmra.mxu1 %v813_v34  ;;  %v596_v38 = vpop.f32.mrf.mxu3 }
  0x94   :  { %v458_v37 = vpop.f32.mrf.mxu2 }
  0x9a   :  { %v599_v44 = vpop.f32.mrf.mxu3 }
  0x9c   :  { %v461_v43 = vpop.f32.mrf.mxu2 }
  0x9e   :  { %v358_v40 = vpop.f32.mrf.mxu0 }
  0x9f   :  { %v407_v41 = vpop.f32.mrf.mxu1  ;;  %v359_v42 = vadd.f32 %v1321_v39, %v358_v40 }
  0xa1   :  { %v408_v45 = vadd.f32 %v407_v41, %v359_v42 }
  0xa2   :  { %v601_v51 = vpop.f32.mrf.mxu3 }
  0xa3   :  { %v457_v46 = vadd.f32 %v456_v35, %v408_v45 }
  0xa4   :  { %v463_v50 = vpop.f32.mrf.mxu2 }
  0xa5   :  { %v634_v52 = vadd.f32 %v594_v36, %v457_v46 }
  0xa6   :  { %v360_v47 = vpop.f32.mrf.mxu0 }
  0xa7   :  { %v409_v48 = vpop.f32.mrf.mxu1  ;;  %v361_v49 = vadd.f32 %v1321_v39, %v360_v47  ;;  %v654_v56 = vadd.f32 %v1328_v53, %v634_v52 }
  0xa9   :  { %v410_v54 = vadd.f32 %v409_v48, %v361_v49  ;;  %v670_v0 = vmax.f32 %v654_v56, 0.0 }
  0xaa   :  { %v604_v63 = vpop.f32.mrf.mxu3 }
  0xab   :  { %v459_v55 = vadd.f32 %v458_v37, %v410_v54 }
  0xac   :  { %v466_v62 = vpop.f32.mrf.mxu2 }
  0xad   :  { %v635_v57 = vadd.f32 %v596_v38, %v459_v55 }
  0xae   :  { %v363_v58 = vpop.f32.mrf.mxu0 }
  0xaf   :  { %v412_v59 = vpop.f32.mrf.mxu1  ;;  %v655_v60 = vadd.f32 %v1328_v53, %v635_v57  ;;  %v364_v61 = vadd.f32 %v1321_v39, %v363_v58 }
  0xb1   :  { %v671_v1 = vmax.f32 %v655_v60, 0.0  ;;  %v413_v2 = vadd.f32 %v412_v59, %v364_v61 }
  0xb2   :  { %v606_v9 = vpop.f32.mrf.mxu3 }
  0xb3   :  { %v996_v3 = vpack.c.bf16 %v671_v1, %v670_v0  ;;  %v462_v4 = vadd.f32 %v461_v43, %v413_v2 }
  0xb4   :  { %v468_v8 = vpop.f32.mrf.mxu2 }
  0xb5   :  { %997 = vst [vmem:[%s1390_s6] sm:$0xff] %v996_v3   ;;  %v636_v10 = vadd.f32 %v599_v44, %v462_v4 }
  0xb6   :  { %v365_v5 = vpop.f32.mrf.mxu0 }
  0xb7   :  { %v414_v6 = vpop.f32.mrf.mxu1  ;;  %v366_v7 = vadd.f32 %v1321_v39, %v365_v5  ;;  %v656_v13 = vadd.f32 %v1328_v53, %v636_v10 }
  0xb9   :  { %v415_v11 = vadd.f32 %v414_v6, %v366_v7  ;;  %v672_v20 = vmax.f32 %v656_v13, 0.0 }
  0xba   :  { %v609_v23 = vpop.f32.mrf.mxu3 }
  0xbb   :  { %v464_v12 = vadd.f32 %v463_v50, %v415_v11 }
  0xbc   :  { %v471_v19 = vpop.f32.mrf.mxu2 }
  0xbd   :  { %v637_v14 = vadd.f32 %v601_v51, %v464_v12 }
  0xbe   :  { %v368_v15 = vpop.f32.mrf.mxu0 }
  0xbf   :  { %v417_v16 = vpop.f32.mrf.mxu1  ;;  %v657_v17 = vadd.f32 %v1328_v53, %v637_v14  ;;  %v369_v18 = vadd.f32 %v1321_v39, %v368_v15 }
  0xc1   :  { %v673_v21 = vmax.f32 %v657_v17, 0.0  ;;  %v418_v22 = vadd.f32 %v417_v16, %v369_v18 }
  0xc2   :  { %v611_v33 = vpop.f32.mrf.mxu3 }
  0xc3   :  { %v1001_v24 = vpack.c.bf16 %v673_v21, %v672_v20  ;;  %v467_v25 = vadd.f32 %v466_v62, %v418_v22 }
  0xc4   :  { %v473_v31 = vpop.f32.mrf.mxu2 }
  0xc5   :  { %1033 = vst [vmem:[%s1390_s6 + $0x8] sm:$0xff] %v1001_v24   ;;  %v638_v29 = vadd.f32 %v604_v63, %v467_v25 }
  0xc6   :  { %v370_v26 = vpop.f32.mrf.mxu0 }
  0xc7   :  { %v419_v27 = vpop.f32.mrf.mxu1  ;;  %v371_v28 = vadd.f32 %v1321_v39, %v370_v26  ;;  %v658_v34 = vadd.f32 %v1328_v53, %v638_v29 }
  0xc9   :  { %v420_v30 = vadd.f32 %v419_v27, %v371_v28  ;;  %v674_v41 = vmax.f32 %v658_v34, 0.0 }
  0xca   :  { %v614_v47 = vpop.f32.mrf.mxu3 }
  0xcb   :  { %v469_v32 = vadd.f32 %v468_v8, %v420_v30 }
  0xcc   :  { %v476_v45 = vpop.f32.mrf.mxu2 }
  0xcd   :  { %v639_v35 = vadd.f32 %v606_v9, %v469_v32 }
  0xce   :  { %v373_v36 = vpop.f32.mrf.mxu0 }
  0xcf   :  { %v422_v37 = vpop.f32.mrf.mxu1  ;;  %v659_v38 = vadd.f32 %v1328_v53, %v639_v35  ;;  %v374_v40 = vadd.f32 %v1321_v39, %v373_v36 }
  0xd1   :  { %v675_v42 = vmax.f32 %v659_v38, 0.0  ;;  %v423_v43 = vadd.f32 %v422_v37, %v374_v40 }
  0xd2   :  { %v616_v62 = vpop.f32.mrf.mxu3 }
  0xd3   :  { %v1006_v44 = vpack.c.bf16 %v675_v42, %v674_v41  ;;  %v472_v46 = vadd.f32 %v471_v19, %v423_v43 }
  0xd4   :  { %v478_v57 = vpop.f32.mrf.mxu2 }
  0xd5   :  { %1034 = vst [vmem:[%s1390_s6 + $0x10] sm:$0xff] %v1006_v44   ;;  %v640_v51 = vadd.f32 %v609_v23, %v472_v46 }
  0xd6   :  { %v375_v48 = vpop.f32.mrf.mxu0 }
  0xd7   :  { %v424_v49 = vpop.f32.mrf.mxu1  ;;  %v376_v50 = vadd.f32 %v1321_v39, %v375_v48  ;;  %v660_v55 = vadd.f32 %v1328_v53, %v640_v51 }
  0xd9   :  { %v425_v52 = vadd.f32 %v424_v49, %v376_v50  ;;  %v676_v63 = vmax.f32 %v660_v55, 0.0 }
  0xda   :  { %v619_v10 = vpop.f32.mrf.mxu3 }
  0xdb   :  { %v474_v54 = vadd.f32 %v473_v31, %v425_v52 }
  0xdc   :  { %v481_v7 = vpop.f32.mrf.mxu2 }
  0xdd   :  { %v641_v56 = vadd.f32 %v611_v33, %v474_v54 }
  0xde   :  { %v378_v58 = vpop.f32.mrf.mxu0 }
  0xdf   :  { %v427_v59 = vpop.f32.mrf.mxu1  ;;  %v661_v60 = vadd.f32 %v1328_v53, %v641_v56  ;;  %v379_v61 = vadd.f32 %v1321_v39, %v378_v58 }
  0xe1   :  { %v677_v0 = vmax.f32 %v661_v60, 0.0  ;;  %v428_v1 = vadd.f32 %v427_v59, %v379_v61 }
  0xe2   :  { %v621_v23 = vpop.f32.mrf.mxu3 }
  0xe3   :  { %v1011_v2 = vpack.c.bf16 %v677_v0, %v676_v63  ;;  %v477_v3 = vadd.f32 %v476_v45, %v428_v1 }
  0xe4   :  { %v483_v21 = vpop.f32.mrf.mxu2 }
  0xe5   :  { %1035 = vst [vmem:[%s1390_s6 + $0x18] sm:$0xff] %v1011_v2   ;;  %v642_v8 = vadd.f32 %v614_v47, %v477_v3 }
  0xe6   :  { %v380_v4 = vpop.f32.mrf.mxu0 }
  0xe7   :  { %v429_v5 = vpop.f32.mrf.mxu1  ;;  %v381_v6 = vadd.f32 %v1321_v39, %v380_v4  ;;  %v662_v12 = vadd.f32 %v1328_v53, %v642_v8 }
  0xe9   :  { %v430_v9 = vadd.f32 %v429_v5, %v381_v6  ;;  %v678_v18 = vmax.f32 %v662_v12, 0.0 }
  0xea   :  { %v624_v34 = vpop.f32.mrf.mxu3 }
  0xeb   :  { %v479_v11 = vadd.f32 %v478_v57, %v430_v9 }
  0xec   :  { %v486_v31 = vpop.f32.mrf.mxu2 }
  0xed   :  { %v643_v13 = vadd.f32 %v616_v62, %v479_v11 }
  0xee   :  { %v383_v14 = vpop.f32.mrf.mxu0 }
  0xef   :  { %v432_v15 = vpop.f32.mrf.mxu1  ;;  %v663_v16 = vadd.f32 %v1328_v53, %v643_v13  ;;  %v384_v17 = vadd.f32 %v1321_v39, %v383_v14 }
  0xf1   :  { %v679_v19 = vmax.f32 %v663_v16, 0.0  ;;  %v433_v20 = vadd.f32 %v432_v15, %v384_v17 }
  0xf2   :  { %v626_v49 = vpop.f32.mrf.mxu3 }
  0xf3   :  { %v1016_v22 = vpack.c.bf16 %v679_v19, %v678_v18  ;;  %v482_v24 = vadd.f32 %v481_v7, %v433_v20 }
  0xf4   :  { %v488_v45 = vpop.f32.mrf.mxu2 }
  0xf5   :  { %1036 = vst [vmem:[%s1390_s6 + $0x20] sm:$0xff] %v1016_v22   ;;  %v644_v28 = vadd.f32 %v619_v10, %v482_v24 }
  0xf6   :  { %v385_v25 = vpop.f32.mrf.mxu0 }
  0xf7   :  { %v434_v26 = vpop.f32.mrf.mxu1  ;;  %v386_v27 = vadd.f32 %v1321_v39, %v385_v25  ;;  %v664_v32 = vadd.f32 %v1328_v53, %v644_v28 }
  0xf9   :  { %v435_v29 = vadd.f32 %v434_v26, %v386_v27  ;;  %v680_v40 = vmax.f32 %v664_v32, 0.0 }
  0xfa   :  { %v629_v0 = vpop.f32.mrf.mxu3 }
  0xfb   :  { %v484_v30 = vadd.f32 %v483_v21, %v435_v29 }
  0xfc   :  { %v491_v60 = vpop.f32.mrf.mxu2 }
  0xfd   :  { %v645_v33 = vadd.f32 %v621_v23, %v484_v30 }
  0xfe   :  { %v388_v35 = vpop.f32.mrf.mxu0 }
  0xff   :  { %v437_v36 = vpop.f32.mrf.mxu1  ;;  %v665_v37 = vadd.f32 %v1328_v53, %v645_v33  ;;  %v389_v38 = vadd.f32 %v1321_v39, %v388_v35 }
 0x101   :  { %v681_v41 = vmax.f32 %v665_v37, 0.0  ;;  %v438_v42 = vadd.f32 %v437_v36, %v389_v38 }
 0x102   :  { %v631_v10 = vpop.f32.mrf.mxu3 }
 0x103   :  { %v1021_v43 = vpack.c.bf16 %v681_v41, %v680_v40  ;;  %v487_v44 = vadd.f32 %v486_v31, %v438_v42 }
 0x104   :  { %v493_v8 = vpop.f32.mrf.mxu2 }
 0x105   :  { %1037 = vst [vmem:[%s1390_s6 + $0x28] sm:$0xff] %v1021_v43   ;;  %v646_v50 = vadd.f32 %v624_v34, %v487_v44 }
 0x106   :  { %v390_v46 = vpop.f32.mrf.mxu0 }
 0x107   :  { %v439_v47 = vpop.f32.mrf.mxu1  ;;  %v391_v48 = vadd.f32 %v1321_v39, %v390_v46  ;;  %v666_v54 = vadd.f32 %v1328_v53, %v646_v50 }
 0x109   :  { %v440_v51 = vadd.f32 %v439_v47, %v391_v48  ;;  %v682_v61 = vmax.f32 %v666_v54, 0.0 }
 0x10b   :  { %v489_v52 = vadd.f32 %v488_v45, %v440_v51 }
 0x10d   :  { %v647_v55 = vadd.f32 %v626_v49, %v489_v52 }
 0x10e   :  { %v393_v56 = vpop.f32.mrf.mxu0 }
 0x10f   :  { %v442_v57 = vpop.f32.mrf.mxu1  ;;  %v667_v58 = vadd.f32 %v1328_v53, %v647_v55  ;;  %v394_v59 = vadd.f32 %v1321_v39, %v393_v56 }
 0x111   :  { %v683_v62 = vmax.f32 %v667_v58, 0.0  ;;  %v443_v63 = vadd.f32 %v442_v57, %v394_v59 }
 0x113   :  { %v1026_v1 = vpack.c.bf16 %v683_v62, %v682_v61  ;;  %v492_v2 = vadd.f32 %v491_v60, %v443_v63 }
 0x115   :  { %1038 = vst [vmem:[%s1390_s6 + $0x30] sm:$0xff] %v1026_v1   ;;  %v648_v6 = vadd.f32 %v629_v0, %v492_v2 }
 0x116   :  { %v395_v3 = vpop.f32.mrf.mxu0 }
 0x117   :  { %v396_v4 = vadd.f32 %v1321_v39, %v395_v3  ;;  %v444_v5 = vpop.f32.mrf.mxu1  ;;  %v668_v11 = vadd.f32 %v1328_v53, %v648_v6 }
 0x119   :  { %v445_v7 = vadd.f32 %v444_v5, %v396_v4  ;;  %v684_v14 = vmax.f32 %v668_v11, 0.0 }
 0x11b   :  { %v494_v9 = vadd.f32 %v493_v8, %v445_v7 }
 0x11d   :  { %v649_v12 = vadd.f32 %v631_v10, %v494_v9 }
 0x11f   :  { %v669_v13 = vadd.f32 %v1328_v53, %v649_v12 }
 0x121   :  { %v685_v15 = vmax.f32 %v669_v13, 0.0 }
 0x123   :  { %v1031_v16 = vpack.c.bf16 %v685_v15, %v684_v14 }
 0x125   :  { %1039 = vst [vmem:[%s1390_s6 + $0x38] sm:$0xff] %v1031_v16  }

// kernel: cifar_attention_resnet_forward.13
= control target key start
LH: loop header
LB: loop body
LE: loop exit
PB: predicated region body
PF: predicated region fallthrough
CT: control target
= control target key end

     0   :  { %vm201_vm0 = vcmask 261120   ;;  %s544_s1 = inlined_call_operand.vmem [shape: bf16[288,128], index: 1, kind: input, shape index: {}]   ;;  %s545_s0 = inlined_call_operand.vmem [shape: bf16[32,288], index: 0, kind: input, shape index: {}]   ;;  %s546_s2 = inlined_call_operand.vmem [shape: f32[1,128], index: 2, kind: input, shape index: {}]   ;;  %s547_s3 = inlined_call_operand.vmem [shape: bf16[32,128], index: 3, kind: output, shape index: {}]  }
   0x1   :  { %v392_v0 = vld [vmem:[%s544_s1 + $0x38] sm:$0xff]  ;;  %v391_v2 = vld [vmem:[%s544_s1 + $0x30] sm:$0xff]  ;;  %v402_v3 = vld [vmem:[%s544_s1 + $0x88] sm:$0xff] }
   0x2   :  { %v400_v1 = vld [vmem:[%s544_s1 + $0x78] sm:$0xff]  ;;  %208 = vmatpush.bf16.msra.mxu0 %v392_v0  ;;  %414 = vmatpush.bf16.msra.mxu3 %v392_v0  ;;  %v399_v4 = vld [vmem:[%s544_s1 + $0x70] sm:$0xff]  ;;  %v401_v5 = vld [vmem:[%s544_s1 + $0x80] sm:$0xff] }
   0x3   :  { %227 = vmatpush.bf16.msra.mxu1 %v400_v1  ;;  %252 = vmatpush.bf16.msra.mxu2 %v402_v3  ;;  %v291_v6 = vld [vmem:[%s545_s0 + $0x8] sm:$0xf]  ;;  %v381_v7 = vld [vmem:[%s545_s0 + $0x10] sm:$0xf0]  ;;  %v389_v11 = vld [vmem:[%s544_s1 + $0x20] sm:$0xff] }
   0x4   :  { %v390_v8 = vld [vmem:[%s544_s1 + $0x28] sm:$0xff]  ;;  %v292_v10 = vor.u32 %v381_v7, %v291_v6  ;;  %v397_v12 = vld [vmem:[%s544_s1 + $0x60] sm:$0xff]  ;;  %v388_v13 = vld [vmem:[%s544_s1 + $0x18] sm:$0xff] }
   0x5   :  { %v398_v9 = vld [vmem:[%s544_s1 + $0x68] sm:$0xff]  ;;  %v396_v14 = vld [vmem:[%s544_s1 + $0x58] sm:$0xff]  ;;  %v387_v15 = vld [vmem:[%s544_s1 + $0x10] sm:$0xff] }
   0x6   :  { %209 = vmatpush.bf16.msra.mxu0 %v391_v2  ;;  %415 = vmatpush.bf16.msra.mxu3 %v391_v2  ;;  %v395_v16 = vld [vmem:[%s544_s1 + $0x50] sm:$0xff]  ;;  %v303_v17 = vld [vmem:[%s545_s0 + $0x20] sm:$0xf]  ;;  %v384_v18 = vld [vmem:[%s545_s0 + $0x28] sm:$0xf0] }
   0x7   :  { %228 = vmatpush.bf16.msra.mxu1 %v399_v4  ;;  %253 = vmatpush.bf16.msra.mxu2 %v401_v5  ;;  %v386_v19 = vld [vmem:[%s544_s1 + $0x8] sm:$0xff]  ;;  %v304_v21 = vor.u32 %v384_v18, %v303_v17  ;;  %v385_v22 = vld [vmem:[%s544_s1] sm:$0xff]  ;;  %v295_v25 = vld [vmem:[%s545_s0 + $0x18] sm:$0xf] }
   0x8   :  { %v394_v20 = vld [vmem:[%s544_s1 + $0x48] sm:$0xff]  ;;  %v283_v23 = vld [vmem:[%s545_s0] sm:$0xf]  ;;  %v383_v26 = vld [vmem:[%s545_s0 + $0x20] sm:$0xf0] }
   0x9   :  { %v380_v24 = vld [vmem:[%s545_s0 + $0x8] sm:$0xf0]  ;;  %v393_v27 = vld [vmem:[%s544_s1 + $0x40] sm:$0xff]  ;;  %v285_v29 = vld [vmem:[%s545_s0 + $0xc] sm:$0xf0]  ;;  %v296_v31 = vor.u32 %v383_v26, %v295_v25 }
   0xa   :  { %210 = vmatpush.bf16.msra.mxu0 %v390_v8  ;;  %416 = vmatpush.bf16.msra.mxu3 %v390_v8  ;;  %v379_v28 = vld [vmem:[%s545_s0 + $0x4] sm:$0xf]  ;;  %v284_v30 = vor.u32 %v380_v24, %v283_v23  ;;  %v382_v33 = vld [vmem:[%s545_s0 + $0x1c] sm:$0xf]  ;;  %v297_v34 = vld [vmem:[%s545_s0 + $0x24] sm:$0xf0] }
   0xb   :  { %229 = vmatpush.bf16.msra.mxu1 %v398_v9  ;;  %377 = vmatmul.msk.bf16.vlgmr.msra.gmra.mxu2 %vm201_vm0, %v292_v10  ;;  %v288_v32 = vor.u32 %v379_v28, %v285_v29  ;;  %v300_v35 = vor.u32 %v382_v33, %v297_v34  ;;  %v422_v37 = vld [vmem:[%s546_s2] ss:$0 sm:$0xff] }
   0xe   :  { %211 = vmatpush.bf16.msra.mxu0 %v389_v11  ;;  %417 = vmatpush.bf16.msra.mxu3 %v389_v11 }
   0xf   :  { %230 = vmatpush.bf16.msra.mxu1 %v397_v12 }
  0x12   :  { %212 = vmatpush.bf16.msra.mxu0 %v388_v13  ;;  %418 = vmatpush.bf16.msra.mxu3 %v388_v13 }
  0x13   :  { %231 = vmatpush.bf16.msra.mxu1 %v396_v14 }
  0x16   :  { %213 = vmatpush.bf16.msra.mxu0 %v387_v15  ;;  %419 = vmatpush.bf16.msra.mxu3 %v387_v15 }
  0x17   :  { %232 = vmatpush.bf16.msra.mxu1 %v395_v16 }
  0x1a   :  { %214 = vmatpush.bf16.msra.mxu0 %v386_v19  ;;  %420 = vmatpush.bf16.msra.mxu3 %v386_v19 }
  0x1b   :  { %233 = vmatpush.bf16.msra.mxu1 %v394_v20  ;;  %378 = vmatmul.msk.bf16.gmra.mxu2 %vm201_vm0, %v304_v21 }
  0x1e   :  { %215 = vmatpush.bf16.msra.mxu0 %v385_v22  ;;  %421 = vmatpush.bf16.msra.mxu3 %v385_v22 }
  0x1f   :  { %234 = vmatpush.bf16.msra.mxu1 %v393_v27 }
  0x21   :  { %216 = vmatmul.bf16.vlgmr.msra.gmra.mxu0 %v284_v30  ;;  %221 = vmatmul.bf16.vlgmr.msra.gmra.mxu3 %v296_v31 }
  0x22   :  { %235 = vmatmul.bf16.vlgmr.msra.gmra.mxu1 %v288_v32 }
  0x32   :  { %240 = vmatmul.bf16.gmra.mxu1 %v300_v35 }
  0x8e   :  { %v255_v36 = vpop.f32.mrf.mxu2 }
  0x96   :  { %v257_v42 = vpop.f32.mrf.mxu2 }
  0x9e   :  { %v217_v38 = vpop.f32.mrf.mxu0  ;;  %v260_v53 = vpop.f32.mrf.mxu2 }
  0x9f   :  { %v236_v39 = vpop.f32.mrf.mxu1  ;;  %v218_v40 = vadd.f32 %v422_v37, %v217_v38 }
  0xa1   :  { %v237_v41 = vadd.f32 %v236_v39, %v218_v40 }
  0xa3   :  { %v256_v46 = vadd.f32 %v255_v36, %v237_v41 }
  0xa4   :  { %v222_v47 = vpop.f32.mrf.mxu3 }
  0xa5   :  { %v265_v50 = vmax.f32 %v256_v46, 0.0  ;;  %v223_v55 = vadd.f32 %v422_v37, %v222_v47 }
  0xa6   :  { %v219_v43 = vpop.f32.mrf.mxu0  ;;  %v262_v62 = vpop.f32.mrf.mxu2 }
  0xa7   :  { %v220_v44 = vadd.f32 %v422_v37, %v219_v43  ;;  %v238_v45 = vpop.f32.mrf.mxu1 }
  0xa9   :  { %v239_v48 = vadd.f32 %v238_v45, %v220_v44 }
  0xab   :  { %v258_v49 = vadd.f32 %v257_v42, %v239_v48 }
  0xac   :  { %v224_v56 = vpop.f32.mrf.mxu3 }
  0xad   :  { %v266_v51 = vmax.f32 %v258_v49, 0.0  ;;  %v225_v58 = vadd.f32 %v422_v37, %v224_v56 }
  0xaf   :  { %v406_v52 = vpack.c.bf16 %v266_v51, %v265_v50  ;;  %v241_v54 = vpop.f32.mrf.mxu1 }
  0xb0   :  { %v242_v57 = vadd.f32 %v241_v54, %v223_v55 }
  0xb1   :  { %407 = vst [vmem:[%s547_s3] sm:$0xff] %v406_v52  }
  0xb2   :  { %v261_v60 = vadd.f32 %v260_v53, %v242_v57 }
  0xb4   :  { %v267_v0 = vmax.f32 %v261_v60, 0.0 }
  0xb7   :  { %v243_v59 = vpop.f32.mrf.mxu1 }
  0xb8   :  { %v244_v61 = vadd.f32 %v243_v59, %v225_v58 }
  0xba   :  { %v263_v63 = vadd.f32 %v262_v62, %v244_v61 }
  0xbc   :  { %v268_v1 = vmax.f32 %v263_v63, 0.0 }
  0xbe   :  { %v411_v2 = vpack.c.bf16 %v268_v1, %v267_v0 }
  0xc0   :  { %413 = vst [vmem:[%s547_s3 + $0x8] sm:$0xff] %v411_v2  }

// kernel: cifar_attention_resnet_forward.15
= control target key start
LH: loop header
LB: loop body
LE: loop exit
PB: predicated region body
PF: predicated region fallthrough
CT: control target
= control target key end

     0   :  { %s217_s0 = inlined_call_operand.vmem [shape: bf16[2,16,128], index: 0, kind: input, shape index: {}]   ;;  %s218_s1 = inlined_call_operand.vmem [shape: f32[128,128], index: 1, kind: input, shape index: {}]   ;;  %s219_s2 = inlined_call_operand.vmem [shape: f32[1,128], index: 2, kind: input, shape index: {}]   ;;  %s220_s3 = inlined_call_operand.hbm [shape: f32[2,128], index: 3, kind: output, shape index: {}]  }
   0x1   :  { %v52_v0 = vld [vmem:[%s218_s1 + $0x78] sm:$0xff]  ;;  %v51_v1 = vld [vmem:[%s218_s1 + $0x70] sm:$0xff]  ;;  %v50_v2 = vld [vmem:[%s218_s1 + $0x68] sm:$0xff] }
   0x2   :  { %62 = vmatpush.msra.mxu0 %v52_v0  ;;  %v49_v3 = vld [vmem:[%s218_s1 + $0x60] sm:$0xff]  ;;  %v107_v5 = vld [vmem:[%s217_s0 + $0x8] sm:$0xff]   ;;  %v48_v6 = vld [vmem:[%s218_s1 + $0x58] sm:$0xff] }
   0x3   :  { %v100_v4 = vld [vmem:[%s217_s0] sm:$0xff]   ;;  %v105_v9 = vunpack.c.l.bf16 %v107_v5  ;;  %v106_v10 = vunpack.c.h.bf16 %v107_v5 }
   0x4   :  { %63 = vmatpush.msra.mxu0 %v51_v1  ;;  %v101_v7 = vunpack.c.l.bf16 %v100_v4  ;;  %v102_v8 = vunpack.c.h.bf16 %v100_v4 }
   0x6   :  { %64 = vmatpush.msra.mxu0 %v50_v2 }
   0x7   :  { %8 = vsyncpa [#allocation3], 0  ;;  %v47_v11 = vld [vmem:[%s218_s1 + $0x50] sm:$0xff]  ;;  %v23_v12 = vadd.f32 %v102_v8, %v101_v7  ;;  %v30_v13 = vadd.f32 %v106_v10, %v105_v9  ;;  %v46_v14 = vld [vmem:[%s218_s1 + $0x48] sm:$0xff]  ;;  %vm59_vm0 = vcmask 1041409   ;;  %s136_s22 = smov [#allocation2]  }
   0x8   :  { %65 = vmatpush.msra.mxu0 %v49_v3  ;;  %v45_v17 = vld [vmem:[%s218_s1 + $0x40] sm:$0xff]  ;;  %v44_v20 = vld [vmem:[%s218_s1 + $0x38] sm:$0xff]  ;;  %v43_v23 = vld [vmem:[%s218_s1 + $0x30] sm:$0xff]  ;;  %s88_s23 = sshll.u32 %s136_s22, 4  ;;  %s90_s26 = sshll.u32 %s220_s3, 4  ;;  %s89_s23 = int_to_ptr.vmem [resolvable:$true] %s88_s23  ;;  %s91_s26 = int_to_ptr.hbm [resolvable:$true] %s90_s26 }
   0x9   :  { %v24_v15 = vrot.slane %v23_v12, 4  ;;  %v31_v16 = vrot.slane %v30_v13, 4  ;;  %v42_v26 = vld [vmem:[%s218_s1 + $0x28] sm:$0xff]  ;;  %v41_v27 = vld [vmem:[%s218_s1 + $0x20] sm:$0xff]  ;;  %v40_v30 = vld [vmem:[%s218_s1 + $0x18] sm:$0xff] }
   0xa   :  { %66 = vmatpush.msra.mxu0 %v48_v6  ;;  %v39_v31 = vld [vmem:[%s218_s1 + $0x10] sm:$0xff]  ;;  %v38_v34 = vld [vmem:[%s218_s1 + $0x8] sm:$0xff]  ;;  %v37_v35 = vld [vmem:[%s218_s1] sm:$0xff] }
   0xb   :  { %v25_v18 = vadd.f32 %v24_v15, %v23_v12  ;;  %v32_v19 = vadd.f32 %v31_v16, %v30_v13  ;;  %v109_v37 = vld [vmem:[%s219_s2] ss:$0 sm:$0xff] }
   0xc   :  { %67 = vmatpush.msra.mxu0 %v47_v11 }
   0xd   :  { %v26_v21 = vrot.slane %v25_v18, 2  ;;  %v33_v22 = vrot.slane %v32_v19, 2 }
   0xe   :  { %68 = vmatpush.msra.mxu0 %v46_v14 }
   0xf   :  { %v27_v24 = vadd.f32 %v26_v21, %v25_v18  ;;  %v34_v25 = vadd.f32 %v33_v22, %v32_v19 }
  0x10   :  { %69 = vmatpush.msra.mxu0 %v45_v17 }
  0x11   :  { %v28_v28 = vrot.slane %v27_v24, 1  ;;  %v35_v29 = vrot.slane %v34_v25, 1 }
  0x12   :  { %70 = vmatpush.msra.mxu0 %v44_v20 }
  0x13   :  { %v29_v32 = vadd.f32 %v28_v28, %v27_v24  ;;  %v36_v33 = vadd.f32 %v35_v29, %v34_v25 }
  0x14   :  { %71 = vmatpush.msra.mxu0 %v43_v23 }
  0x15   :  { %v60_v36 = vsel %vm59_vm0, %v36_v33, %v29_v32 }
  0x16   :  { %72 = vmatpush.msra.mxu0 %v42_v26 }
  0x18   :  { %73 = vmatpush.msra.mxu0 %v41_v27 }
  0x1a   :  { %74 = vmatpush.msra.mxu0 %v40_v30 }
  0x1c   :  { %75 = vmatpush.msra.mxu0 %v39_v31 }
  0x1e   :  { %76 = vmatpush.msra.mxu0 %v38_v34 }
  0x20   :  { %77 = vmatpush.msra.mxu0 %v37_v35 }
  0x21   :  { %78 = vmatmul.f32.vlgmr.msra.gmra.mxu0 %v60_v36 }
  0x9e   :  { %v79_v38 = vpop.f32.mrf.mxu0 }
  0x9f   :  { %v80_v39 = vadd.f32 %v109_v37, %v79_v38 }
  0xa1   :  { %82 = vst [vmem:[#allocation2] sm:$0x3] %v80_v39 }
  0xa2   :  { %93 = dma.vmem_to_hbm [thread:$0]  %s89_s23, 32, %s91_s26, [#allocation3]  }
  0xa3   :  { %134 = dma.done.wait [#allocation3], 32  }
  0xa4   :  { %135 = vsyncadd [#allocation3], 4294967264 }
  0xa5   :  { %98 = vsyncpa [#allocation3], 1 }

// kernel: cifar_attention_resnet_forward.14
= control target key start
LH: loop header
LB: loop body
LE: loop exit
PB: predicated region body
PF: predicated region fallthrough
CT: control target
= control target key end

     0   :  { %vm378_vm0 = vcmask 523264   ;;  %vm510_vm1 = vcmask 261120   ;;  %s1064_s1 = inlined_call_operand.vmem [shape: bf16[576,128], index: 1, kind: input, shape index: {}]   ;;  %s1065_s2 = inlined_call_operand.vmem [shape: f32[1,128], index: 2, kind: input, shape index: {}]   ;;  %s1066_s0 = inlined_call_operand.vmem [shape: bf16[32,576], index: 0, kind: input, shape index: {}]   ;;  %s1067_s4 = inlined_call_operand.vmem [shape: bf16[32,128], index: 4, kind: input, shape index: {}]   ;;  %s1068_s3 = inlined_call_operand.vmem [shape: bf16[32,32], index: 3, kind: input, shape index: {}]   ;;  %s1069_s5 = inlined_call_operand.vmem [shape: f32[1,128], index: 5, kind: input, shape index: {}]   ;;  %s1070_s6 = inlined_call_operand.vmem [shape: bf16[32,128], index: 6, kind: output, shape index: {}]  }
   0x1   :  { %v785_v0 = vld [vmem:[%s1064_s1 + $0x38] sm:$0xff]  ;;  %v784_v4 = vld [vmem:[%s1064_s1 + $0x30] sm:$0xff]  ;;  %v783_v8 = vld [vmem:[%s1064_s1 + $0x28] sm:$0xff] }
   0x2   :  { %v793_v1 = vld [vmem:[%s1064_s1 + $0x78] sm:$0xff]  ;;  %385 = vmatpush.bf16.msra.mxu0 %v785_v0  ;;  %v792_v5 = vld [vmem:[%s1064_s1 + $0x70] sm:$0xff]  ;;  %v791_v9 = vld [vmem:[%s1064_s1 + $0x68] sm:$0xff] }
   0x3   :  { %v801_v2 = vld [vmem:[%s1064_s1 + $0xb8] sm:$0xff]  ;;  %404 = vmatpush.bf16.msra.mxu1 %v793_v1  ;;  %v800_v6 = vld [vmem:[%s1064_s1 + $0xb0] sm:$0xff]  ;;  %v799_v10 = vld [vmem:[%s1064_s1 + $0xa8] sm:$0xff] }
   0x4   :  { %v809_v3 = vld [vmem:[%s1064_s1 + $0xf8] sm:$0xff]  ;;  %423 = vmatpush.bf16.msra.mxu2 %v801_v2  ;;  %v808_v7 = vld [vmem:[%s1064_s1 + $0xf0] sm:$0xff]  ;;  %v807_v11 = vld [vmem:[%s1064_s1 + $0xe8] sm:$0xff] }
   0x5   :  { %442 = vmatpush.bf16.msra.mxu3 %v809_v3  ;;  %v782_v12 = vld [vmem:[%s1064_s1 + $0x20] sm:$0xff]  ;;  %v781_v16 = vld [vmem:[%s1064_s1 + $0x18] sm:$0xff]  ;;  %v780_v20 = vld [vmem:[%s1064_s1 + $0x10] sm:$0xff] }
   0x6   :  { %386 = vmatpush.bf16.msra.mxu0 %v784_v4  ;;  %v790_v13 = vld [vmem:[%s1064_s1 + $0x60] sm:$0xff]  ;;  %v789_v17 = vld [vmem:[%s1064_s1 + $0x58] sm:$0xff]  ;;  %v788_v21 = vld [vmem:[%s1064_s1 + $0x50] sm:$0xff] }
   0x7   :  { %405 = vmatpush.bf16.msra.mxu1 %v792_v5  ;;  %v798_v14 = vld [vmem:[%s1064_s1 + $0xa0] sm:$0xff]  ;;  %v797_v18 = vld [vmem:[%s1064_s1 + $0x98] sm:$0xff]  ;;  %v796_v22 = vld [vmem:[%s1064_s1 + $0x90] sm:$0xff] }
   0x8   :  { %424 = vmatpush.bf16.msra.mxu2 %v800_v6  ;;  %v806_v15 = vld [vmem:[%s1064_s1 + $0xe0] sm:$0xff]  ;;  %v805_v19 = vld [vmem:[%s1064_s1 + $0xd8] sm:$0xff]  ;;  %v804_v23 = vld [vmem:[%s1064_s1 + $0xd0] sm:$0xff] }
   0x9   :  { %443 = vmatpush.bf16.msra.mxu3 %v808_v7  ;;  %v779_v24 = vld [vmem:[%s1064_s1 + $0x8] sm:$0xff]  ;;  %v778_v28 = vld [vmem:[%s1064_s1] sm:$0xff]  ;;  %v770_v33 = vld [vmem:[%s1066_s0 + $0x10] sm:$0xf0] }
   0xa   :  { %387 = vmatpush.bf16.msra.mxu0 %v783_v8  ;;  %v787_v25 = vld [vmem:[%s1064_s1 + $0x48] sm:$0xff]  ;;  %v786_v29 = vld [vmem:[%s1064_s1 + $0x40] sm:$0xff]  ;;  %v568_v35 = vld [vmem:[%s1066_s0 + $0x14] sm:$0xf0] }
   0xb   :  { %406 = vmatpush.bf16.msra.mxu1 %v791_v9  ;;  %v795_v26 = vld [vmem:[%s1064_s1 + $0x88] sm:$0xff]  ;;  %v794_v30 = vld [vmem:[%s1064_s1 + $0x80] sm:$0xff]  ;;  %v771_v37 = vld [vmem:[%s1066_s0 + $0x18] sm:$0xf0] }
   0xc   :  { %425 = vmatpush.bf16.msra.mxu2 %v799_v10  ;;  %v803_v27 = vld [vmem:[%s1064_s1 + $0xc8] sm:$0xff]  ;;  %v802_v31 = vld [vmem:[%s1064_s1 + $0xc0] sm:$0xff]  ;;  %v813_v40 = vld [vmem:[%s1064_s1 + $0x118] sm:$0xff] }
   0xd   :  { %444 = vmatpush.bf16.msra.mxu3 %v807_v11  ;;  %v566_v32 = vld [vmem:[%s1066_s0] sm:$0xf]  ;;  %v768_v34 = vld [vmem:[%s1066_s0 + $0x4] sm:$0xf]  ;;  %v574_v36 = vld [vmem:[%s1066_s0 + $0x8] sm:$0xf] }
   0xe   :  { %388 = vmatpush.bf16.msra.mxu0 %v782_v12  ;;  %v769_v38 = vld [vmem:[%s1066_s0 + $0xc] sm:$0xf]  ;;  %v576_v39 = vld [vmem:[%s1066_s0 + $0x1c] sm:$0xf0]  ;;  %v567_v42 = vor.u32 %v770_v33, %v566_v32  ;;  %v571_v43 = vor.u32 %v768_v34, %v568_v35  ;;  %v575_v44 = vor.u32 %v771_v37, %v574_v36  ;;  %v812_v46 = vld [vmem:[%s1064_s1 + $0x110] sm:$0xff] }
   0xf   :  { %407 = vmatpush.bf16.msra.mxu1 %v790_v13  ;;  %v817_v41 = vld [vmem:[%s1067_s4 + $0x8] sm:$0xff]  ;;  %v579_v45 = vor.u32 %v769_v38, %v576_v39  ;;  %v816_v47 = vld [vmem:[%s1067_s4] sm:$0xff]  ;;  %v775_v51 = vld [vmem:[%s1066_s0 + $0x38] sm:$0xf0] }
  0x10   :  { %426 = vmatpush.bf16.msra.mxu2 %v798_v14  ;;  %v811_v48 = vld [vmem:[%s1064_s1 + $0x108] sm:$0xff]  ;;  %v810_v49 = vld [vmem:[%s1064_s1 + $0x100] sm:$0xff]  ;;  %v594_v54 = vld [vmem:[%s1066_s0 + $0x30] sm:$0xf] }
  0x11   :  { %445 = vmatpush.bf16.msra.mxu3 %v806_v15  ;;  %v586_v50 = vld [vmem:[%s1066_s0 + $0x28] sm:$0xf]  ;;  %v773_v52 = vld [vmem:[%s1066_s0 + $0x2c] sm:$0xf]  ;;  %v588_v53 = vld [vmem:[%s1066_s0 + $0x3c] sm:$0xf0] }
  0x12   :  { %389 = vmatpush.bf16.msra.mxu0 %v781_v16  ;;  %v776_v55 = vld [vmem:[%s1066_s0 + $0x40] sm:$0xf0]  ;;  %v774_v56 = vld [vmem:[%s1066_s0 + $0x34] sm:$0xf]  ;;  %v596_v57 = vld [vmem:[%s1066_s0 + $0x44] sm:$0xf0]  ;;  %v587_v58 = vor.u32 %v775_v51, %v586_v50  ;;  %v591_v59 = vor.u32 %v773_v52, %v588_v53 }
  0x13   :  { %408 = vmatpush.bf16.msra.mxu1 %v789_v17  ;;  %v595_v60 = vor.u32 %v776_v55, %v594_v54  ;;  %v599_v61 = vor.u32 %v774_v56, %v596_v57  ;;  %v582_v62 = vld [vmem:[%s1066_s0 + $0x10] sm:$0xf]  ;;  %v772_v63 = vld [vmem:[%s1066_s0 + $0x20] sm:$0xf0]  ;;  %v602_v0 = vld [vmem:[%s1066_s0 + $0x38] sm:$0xf] }
  0x14   :  { %427 = vmatpush.bf16.msra.mxu2 %v797_v18  ;;  %v777_v1 = vld [vmem:[%s1066_s0 + $0x48] sm:$0xf0]  ;;  %v583_v2 = vor.u32 %v772_v63, %v582_v62  ;;  %v814_v3 = vld [vmem:[%s1068_s3] sm:$0xff] }
  0x15   :  { %446 = vmatpush.bf16.msra.mxu3 %v805_v19  ;;  %v603_v4 = vor.u32 %v777_v1, %v602_v0  ;;  %v815_v5 = vld [vmem:[%s1068_s3 + $0x8] sm:$0xff]  ;;  %v835_v16 = vld [vmem:[%s1065_s2] ss:$0 sm:$0xff] }
  0x16   :  { %390 = vmatpush.bf16.msra.mxu0 %v780_v20  ;;  %v836_v39 = vld [vmem:[%s1069_s5] ss:$0 sm:$0xff] }
  0x17   :  { %409 = vmatpush.bf16.msra.mxu1 %v788_v21 }
  0x18   :  { %428 = vmatpush.bf16.msra.mxu2 %v796_v22 }
  0x19   :  { %447 = vmatpush.bf16.msra.mxu3 %v804_v23 }
  0x1a   :  { %391 = vmatpush.bf16.msra.mxu0 %v779_v24 }
  0x1b   :  { %410 = vmatpush.bf16.msra.mxu1 %v787_v25 }
  0x1c   :  { %429 = vmatpush.bf16.msra.mxu2 %v795_v26 }
  0x1d   :  { %448 = vmatpush.bf16.msra.mxu3 %v803_v27 }
  0x1e   :  { %392 = vmatpush.bf16.msra.mxu0 %v778_v28 }
  0x1f   :  { %411 = vmatpush.bf16.msra.mxu1 %v786_v29 }
  0x20   :  { %430 = vmatpush.bf16.msra.mxu2 %v794_v30 }
  0x21   :  { %449 = vmatpush.bf16.msra.mxu3 %v802_v31  ;;  %393 = vmatmul.bf16.vlgmr.msra.gmra.mxu0 %v567_v42 }
  0x22   :  { %412 = vmatmul.bf16.vlgmr.msra.gmra.mxu1 %v571_v43  ;;  %465 = vmatpush.bf16.msrb.mxu0 %v813_v40 }
  0x23   :  { %431 = vmatmul.bf16.vlgmr.msra.gmra.mxu2 %v575_v44  ;;  %523 = vmatpush.bf16.msrb.mxu1 %v817_v41 }
  0x24   :  { %829 = vmatpush.bf16.msrb.mxu2 %v813_v40  ;;  %450 = vmatmul.bf16.vlgmr.msra.gmra.mxu3 %v579_v45 }
  0x25   :  { %833 = vmatpush.bf16.msrb.mxu3 %v817_v41 }
  0x26   :  { %466 = vmatpush.bf16.msrb.mxu0 %v812_v46 }
  0x27   :  { %524 = vmatpush.bf16.msrb.mxu1 %v816_v47 }
  0x28   :  { %830 = vmatpush.bf16.msrb.mxu2 %v812_v46 }
  0x29   :  { %834 = vmatpush.bf16.msrb.mxu3 %v816_v47 }
  0x2a   :  { %467 = vmatpush.bf16.msrb.mxu0 %v811_v48 }
  0x2c   :  { %831 = vmatpush.bf16.msrb.mxu2 %v811_v48 }
  0x2e   :  { %468 = vmatpush.bf16.msrb.mxu0 %v810_v49 }
  0x30   :  { %832 = vmatpush.bf16.msrb.mxu2 %v810_v49 }
  0x31   :  { %398 = vmatmul.bf16.gmra.mxu0 %v587_v58 }
  0x32   :  { %417 = vmatmul.bf16.gmra.mxu1 %v591_v59 }
  0x33   :  { %436 = vmatmul.bf16.gmra.mxu2 %v595_v60 }
  0x34   :  { %455 = vmatmul.bf16.gmra.mxu3 %v599_v61 }
  0x41   :  { %748 = vmatmul.msk.bf16.vlgmr.msrb.gmra.mxu0 %vm378_vm0, %v583_v2 }
  0x42   :  { %766 = vmatmul.msk.bf16.vlgmr.msrb.gmra.mxu1 %vm510_vm1, %v814_v3 }
  0x43   :  { %749 = vmatmul.msk.bf16.vlgmr.msrb.gmra.mxu2 %vm378_vm0, %v603_v4 }
  0x44   :  { %767 = vmatmul.msk.bf16.vlgmr.msrb.gmra.mxu3 %vm510_vm1, %v815_v5 }
  0x9e   :  { %v394_v6 = vpop.f32.mrf.mxu0 }
  0x9f   :  { %v413_v7 = vpop.f32.mrf.mxu1  ;;  %v395_v17 = vadd.f32 %v835_v16, %v394_v6 }
  0xa1   :  { %v414_v22 = vadd.f32 %v413_v7, %v395_v17 }
  0xa6   :  { %v432_v8 = vpop.f32.mrf.mxu2  ;;  %v396_v10 = vpop.f32.mrf.mxu0 }
  0xa7   :  { %v451_v9 = vpop.f32.mrf.mxu3  ;;  %v415_v11 = vpop.f32.mrf.mxu1  ;;  %v433_v24 = vadd.f32 %v432_v8, %v414_v22  ;;  %v397_v25 = vadd.f32 %v835_v16, %v396_v10 }
  0xa9   :  { %v452_v31 = vadd.f32 %v451_v9, %v433_v24  ;;  %v416_v32 = vadd.f32 %v415_v11, %v397_v25 }
  0xae   :  { %v434_v12 = vpop.f32.mrf.mxu2  ;;  %v399_v14 = vpop.f32.mrf.mxu0 }
  0xaf   :  { %v453_v13 = vpop.f32.mrf.mxu3  ;;  %v418_v15 = vpop.f32.mrf.mxu1  ;;  %v400_v23 = vadd.f32 %v835_v16, %v399_v14  ;;  %v435_v33 = vadd.f32 %v434_v12, %v416_v32 }
  0xb1   :  { %v419_v28 = vadd.f32 %v418_v15, %v400_v23  ;;  %v454_v37 = vadd.f32 %v453_v13, %v435_v33 }
  0xb6   :  { %v437_v18 = vpop.f32.mrf.mxu2  ;;  %v401_v20 = vpop.f32.mrf.mxu0 }
  0xb7   :  { %v456_v19 = vpop.f32.mrf.mxu3  ;;  %v420_v21 = vpop.f32.mrf.mxu1  ;;  %v438_v35 = vadd.f32 %v437_v18, %v419_v28  ;;  %v402_v36 = vadd.f32 %v835_v16, %v401_v20 }
  0xb9   :  { %v457_v42 = vadd.f32 %v456_v19, %v438_v35  ;;  %v421_v43 = vadd.f32 %v420_v21, %v402_v36 }
  0xbe   :  { %v439_v26 = vpop.f32.mrf.mxu2  ;;  %v470_v29 = vpop.f32.mrf.mxu0 }
  0xbf   :  { %v458_v27 = vpop.f32.mrf.mxu3  ;;  %v526_v30 = vpop.f32.mrf.mxu1  ;;  %v471_v34 = vadd.f32 %v470_v29, %v452_v31  ;;  %v440_v46 = vadd.f32 %v439_v26, %v421_v43 }
  0xc1   :  { %v536_v38 = vadd.f32 %v526_v30, %v471_v34  ;;  %v459_v52 = vadd.f32 %v458_v27, %v440_v46 }
  0xc3   :  { %v544_v49 = vadd.f32 %v836_v39, %v536_v38 }
  0xc5   :  { %v548_v54 = vmax.f32 %v544_v49, 0.0 }
  0xc6   :  { %v475_v40 = vpop.f32.mrf.mxu2  ;;  %v472_v44 = vpop.f32.mrf.mxu0 }
  0xc7   :  { %v531_v41 = vpop.f32.mrf.mxu3  ;;  %v473_v45 = vadd.f32 %v472_v44, %v454_v37  ;;  %v476_v47 = vadd.f32 %v475_v40, %v457_v42  ;;  %v528_v48 = vpop.f32.mrf.mxu1 }
  0xc9   :  { %v537_v50 = vadd.f32 %v528_v48, %v473_v45  ;;  %v538_v53 = vadd.f32 %v531_v41, %v476_v47 }
  0xcb   :  { %v545_v51 = vadd.f32 %v836_v39, %v537_v50  ;;  %v546_v60 = vadd.f32 %v836_v39, %v538_v53 }
  0xcd   :  { %v549_v55 = vmax.f32 %v545_v51, 0.0  ;;  %v550_v63 = vmax.f32 %v546_v60, 0.0 }
  0xce   :  { %v477_v56 = vpop.f32.mrf.mxu2 }
  0xcf   :  { %v478_v57 = vadd.f32 %v477_v56, %v459_v52  ;;  %v821_v58 = vpack.c.bf16 %v549_v55, %v548_v54  ;;  %v533_v59 = vpop.f32.mrf.mxu3 }
  0xd1   :  { %v539_v61 = vadd.f32 %v533_v59, %v478_v57  ;;  %822 = vst [vmem:[%s1070_s6] sm:$0xff] %v821_v58  }
  0xd3   :  { %v547_v62 = vadd.f32 %v836_v39, %v539_v61 }
  0xd5   :  { %v551_v0 = vmax.f32 %v547_v62, 0.0 }
  0xd7   :  { %v826_v1 = vpack.c.bf16 %v551_v0, %v550_v63 }
  0xd9   :  { %828 = vst [vmem:[%s1070_s6 + $0x8] sm:$0xff] %v826_v1  }

</bundles_post_ra>
